<compile_context>
chip_gen: v6e
topology: v6e:2x2x1
jax: 0.10.0
libtpu: 0.0.40
codegen_flags: <defaults>
</compile_context>

<pallas_src>
import jax
import jax.numpy as jnp
from jax.experimental import pallas as pl
from jax.experimental.pallas import tpu as pltpu


def _round_up(x, m):
    return ((x + m - 1) // m) * m


def _pad2(a, rows, cols):
    return jnp.pad(a, ((0, rows - a.shape[0]), (0, cols - a.shape[1])))


def _default_vmem_limit_bytes():
    """~80% of physical VMEM (=> ~102 MiB on v5e/v6e, ~51 MiB on v7x)."""
    try:
        cap = int(pltpu.get_tpu_info().vmem_capacity_bytes)
        return int(cap * 0.8)
    except Exception:
        return 48 * 1024 * 1024


# ----------------------------------------------------------------------------- kernel
def _cheb_kernel(lap_ref, x_hbm, wt_ref, out_hbm,
                 pa_ref, pb_ref, sum_ref, acc_ref, otile_ref, sem_ref):
    """One grid point = one (chain step s, output-row tile i, contraction tile k).

    lap_ref : [Tm, Tk]            bf16 streamed operator tile (L for step 0, 2*Lnorm after)
    x_hbm   : [N_pad, Cin_pad]    f32, raw HBM (memory_space=ANY) — DMA'd once at init
    wt_ref  : [Cin_pad, Cout_pad] bf16 resident pre-transposed weight
    out_hbm : [N_pad, Cout_pad]   f32, raw HBM — written via DMA on the last step only
    pa/pb   : [N_pad, Cin_pad]    bf16 chain-state ping-pong (MXU RHS)
    sum_ref : [N_pad, Cin_pad]    f32 running sum X + q1 + q2 + ...
    acc_ref : [Tm, Cin_pad]       f32 MXU accumulator for the current row tile
    otile   : [Tm, Cout_pad]      f32 staging tile for the final projection + ReLU
    sem_ref : DMA semaphores (0: feature load, 1: output store)
    """
    s = pl.program_id(0)           # chain step (outermost: sequential dependency)
    i = pl.program_id(1)           # output row tile
    k = pl.program_id(2)           # contraction tile (reduction axis, innermost)
    n_steps = pl.num_programs(0)
    n_k = pl.num_programs(2)

    tm = acc_ref.shape[0]
    tk = lap_ref.shape[1]
    row0 = pl.multiple_of(i * tm, tm)
    col0 = pl.multiple_of(k * tk, tk)

    # One-time init at the very first grid point: pull the padded f32 features from
    # HBM straight into the f32 running sum (the q0 term, kept at full precision)
    # and seed the bf16 chain state with bf16(X).
    @pl.when((s == 0) & (i == 0) & (k == 0))
    def _():
        cp = pltpu.make_async_copy(x_hbm, sum_ref, sem_ref.at[0])
        cp.start()
        cp.wait()
        pb_ref[...] = sum_ref[...].astype(pb_ref.dtype)

    # Reset the row-tile accumulator at the start of each reduction sweep.
    @pl.when(k == 0)
    def _():
        acc_ref[...] = jnp.zeros_like(acc_ref)

    # Ping-pong: even steps read pb / write pa, odd steps read pa / write pb.
    read_b = (s % 2) == 0

    def _accum(src_ref):
        # bf16 x bf16 -> native MXU path, f32 accumulation.
        acc_ref[...] += jnp.dot(lap_ref[...], src_ref[pl.ds(col0, tk), :],
                                preferred_element_type=jnp.float32)

    @pl.when(read_b)
    def _():
        _accum(pb_ref)

    @pl.when(~read_b)
    def _():
        _accum(pa_ref)

    # Finalize this row tile of the current chain step.
    @pl.when(k == n_k - 1)
    def _():
        q_new = acc_ref[...]
        total = sum_ref[pl.ds(row0, tm), :] + q_new

        # Persist state / running sum only if another chain step still needs them.
        @pl.when(s + 1 < n_steps)
        def _():
            sum_ref[pl.ds(row0, tm), :] = total

            @pl.when(read_b)
            def _():
                pa_ref[pl.ds(row0, tm), :] = q_new.astype(pa_ref.dtype)

            @pl.when(~read_b)
            def _():
                pb_ref[pl.ds(row0, tm), :] = q_new.astype(pb_ref.dtype)

        # Last chain step: apply the (pre-transposed, bf16) weight once, ReLU, and
        # DMA the finished row tile to HBM.  Earlier steps write nothing to HBM.
        @pl.when(s == n_steps - 1)
        def _():
            proj = jnp.dot(total.astype(wt_ref.dtype), wt_ref[...],
                           preferred_element_type=jnp.float32)
            otile_ref[...] = jnp.maximum(proj, 0.0).astype(otile_ref.dtype)
            out_cp = pltpu.make_async_copy(
                otile_ref, out_hbm.at[pl.ds(row0, tm), :], sem_ref.at[1])
            out_cp.start()
            out_cp.wait()


# ----------------------------------------------------------------------------- wrapper
def prepare_graph_operators(lap, lap_norm, *, pad_to=512, dtype=jnp.bfloat16):
    """One-time (graph-construction) packing of the dense Laplacian operators.

    Returns a [2, N_pad, N_pad] stack (slot 0 = L, slot 1 = 2 * L_norm with the
    per-step 2x folded in), zero-padded to a multiple of `pad_to` so any tile size
    dividing `pad_to` (128/256/512) can be used without re-prep.  bf16 storage
    (default) halves HBM traffic of this bandwidth-bound kernel; pass
    dtype=jnp.float32 for very deep chains if operator rounding matters.
    """
    n = lap.shape[0]
    n_pad = _round_up(n, pad_to)
    lap_p = _pad2(lap.astype(jnp.float32), n_pad, n_pad)
    lapn_p = _pad2(2.0 * lap_norm.astype(jnp.float32), n_pad, n_pad)
    return jnp.stack([lap_p, lapn_p]).astype(dtype)


def chebyshev_conv(x, weight, lap_stack, *, depth=2, tm=512, tk=512,
                   vmem_limit_bytes=None):
    """x: [N, Cin], weight (nn.Linear layout): [Cout, Cin],
    lap_stack: [2, N_pad, N_pad] from prepare_graph_operators  ->  [N, Cout].

    tm/tk must be multiples of 128 and divide N_pad.  512 is a good default on all
    current generations (v5e/v6e/v7x); drop to 256 only if the VMEM budget is tight.
    """
    n, c_in = x.shape
    c_out = weight.shape[0]
    n_pad = lap_stack.shape[1]
    assert tm % 128 == 0 and tk % 128 == 0, "tile sizes must be multiples of 128"
    assert n_pad >= n and n_pad % tm == 0 and n_pad % tk == 0, (
        f"lap_stack padding ({n_pad}) must be divisible by tm={tm} and tk={tk}")

    cin_pad = _round_up(max(c_in, 1), 128)
    cout_pad = _round_up(max(c_out, 1), 128)

    # Number of laplacian_action applications in the original forward:
    # one unconditional + (depth - 2) loop iterations.
    n_steps = 1 + max(0, depth - 2)

    x_p = _pad2(x.astype(jnp.float32), n_pad, cin_pad)
    # Pre-transpose the nn.Linear weight ONCE outside the kernel (never in-kernel);
    # stored bf16 since it is only ever an MXU operand.
    wt_p = _pad2(weight.astype(jnp.float32).T, cin_pad, cout_pad).astype(jnp.bfloat16)

    if vmem_limit_bytes is None:
        vmem_limit_bytes = _default_vmem_limit_bytes()

    grid = (n_steps, n_pad // tm, n_pad // tk)

    out_p = pl.pallas_call(
        _cheb_kernel,
        out_shape=jax.ShapeDtypeStruct((n_pad, cout_pad), jnp.float32),
        grid_spec=pltpu.PrefetchScalarGridSpec(
            num_scalar_prefetch=0,
            grid=grid,
            in_specs=[
                # Stream (Tm, Tk) operator tiles (bf16): operator 0 (L) for step 0,
                # operator 1 (2*Lnorm) afterwards — chosen in the index_map so only
                # ONE operator is DMA'd per grid point.  Auto double-buffered.
                pl.BlockSpec((None, tm, tk),
                             lambda s, i, k: (jnp.minimum(s, 1), i, k)),
                # Node features stay in HBM (no resident double-buffered copy);
                # they are DMA'd once into scratch at the first grid point.
                pl.BlockSpec(memory_space=pl.ANY),
                # Small pre-transposed bf16 weight: resident.
                pl.BlockSpec((cin_pad, cout_pad), lambda s, i, k: (0, 0)),
            ],
            # Output stays in HBM and is written by explicit DMA on the last chain
            # step only -> no garbage writebacks for earlier steps.
            out_specs=pl.BlockSpec(memory_space=pl.ANY),
            scratch_shapes=[
                pltpu.VMEM((n_pad, cin_pad), jnp.bfloat16),   # pa: chain state (ping)
                pltpu.VMEM((n_pad, cin_pad), jnp.bfloat16),   # pb: chain state (pong)
                pltpu.VMEM((n_pad, cin_pad), jnp.float32),    # sum: X + q1 + q2 + ...
                pltpu.VMEM((tm, cin_pad), jnp.float32),       # acc: row-tile partial
                pltpu.VMEM((tm, cout_pad), jnp.float32),      # otile: projected rows
                pltpu.SemaphoreType.DMA((2,)),                # 0: x load, 1: out store
            ],
        ),
        compiler_params=pltpu.CompilerParams(
            # The chain-step axis carries a true sequential dependency through the
            # scratch state, and the row/k axes share that scratch, so all axes stay
            # "arbitrary".
            # TODO(synk): v7x dual-TensorCore split of the row-tile axis (core_map +
            # VMEM_SHARED chain state with a core_barrier per step) is not implemented.
            dimension_semantics=("arbitrary", "arbitrary", "arbitrary"),
            vmem_limit_bytes=vmem_limit_bytes,
        ),
    )(lap_stack, x_p, wt_p)

    return out_p[:n, :c_out].astype(x.dtype)


# ----------------------------------------------------------------------------- demo
def _build_laplacians(key, n, p=0.3):
    """Synthetic symmetric adjacency -> (L = D - A, L_norm = I - D^-1/2 A D^-1/2)."""
    a = jax.random.bernoulli(key, p, (n, n)).astype(jnp.float32)
    a = jnp.triu(a, k=1)
    a = a + a.T                                   # symmetric, zero diagonal
    ring = jnp.roll(jnp.eye(n, dtype=jnp.float32), 1, axis=1)
    a = jnp.clip(a + ring + ring.T, 0.0, 1.0)     # no isolated nodes
    deg = a.sum(axis=1)
    lap = jnp.diag(deg) - a
    d_inv_sqrt = 1.0 / jnp.sqrt(deg)
    lap_norm = jnp.eye(n, dtype=jnp.float32) - (d_inv_sqrt[:, None] * a * d_inv_sqrt[None, :])
    return lap, lap_norm


def _reference_f32(x, weight, lap, lap_norm, depth):
    """Pure-JAX f32 reference mirroring the (aliased) PyTorch forward exactly."""
    m2 = x @ weight.T
    m1 = lap @ m2
    out = m1 + m2
    for _ in range(2, depth):
        m1 = 2.0 * (lap_norm @ m1)
        out = out + m1
    return jnp.maximum(out, 0.0)


def _reference_matched(x, weight, lap, lap_norm, depth):
    """Reference mirroring the kernel's numerics (bf16-stored operators / chain
    state / weight, f32 accumulation, chain on the narrow width, weight last)."""
    bf, f32 = jnp.bfloat16, jnp.float32
    lap_q = lap.astype(bf).astype(f32)
    lap2_q = (2.0 * lap_norm).astype(bf).astype(f32)
    wt_q = weight.T.astype(bf).astype(f32)
    total = x.astype(f32)
    state = x.astype(bf).astype(f32)
    n_steps = 1 + max(0, depth - 2)
    for s in range(n_steps):
        op = lap_q if s == 0 else lap2_q
        q = op @ state
        total = total + q
        state = q.astype(bf).astype(f32)
    return jnp.maximum(total.astype(bf).astype(f32) @ wt_q, 0.0)


def _norm_max_err(y, y_ref):
    scale = float(jnp.max(jnp.abs(y_ref))) + 1e-6
    return float(jnp.max(jnp.abs(y.astype(jnp.float32) - y_ref))) / scale


if __name__ == "__main__":
    key = jax.random.PRNGKey(0)
    k1, k2, k3, k4, k5, k6 = jax.random.split(key, 6)

    def linear_weight(k, c_out, c_in):
        bound = 1.0 / float(jnp.sqrt(jnp.float32(c_in)))
        return jax.random.uniform(k, (c_out, c_in), dtype=jnp.float32,
                                  minval=-bound, maxval=bound)

    # TODO(synk): graph.new_like()/Graph container and the matrix_free=True (sparse,
    # non-materialized) laplacian_action path are not translated; only the dense-
    # Laplacian node-feature math is implemented here.

    # --- Test 1: small graph, default (512) tiles, depth=3 -----------------------
    n1, cin1, cout1, depth1 = 16, 4, 8, 3
    x1 = jax.random.normal(k1, (n1, cin1), dtype=jnp.float32)
    w1 = linear_weight(k2, cout1, cin1)
    lap1, lapn1 = _build_laplacians(k3, n1, p=0.3)
    stack1 = prepare_graph_operators(lap1, lapn1)          # bf16, padded to 512
    y1 = jax.block_until_ready(chebyshev_conv(x1, w1, stack1, depth=depth1))
    assert y1.shape == (n1, cout1)
    err1 = _norm_max_err(y1, _reference_matched(x1, w1, lap1, lapn1, depth1))
    assert err1 < 2e-2, f"test1 mismatch vs matched-precision reference: {err1}"
    err1_f32 = _norm_max_err(y1, _reference_f32(x1, w1, lap1, lapn1, depth1))
    assert err1_f32 < 1e-1, (
        f"test1 deviates too far from f32 module semantics: {err1_f32}")

    # --- Test 2: multi row-tile / multi k-tile / deep chain (ping-pong exercised) --
    n2, cin2, cout2, depth2 = 300, 8, 16, 5
    x2 = jax.random.normal(k4, (n2, cin2), dtype=jnp.float32)
    w2 = linear_weight(k5, cout2, cin2)
    lap2, lapn2 = _build_laplacians(k6, n2, p=0.03)
    stack2 = prepare_graph_operators(lap2, lapn2)          # N_pad = 512
    y2 = jax.block_until_ready(
        chebyshev_conv(x2, w2, stack2, depth=depth2, tm=128, tk=128))
    assert y2.shape == (n2, cout2)
    err2 = _norm_max_err(y2, _reference_matched(x2, w2, lap2, lapn2, depth2))
    assert err2 < 2e-2, f"test2 mismatch vs matched-precision reference: {err2}"

    print("KERNEL_OK")
</pallas_src>

<mosaic_0001>
module attributes {stable_mosaic.version = 11 : i64} {
  func.func @_cheb_kernel(%arg0: i32, %arg1: i32, %arg2: i32, %arg3: memref<1x512x512xbf16, #tpu.memory_space<vmem>>, %arg4: memref<512x128xf32, #tpu.memory_space<any>>, %arg5: memref<128x128xbf16, #tpu.memory_space<vmem>>, %arg6: memref<512x128xf32, #tpu.memory_space<any>>, %arg7: memref<512x128xbf16, #tpu.memory_space<vmem>>, %arg8: memref<512x128xbf16, #tpu.memory_space<vmem>>, %arg9: memref<512x128xf32, #tpu.memory_space<vmem>>, %arg10: memref<512x128xf32, #tpu.memory_space<vmem>>, %arg11: memref<512x128xf32, #tpu.memory_space<vmem>>, %arg12: memref<2x!tpu.dma_semaphore, #tpu.memory_space<semaphore_mem>>) attributes {dimension_semantics = [#tpu.dimension_semantics<arbitrary>, #tpu.dimension_semantics<arbitrary>, #tpu.dimension_semantics<arbitrary>], iteration_bounds = array<i64: 2, 1, 1>, scalar_prefetch = 0 : i64, scratch_operands = 6 : i64, tpu.core_type = #tpu.core_type<tc>, window_params = [{transform_indices = @transform_0, window_bounds = array<i64: 1, 512, 512>}, {}, {pipeline_mode = #tpu.pipeline_mode<synchronous>, transform_indices = @transform_2, window_bounds = array<i64: 128, 128>}, {}]} {
    %c512_i32 = arith.constant 512 : i32
    %0 = arith.muli %arg1, %c512_i32 : i32
    %1 = tpu.assume_multiple %0, 512 : i32
    %c512_i32_0 = arith.constant 512 : i32
    %2 = arith.muli %arg2, %c512_i32_0 : i32
    %3 = tpu.assume_multiple %2, 512 : i32
    %c0_i32 = arith.constant 0 : i32
    %4 = arith.cmpi eq, %arg0, %c0_i32 : i32
    %c0_i32_1 = arith.constant 0 : i32
    %5 = arith.cmpi eq, %arg1, %c0_i32_1 : i32
    %6 = arith.andi %4, %5 : i1
    %c0_i32_2 = arith.constant 0 : i32
    %7 = arith.cmpi eq, %arg2, %c0_i32_2 : i32
    %8 = arith.andi %6, %7 : i1
    %9 = arith.extui %8 : i1 to i32
    %c0_i32_3 = arith.constant 0 : i32
    %10 = arith.cmpi ne, %9, %c0_i32_3 : i32
    scf.if %10 {
      %c0_i32_15 = arith.constant 0 : i32
      %33 = tpu.memref_slice %arg12[%c0_i32_15] : memref<2x!tpu.dma_semaphore, #tpu.memory_space<semaphore_mem>> -> memref<1x!tpu.dma_semaphore, #tpu.memory_space<semaphore_mem>>
      %34 = tpu.memref_squeeze %33 : memref<1x!tpu.dma_semaphore, #tpu.memory_space<semaphore_mem>> -> memref<!tpu.dma_semaphore, #tpu.memory_space<semaphore_mem>>
      tpu.enqueue_dma source(%arg4 : memref<512x128xf32, #tpu.memory_space<any>>) target(%arg9 : memref<512x128xf32, #tpu.memory_space<vmem>>) target_semaphore(%34 : memref<!tpu.dma_semaphore, #tpu.memory_space<semaphore_mem>>)
      %c0_i32_16 = arith.constant 0 : i32
      %35 = tpu.memref_slice %arg12[%c0_i32_16] : memref<2x!tpu.dma_semaphore, #tpu.memory_space<semaphore_mem>> -> memref<1x!tpu.dma_semaphore, #tpu.memory_space<semaphore_mem>>
      %36 = tpu.memref_squeeze %35 : memref<1x!tpu.dma_semaphore, #tpu.memory_space<semaphore_mem>> -> memref<!tpu.dma_semaphore, #tpu.memory_space<semaphore_mem>>
      tpu.wait_dma2 semaphore(%36 : memref<!tpu.dma_semaphore, #tpu.memory_space<semaphore_mem>>) src(%arg4 : memref<512x128xf32, #tpu.memory_space<any>>) dst(%arg9 : memref<512x128xf32, #tpu.memory_space<vmem>>)
      %c0 = arith.constant 0 : index
      %c0_17 = arith.constant 0 : index
      %37 = vector.load %arg9[%c0, %c0_17] : memref<512x128xf32, #tpu.memory_space<vmem>>, vector<512x128xf32>
      %38 = arith.truncf %37 : vector<512x128xf32> to vector<512x128xbf16>
      %c0_18 = arith.constant 0 : index
      %c0_19 = arith.constant 0 : index
      %39 = vector.load %arg8[%c0_18, %c0_19] : memref<512x128xbf16, #tpu.memory_space<vmem>>, vector<512x128xbf16>
      tpu.vector_store %arg8[%c0_18, %c0_19], %38 {strides = array<i32>} : memref<512x128xbf16, #tpu.memory_space<vmem>>, vector<512x128xbf16>,
    } else {
    }
    %c0_i32_4 = arith.constant 0 : i32
    %11 = arith.cmpi eq, %arg2, %c0_i32_4 : i32
    %12 = arith.extui %11 : i1 to i32
    %c0_i32_5 = arith.constant 0 : i32
    %13 = arith.cmpi ne, %12, %c0_i32_5 : i32
    scf.if %13 {
      %cst = arith.constant 0.000000e+00 : f32
      %33 = vector.broadcast %cst : f32 to vector<512x128xf32>
      %c0 = arith.constant 0 : index
      %c0_15 = arith.constant 0 : index
      %34 = vector.load %arg10[%c0, %c0_15] : memref<512x128xf32, #tpu.memory_space<vmem>>, vector<512x128xf32>
      tpu.vector_store %arg10[%c0, %c0_15], %33 {strides = array<i32>} : memref<512x128xf32, #tpu.memory_space<vmem>>, vector<512x128xf32>,
    } else {
    }
    %c2_i32 = arith.constant 2 : i32
    %c0_i32_6 = arith.constant 0 : i32
    %14 = arith.cmpi eq, %c2_i32, %c0_i32_6 : i32
    %c1_i32 = arith.constant 1 : i32
    %15 = arith.select %14, %c1_i32, %c2_i32 : i32
    %16 = arith.remsi %arg0, %15 : i32
    %c0_i32_7 = arith.constant 0 : i32
    %17 = arith.cmpi ne, %16, %c0_i32_7 : i32
    %c0_i32_8 = arith.constant 0 : i32
    %18 = arith.cmpi slt, %16, %c0_i32_8 : i32
    %c0_i32_9 = arith.constant 0 : i32
    %19 = arith.cmpi slt, %15, %c0_i32_9 : i32
    %20 = arith.xori %18, %19 : i1
    %21 = arith.andi %20, %17 : i1
    %22 = arith.addi %16, %15 : i32
    %23 = arith.select %21, %22, %16 : i32
    %c0_i32_10 = arith.constant 0 : i32
    %24 = arith.cmpi eq, %23, %c0_i32_10 : i32
    %25 = arith.extui %24 : i1 to i32
    %c0_i32_11 = arith.constant 0 : i32
    %26 = arith.cmpi ne, %25, %c0_i32_11 : i32
    scf.if %26 {
      %c0 = arith.constant 0 : index
      %c0_15 = arith.constant 0 : index
      %33 = vector.load %arg10[%c0, %c0_15] : memref<512x128xf32, #tpu.memory_space<vmem>>, vector<512x128xf32>
      %c0_16 = arith.constant 0 : index
      %c0_17 = arith.constant 0 : index
      %c0_18 = arith.constant 0 : index
      %34 = vector.load %arg3[%c0_16, %c0_17, %c0_18] : memref<1x512x512xbf16, #tpu.memory_space<vmem>>, vector<1x512x512xbf16>
      %35 = vector.shape_cast %34 : vector<1x512x512xbf16> to vector<512x512xbf16>
      %36 = arith.index_cast %3 : i32 to index
      %c0_19 = arith.constant 0 : index
      %37 = vector.load %arg8[%36, %c0_19] : memref<512x128xbf16, #tpu.memory_space<vmem>>, vector<512x128xbf16>
      %cst = arith.constant dense<0.000000e+00> : vector<512x128xf32>
      %38 = tpu.matmul %35, %37, %cst {dimension_numbers = #tpu.dot_dimension_numbers<[1], [0], [0], [1], [0, 0, 1, 1], [], []>} : vector<512x512xbf16>, vector<512x128xbf16>, vector<512x128xf32> -> vector<512x128xf32>
      %39 = arith.addf %33, %38 : vector<512x128xf32>
      %c0_20 = arith.constant 0 : index
      %c0_21 = arith.constant 0 : index
      %40 = vector.load %arg10[%c0_20, %c0_21] : memref<512x128xf32, #tpu.memory_space<vmem>>, vector<512x128xf32>
      tpu.vector_store %arg10[%c0_20, %c0_21], %39 {strides = array<i32>} : memref<512x128xf32, #tpu.memory_space<vmem>>, vector<512x128xf32>,
    } else {
    }
    %true = arith.constant true
    %27 = arith.xori %24, %true : i1
    %28 = arith.extui %27 : i1 to i32
    %c0_i32_12 = arith.constant 0 : i32
    %29 = arith.cmpi ne, %28, %c0_i32_12 : i32
    scf.if %29 {
      %c0 = arith.constant 0 : index
      %c0_15 = arith.constant 0 : index
      %33 = vector.load %arg10[%c0, %c0_15] : memref<512x128xf32, #tpu.memory_space<vmem>>, vector<512x128xf32>
      %c0_16 = arith.constant 0 : index
      %c0_17 = arith.constant 0 : index
      %c0_18 = arith.constant 0 : index
      %34 = vector.load %arg3[%c0_16, %c0_17, %c0_18] : memref<1x512x512xbf16, #tpu.memory_space<vmem>>, vector<1x512x512xbf16>
      %35 = vector.shape_cast %34 : vector<1x512x512xbf16> to vector<512x512xbf16>
      %36 = arith.index_cast %3 : i32 to index
      %c0_19 = arith.constant 0 : index
      %37 = vector.load %arg7[%36, %c0_19] : memref<512x128xbf16, #tpu.memory_space<vmem>>, vector<512x128xbf16>
      %cst = arith.constant dense<0.000000e+00> : vector<512x128xf32>
      %38 = tpu.matmul %35, %37, %cst {dimension_numbers = #tpu.dot_dimension_numbers<[1], [0], [0], [1], [0, 0, 1, 1], [], []>} : vector<512x512xbf16>, vector<512x128xbf16>, vector<512x128xf32> -> vector<512x128xf32>
      %39 = arith.addf %33, %38 : vector<512x128xf32>
      %c0_20 = arith.constant 0 : index
      %c0_21 = arith.constant 0 : index
      %40 = vector.load %arg10[%c0_20, %c0_21] : memref<512x128xf32, #tpu.memory_space<vmem>>, vector<512x128xf32>
      tpu.vector_store %arg10[%c0_20, %c0_21], %39 {strides = array<i32>} : memref<512x128xf32, #tpu.memory_space<vmem>>, vector<512x128xf32>,
    } else {
    }
    %c0_i32_13 = arith.constant 0 : i32
    %30 = arith.cmpi eq, %arg2, %c0_i32_13 : i32
    %31 = arith.extui %30 : i1 to i32
    %c0_i32_14 = arith.constant 0 : i32
    %32 = arith.cmpi ne, %31, %c0_i32_14 : i32
    scf.if %32 {
      %c0 = arith.constant 0 : index
      %c0_15 = arith.constant 0 : index
      %33 = vector.load %arg10[%c0, %c0_15] : memref<512x128xf32, #tpu.memory_space<vmem>>, vector<512x128xf32>
      %34 = arith.index_cast %1 : i32 to index
      %c0_16 = arith.constant 0 : index
      %35 = vector.load %arg9[%34, %c0_16] : memref<512x128xf32, #tpu.memory_space<vmem>>, vector<512x128xf32>
      %36 = arith.addf %35, %33 : vector<512x128xf32>
      %c1_i32_17 = arith.constant 1 : i32
      %37 = arith.addi %arg0, %c1_i32_17 : i32
      %c2_i32_18 = arith.constant 2 : i32
      %38 = arith.cmpi slt, %37, %c2_i32_18 : i32
      %39 = arith.extui %38 : i1 to i32
      %c0_i32_19 = arith.constant 0 : i32
      %40 = arith.cmpi ne, %39, %c0_i32_19 : i32
      scf.if %40 {
        %44 = arith.index_cast %1 : i32 to index
        %c0_22 = arith.constant 0 : index
        %45 = vector.load %arg9[%44, %c0_22] : memref<512x128xf32, #tpu.memory_space<vmem>>, vector<512x128xf32>
        tpu.vector_store %arg9[%44, %c0_22], %36 {strides = array<i32>} : memref<512x128xf32, #tpu.memory_space<vmem>>, vector<512x128xf32>,
        %46 = arith.extui %24 : i1 to i32
        %c0_i32_23 = arith.constant 0 : i32
        %47 = arith.cmpi ne, %46, %c0_i32_23 : i32
        scf.if %47 {
          %51 = arith.truncf %33 : vector<512x128xf32> to vector<512x128xbf16>
          %52 = arith.index_cast %1 : i32 to index
          %c0_26 = arith.constant 0 : index
          %53 = vector.load %arg7[%52, %c0_26] : memref<512x128xbf16, #tpu.memory_space<vmem>>, vector<512x128xbf16>
          tpu.vector_store %arg7[%52, %c0_26], %51 {strides = array<i32>} : memref<512x128xbf16, #tpu.memory_space<vmem>>, vector<512x128xbf16>,
        } else {
        }
        %true_24 = arith.constant true
        %48 = arith.xori %24, %true_24 : i1
        %49 = arith.extui %48 : i1 to i32
        %c0_i32_25 = arith.constant 0 : i32
        %50 = arith.cmpi ne, %49, %c0_i32_25 : i32
        scf.if %50 {
          %51 = arith.truncf %33 : vector<512x128xf32> to vector<512x128xbf16>
          %52 = arith.index_cast %1 : i32 to index
          %c0_26 = arith.constant 0 : index
          %53 = vector.load %arg8[%52, %c0_26] : memref<512x128xbf16, #tpu.memory_space<vmem>>, vector<512x128xbf16>
          tpu.vector_store %arg8[%52, %c0_26], %51 {strides = array<i32>} : memref<512x128xbf16, #tpu.memory_space<vmem>>, vector<512x128xbf16>,
        } else {
        }
      } else {
      }
      %c1_i32_20 = arith.constant 1 : i32
      %41 = arith.cmpi eq, %arg0, %c1_i32_20 : i32
      %42 = arith.extui %41 : i1 to i32
      %c0_i32_21 = arith.constant 0 : i32
      %43 = arith.cmpi ne, %42, %c0_i32_21 : i32
      scf.if %43 {
        %44 = arith.truncf %36 : vector<512x128xf32> to vector<512x128xbf16>
        %c0_22 = arith.constant 0 : index
        %c0_23 = arith.constant 0 : index
        %45 = vector.load %arg5[%c0_22, %c0_23] : memref<128x128xbf16, #tpu.memory_space<vmem>>, vector<128x128xbf16>
        %cst = arith.constant dense<0.000000e+00> : vector<512x128xf32>
        %46 = tpu.matmul %44, %45, %cst {dimension_numbers = #tpu.dot_dimension_numbers<[1], [0], [0], [1], [0, 0, 1, 1], [], []>} : vector<512x128xbf16>, vector<128x128xbf16>, vector<512x128xf32> -> vector<512x128xf32>
        %cst_24 = arith.constant 0.000000e+00 : f32
        %47 = vector.broadcast %cst_24 : f32 to vector<512x128xf32>
        %48 = arith.maximumf %46, %47 : vector<512x128xf32>
        %c0_25 = arith.constant 0 : index
        %c0_26 = arith.constant 0 : index
        %49 = vector.load %arg11[%c0_25, %c0_26] : memref<512x128xf32, #tpu.memory_space<vmem>>, vector<512x128xf32>
        tpu.vector_store %arg11[%c0_25, %c0_26], %48 {strides = array<i32>} : memref<512x128xf32, #tpu.memory_space<vmem>>, vector<512x128xf32>,
        %c1_i32_27 = arith.constant 1 : i32
        %c0_i32_28 = arith.constant 0 : i32
        %50 = tpu.memref_slice %arg6[%1, %c0_i32_28] : memref<512x128xf32, #tpu.memory_space<any>> -> memref<512x128xf32, #tpu.memory_space<any>>
        %51 = tpu.memref_slice %arg12[%c1_i32_27] : memref<2x!tpu.dma_semaphore, #tpu.memory_space<semaphore_mem>> -> memref<1x!tpu.dma_semaphore, #tpu.memory_space<semaphore_mem>>
        %52 = tpu.memref_squeeze %51 : memref<1x!tpu.dma_semaphore, #tpu.memory_space<semaphore_mem>> -> memref<!tpu.dma_semaphore, #tpu.memory_space<semaphore_mem>>
        tpu.enqueue_dma source(%arg11 : memref<512x128xf32, #tpu.memory_space<vmem>>) target(%50 : memref<512x128xf32, #tpu.memory_space<any>>) target_semaphore(%52 : memref<!tpu.dma_semaphore, #tpu.memory_space<semaphore_mem>>)
        %c1_i32_29 = arith.constant 1 : i32
        %c0_i32_30 = arith.constant 0 : i32
        %53 = tpu.memref_slice %arg6[%1, %c0_i32_30] : memref<512x128xf32, #tpu.memory_space<any>> -> memref<512x128xf32, #tpu.memory_space<any>>
        %54 = tpu.memref_slice %arg12[%c1_i32_29] : memref<2x!tpu.dma_semaphore, #tpu.memory_space<semaphore_mem>> -> memref<1x!tpu.dma_semaphore, #tpu.memory_space<semaphore_mem>>
        %55 = tpu.memref_squeeze %54 : memref<1x!tpu.dma_semaphore, #tpu.memory_space<semaphore_mem>> -> memref<!tpu.dma_semaphore, #tpu.memory_space<semaphore_mem>>
        tpu.wait_dma2 semaphore(%55 : memref<!tpu.dma_semaphore, #tpu.memory_space<semaphore_mem>>) src(%arg11 : memref<512x128xf32, #tpu.memory_space<vmem>>) dst(%53 : memref<512x128xf32, #tpu.memory_space<any>>)
      } else {
      }
    } else {
    }
    return
  }
  func.func @transform_0(%arg0: i32, %arg1: i32, %arg2: i32) -> (i32, i32, i32) {
    %c1_i32 = arith.constant 1 : i32
    %0 = arith.minsi %arg0, %c1_i32 : i32
    %c0_i32 = arith.constant 0 : i32
    return %0, %arg1, %arg2 : i32, i32, i32
  }
  func.func @transform_2(%arg0: i32, %arg1: i32, %arg2: i32) -> (i32, i32) {
    %c0_i32 = arith.constant 0 : i32
    %c0_i32_0 = arith.constant 0 : i32
    %c0_i32_1 = arith.constant 0 : i32
    return %c0_i32, %c0_i32_0 : i32, i32
  }
}

</mosaic_0001>

<bundles_post_ra>
// kernel: tpu_custom_call.1
= control target key start
LH: loop header
LB: loop body
LE: loop exit
PB: predicated region body
PF: predicated region fallthrough
CT: control target
= control target key end

     0   :  { %8 = vsyncpa [#allocation9], 0  ;;  %s9053_s0 = inlined_call_operand.hbm [shape: bf16[2,512,512], index: 0, kind: input, shape index: {}]   ;;  %s9054_s1 = inlined_call_operand.hbm [shape: f32[512,128], index: 1, kind: input, shape index: {}]   ;;  %s9055_s2 = inlined_call_operand.hbm [shape: bf16[128,128], index: 2, kind: input, shape index: {}]   ;;  %s9056_s3 = inlined_call_operand.hbm [shape: f32[512,128], index: 3, kind: output, shape index: {}]  }
   0x1   :  { %10 = vsyncpa [#allocation9 + $0x1], 0 }
   0x2   :  { %11 = vsyncpa [#allocation11], 0  ;;  %s7950_s12 = smov 0   ;;  %s7952_s13 = smov 0  }
   0x3   :  { %s7954_s14 = smov 0   ;;  %s7956_s15 = smov 0  }
   0x4   :  { %s7958_s16 = smov 0   ;;  %s7960_s17 = smov 0  }
   0x5 LB: > { %s5784_s18 = sadd.s32 4294967295, %s7917_s17   ;;  %p60_p0 = scmp.ne.s32.totalorder %s7901_s13, %s7897_s12  ;;  %s7917_s17 = sphi %s7960_s17, %s17_s17   ;;  %s7913_s16 = sphi %s7958_s16, %s9383_s16   ;;  %s7909_s15 = sphi %s7956_s15, %s9382_s15   ;;  %s7905_s14 = sphi %s7954_s14, %s9381_s14   ;;  %s7901_s13 = sphi %s7952_s13, %s9380_s13   ;;  %s7897_s12 = sphi %s7950_s12, %s9379_s12  }
   0x6   : > { %p7980_p1 = scmp.eq.s32.totalorder %s5784_s18, 0  ;;  %p5786_p2 = scmp.lt.s32.totalorder %s7917_s17, 1 }
   0x7   : > { %p7247_p3 = scmp.ge.s32.totalorder %s7917_s17, 1  ;;  %s7919_s21 = smov [#allocation10]  }
   0x8   : > { %p7988_p4 = por %p7980_p1, %p60_p0  ;;  %s88_s22 = sshll.u32 %s7919_s21, 4  ;;  %s89_s22 = int_to_ptr.vmem [resolvable:$true] %s88_s22 }
   0x9   : > { %p7994_p5 = pnand %p7247_p3, %p7980_p1  ;;  %s7776_s24 = scalar_lea.vmem %s89_s22, 1024 }
   0xa   : > { %p7777_p7 = scmp.ne.s32.totalorder %s89_s22, %s7776_s24  ;;  %p7784_p10 = scmp.lt.s32.totalorder %s89_s22, %s89_s22 }
   0xb   : > { %p7767_p6 = pneg %p7994_p5  ;;  %p7785_p11 = scmp.lt.s32.totalorder %s7776_s24, %s7776_s24 }
   0xd   : > { %p7779_p8 = pnand %p7777_p7, %p7767_p6  ;;  %p7786_p12 = por %p7785_p11, %p7784_p10 }
   0xf   : > { %p7780_p9 = pneg %p7779_p8 }
  0x11   : > { %p7787_p13 = pnand %p7786_p12, %p7780_p9 }
  0x13   : > { %7790 = shalt.err (!%p7787_p13)
}
  0x14   : > { %s7920_s25 = smov 64   ;;  %s7921_s26 = smov 4  }
  0x15   : > { %7242 = dma.hbm_to_vmem [thread:$0]  (!%p7994_p5), %s9055_s2, 1024, %s89_s22, [#allocation11], %s7920_s25, %s7920_s25, %s7921_s26  }
  0x16   : > { %s47_s29 = sadd.s32 1, %s7905_s14  ;;  %s32_s30 = sadd.s32 1, %s7913_s16 }
  0x17   : > { %p36_p0 = scmp.lt.s32.totalorder %s7913_s16, 1  ;;  %p34_p3 = scmp.ge.s32.totalorder %s32_s30, 2 }
  0x18   : > { %p53_p6 = scmp.ne.s32.totalorder %s7905_s14, %s7901_s13  ;;  %p54_p7 = scmp.eq.s32.totalorder %s7917_s17, 0 }
  0x19   : > { %s37_s4 = scalar_select %p36_p0, %s7913_s16, 1 }
  0x1a   : > { %s9385_s30 = smov (%p34_p3, %s32_s30), 0  ;;  %p7249_p8 = scmp.lt.s32.totalorder %s7917_s17, 2 }
  0x1b   : > { %p38_p9 = scmp.lt.s32.totalorder %s9385_s30, 1  ;;  %s102_s5 = sand.u32 1, %s7905_s14  }
  0x1c   : > { %p55_p10 = por %p54_p7, %p53_p6  ;;  %s5789_s7 = sshll.u32 %s102_s5, 10 }
  0x1d   : > { %s39_s6 = scalar_select %p38_p9, %s9385_s30, 1 }
  0x1e   : > { %s6329_s8 = sshll.u32 %s37_s4, 14  ;;  %s106_s18 = scalar_lea.vmem [#allocation8], %s5789_s7 }
  0x1f   : > { %s40_s9 = ssub.s32 %s37_s4, %s39_s6  ;;  %s119_s12 = scalar_lea.hbm %s9053_s0, %s6329_s8 }
  0x20   : > { %p45_p5 = scmp.eq.s32.totalorder %s40_s9, 0  ;;  %s120_s21 = sshll.u32 %s106_s18, 4  ;;  %s121_s21 = int_to_ptr.vmem [resolvable:$true] %s120_s21 }
  0x21   : > { %p8021_p11 = pnand %p7249_p8, %p55_p10  ;;  %s103_s24 = scalar_lea.sflag [#allocation9], %s102_s5 }
  0x22   : > { %s8026_s23 = scalar_select %p45_p5, %s7905_s14, %s47_s29  }
  0x23   : > { %p7793_p12 = pneg %p8021_p11  ;;  %s7804_s25 = scalar_lea.vmem %s121_s21, 16384 }
  0x24   : > { %p7805_p13 = scmp.ne.s32.totalorder %s121_s21, %s7804_s25  ;;  %s7922_s26 = smov [#allocation8]  }
  0x25   : > { %s7809_s27 = sshll.u32 %s7922_s26, 4  ;;  %s7810_s27 = int_to_ptr.vmem [resolvable:$false] %s7809_s27 }
  0x26   : > { %p7807_p0 = pnand %p7805_p13, %p7793_p12  ;;  %s7811_s28 = scalar_lea.vmem %s7810_s27, 32768 }
  0x27   : > { %p7812_p6 = scmp.lt.s32.totalorder %s121_s21, %s7810_s27  ;;  %p7813_p7 = scmp.lt.s32.totalorder %s7811_s28, %s7804_s25 }
  0x28   : > { %p7808_p3 = pneg %p7807_p0 }
  0x29   : > { %p7814_p8 = por %p7813_p7, %p7812_p6 }
  0x2b   : > { %p7815_p9 = pnand %p7814_p8, %p7808_p3 }
  0x2d   : > { %7818 = shalt.err (!%p7815_p9)
}
  0x2e   : > { %s7923_s4 = smov 256   ;;  %s7924_s29 = smov 16  }
  0x2f   : > { %7246 = dma.hbm_to_vmem [thread:$0]  (!%p8021_p11), %s119_s12, 16384, %s121_s21, %s103_s24, %s7923_s4, %s7923_s4, %s7924_s29  }
  0x30   : > { %130 = sbr.rel (%p5786_p2) target bundleno = 1616 (0x650), region = 28 }
  0x35   : > { %s132_s5 = sand.u32 1, %s7901_s13  }
  0x36   : > { %s5794_s6 = sshll.u32 %s132_s5, 10  ;;  %s133_s7 = scalar_lea.sflag [#allocation9], %s132_s5 }
  0x37   : > { %s8035_s8 = scalar_lea.vmem [#allocation8], %s5794_s6 }
  0x38   : > { %7884 = dma.done.wait (%p7988_p4), %s133_s7, 16384  }
  0x39   : > { %7886 = vsyncadd (%p7988_p4), %s133_s7, 4294950912 }
  0x3a   : > { %7888 = dma.done.wait (%p7980_p1), [#allocation11], 1024  }
  0x3b   : > { %7890 = vsyncadd (%p7980_p1), [#allocation11], 4294966272  ;;  %p161_p2 = scmp.eq.s32.totalorder %s7909_s15, 0 }
  0x3c   : > { %s7925_s9 = smov (%p161_p2), [#allocation4]  }
  0x3d   : > { %169 = sbr.rel (!%p161_p2) target bundleno = 99 (0x63), region = 40  ;;  %s177_s10 = sshll.u32 (%p161_p2), %s7925_s9, 4  ;;  %s178_s10 = int_to_ptr.vmem [resolvable:$true] %s177_s10 }
  0x3e   : > { %s7827_s11 = scalar_lea.vmem (%p161_p2), %s178_s10, 8192  ;;  %p7832_p5 = scmp.lt.s32.totalorder (%p161_p2), %s178_s10, %s178_s10 }
  0x3f   : > { %p7828_p10 = scmp.ne.s32.totalorder (%p161_p2), %s178_s10, %s7827_s11  ;;  %p7833_p11 = scmp.lt.s32.totalorder (%p161_p2), %s7827_s11, %s7827_s11 }
  0x41   : > { %p7834_p12 = por (%p161_p2), %p7833_p11, %p7832_p5 }
  0x43   : > { %p7835_p13 = pnand %p7834_p12, %p7828_p10 }
  0x45   : > { %7838 = shalt.err (!%p7835_p13)  }
  0x46   : > { %180 = dma.hbm_to_vmem [thread:$0]  %s9054_s1, 8192, %s178_s10, [#allocation7] }
  0x47   : > { %7891 = dma.done.wait [#allocation7], 8192 }
  0x48   : > { %7892 = vsyncadd [#allocation7], 4294959104  ;;  %v184_v0 = vld [vmem:[#allocation4] sm:$0xff]  ;;  %v185_v1 = vld [vmem:[#allocation4 + $0x8] sm:$0xff] }
  0x49   : > { %v186_v2 = vld [vmem:[#allocation4 + $0x10] sm:$0xff]  ;;  %v6527_v3 = vpack.c.bf16 %v185_v1, %v184_v0  ;;  %v187_v4 = vld [vmem:[#allocation4 + $0x18] sm:$0xff]  ;;  %v188_v5 = vld [vmem:[#allocation4 + $0x20] sm:$0xff] }
  0x4a   : > { %v189_v6 = vld [vmem:[#allocation4 + $0x28] sm:$0xff]  ;;  %v6532_v7 = vpack.c.bf16 %v187_v4, %v186_v2  ;;  %v190_v9 = vld [vmem:[#allocation4 + $0x30] sm:$0xff]  ;;  %v191_v10 = vld [vmem:[#allocation4 + $0x38] sm:$0xff] }
  0x4b   : > { %v6537_v8 = vpack.c.bf16 %v189_v6, %v188_v5  ;;  %v192_v11 = vld [vmem:[#allocation4 + $0x40] sm:$0xff]  ;;  %6528 = vst [vmem:[#allocation3] sm:$0xff] %v6527_v3   ;;  %v6542_v12 = vpack.c.bf16 %v191_v10, %v190_v9  ;;  %v193_v13 = vld [vmem:[#allocation4 + $0x48] sm:$0xff]  ;;  %v194_v14 = vld [vmem:[#allocation4 + $0x50] sm:$0xff] }
  0x4c   : > { %v195_v15 = vld [vmem:[#allocation4 + $0x58] sm:$0xff]  ;;  %7004 = vst [vmem:[#allocation3 + $0x8] sm:$0xff] %v6532_v7   ;;  %v6547_v16 = vpack.c.bf16 %v193_v13, %v192_v11  ;;  %v196_v18 = vld [vmem:[#allocation4 + $0x60] sm:$0xff]  ;;  %v197_v19 = vld [vmem:[#allocation4 + $0x68] sm:$0xff] }
  0x4d   : > { %7005 = vst [vmem:[#allocation3 + $0x10] sm:$0xff] %v6537_v8   ;;  %v6552_v17 = vpack.c.bf16 %v195_v15, %v194_v14  ;;  %v198_v20 = vld [vmem:[#allocation4 + $0x70] sm:$0xff]  ;;  %7006 = vst [vmem:[#allocation3 + $0x18] sm:$0xff] %v6542_v12   ;;  %v6557_v21 = vpack.c.bf16 %v197_v19, %v196_v18  ;;  %v199_v22 = vld [vmem:[#allocation4 + $0x78] sm:$0xff] }
  0x4e   : > { %v200_v23 = vld [vmem:[#allocation4 + $0x80] sm:$0xff]  ;;  %v201_v24 = vld [vmem:[#allocation4 + $0x88] sm:$0xff]  ;;  %7007 = vst [vmem:[#allocation3 + $0x20] sm:$0xff] %v6547_v16   ;;  %v6562_v25 = vpack.c.bf16 %v199_v22, %v198_v20  ;;  %v202_v27 = vld [vmem:[#allocation4 + $0x90] sm:$0xff] }
  0x4f   : > { %7008 = vst [vmem:[#allocation3 + $0x28] sm:$0xff] %v6552_v17   ;;  %v6567_v26 = vpack.c.bf16 %v201_v24, %v200_v23  ;;  %v203_v28 = vld [vmem:[#allocation4 + $0x98] sm:$0xff]  ;;  %v204_v29 = vld [vmem:[#allocation4 + $0xa0] sm:$0xff]  ;;  %7009 = vst [vmem:[#allocation3 + $0x30] sm:$0xff] %v6557_v21  }
  0x50   : > { %v6572_v30 = vpack.c.bf16 %v203_v28, %v202_v27  ;;  %v205_v31 = vld [vmem:[#allocation4 + $0xa8] sm:$0xff]  ;;  %v206_v32 = vld [vmem:[#allocation4 + $0xb0] sm:$0xff]  ;;  %v207_v33 = vld [vmem:[#allocation4 + $0xb8] sm:$0xff]  ;;  %7010 = vst [vmem:[#allocation3 + $0x38] sm:$0xff] %v6562_v25  }
  0x51   : > { %7011 = vst [vmem:[#allocation3 + $0x40] sm:$0xff] %v6567_v26   ;;  %v6577_v34 = vpack.c.bf16 %v205_v31, %v204_v29  ;;  %v6582_v35 = vpack.c.bf16 %v207_v33, %v206_v32  ;;  %v208_v36 = vld [vmem:[#allocation4 + $0xc0] sm:$0xff]  ;;  %v209_v37 = vld [vmem:[#allocation4 + $0xc8] sm:$0xff]  ;;  %v210_v38 = vld [vmem:[#allocation4 + $0xd0] sm:$0xff] }
  0x52   : > { %7012 = vst [vmem:[#allocation3 + $0x48] sm:$0xff] %v6572_v30   ;;  %v6587_v39 = vpack.c.bf16 %v209_v37, %v208_v36  ;;  %v211_v40 = vld [vmem:[#allocation4 + $0xd8] sm:$0xff]  ;;  %v212_v41 = vld [vmem:[#allocation4 + $0xe0] sm:$0xff]  ;;  %v213_v42 = vld [vmem:[#allocation4 + $0xe8] sm:$0xff] }
  0x53   : > { %7013 = vst [vmem:[#allocation3 + $0x50] sm:$0xff] %v6577_v34   ;;  %7014 = vst [vmem:[#allocation3 + $0x58] sm:$0xff] %v6582_v35   ;;  %v6592_v43 = vpack.c.bf16 %v211_v40, %v210_v38  ;;  %v6597_v44 = vpack.c.bf16 %v213_v42, %v212_v41  ;;  %v214_v45 = vld [vmem:[#allocation4 + $0xf0] sm:$0xff]  ;;  %v215_v46 = vld [vmem:[#allocation4 + $0xf8] sm:$0xff] }
  0x54   : > { %v216_v47 = vld [vmem:[#allocation4 + $0x100] sm:$0xff]  ;;  %7015 = vst [vmem:[#allocation3 + $0x60] sm:$0xff] %v6587_v39   ;;  %v6602_v48 = vpack.c.bf16 %v215_v46, %v214_v45  ;;  %v217_v49 = vld [vmem:[#allocation4 + $0x108] sm:$0xff]  ;;  %v218_v50 = vld [vmem:[#allocation4 + $0x110] sm:$0xff] }
  0x55   : > { %v219_v51 = vld [vmem:[#allocation4 + $0x118] sm:$0xff]  ;;  %7016 = vst [vmem:[#allocation3 + $0x68] sm:$0xff] %v6592_v43   ;;  %7017 = vst [vmem:[#allocation3 + $0x70] sm:$0xff] %v6597_v44   ;;  %v6607_v52 = vpack.c.bf16 %v217_v49, %v216_v47  ;;  %v220_v54 = vld [vmem:[#allocation4 + $0x120] sm:$0xff] }
  0x56   : > { %v6612_v53 = vpack.c.bf16 %v219_v51, %v218_v50  ;;  %v221_v55 = vld [vmem:[#allocation4 + $0x128] sm:$0xff]  ;;  %v222_v56 = vld [vmem:[#allocation4 + $0x130] sm:$0xff]  ;;  %7018 = vst [vmem:[#allocation3 + $0x78] sm:$0xff] %v6602_v48   ;;  %v223_v58 = vld [vmem:[#allocation4 + $0x138] sm:$0xff] }
  0x57   : > { %v6617_v57 = vpack.c.bf16 %v221_v55, %v220_v54  ;;  %v224_v59 = vld [vmem:[#allocation4 + $0x140] sm:$0xff]  ;;  %v225_v60 = vld [vmem:[#allocation4 + $0x148] sm:$0xff]  ;;  %7019 = vst [vmem:[#allocation3 + $0x80] sm:$0xff] %v6607_v52   ;;  %v6622_v61 = vpack.c.bf16 %v223_v58, %v222_v56  ;;  %v226_v63 = vld [vmem:[#allocation4 + $0x150] sm:$0xff] }
  0x58   : > { %7020 = vst [vmem:[#allocation3 + $0x88] sm:$0xff] %v6612_v53   ;;  %v6627_v62 = vpack.c.bf16 %v225_v60, %v224_v59  ;;  %v227_v0 = vld [vmem:[#allocation4 + $0x158] sm:$0xff]  ;;  %v228_v1 = vld [vmem:[#allocation4 + $0x160] sm:$0xff]  ;;  %v229_v3 = vld [vmem:[#allocation4 + $0x168] sm:$0xff] }
  0x59   : > { %7021 = vst [vmem:[#allocation3 + $0x90] sm:$0xff] %v6617_v57   ;;  %v6632_v2 = vpack.c.bf16 %v227_v0, %v226_v63  ;;  %v230_v4 = vld [vmem:[#allocation4 + $0x170] sm:$0xff]  ;;  %v231_v5 = vld [vmem:[#allocation4 + $0x178] sm:$0xff]  ;;  %7022 = vst [vmem:[#allocation3 + $0x98] sm:$0xff] %v6622_v61   ;;  %v6637_v6 = vpack.c.bf16 %v229_v3, %v228_v1 }
  0x5a   : > { %7023 = vst [vmem:[#allocation3 + $0xa0] sm:$0xff] %v6627_v62   ;;  %v6642_v7 = vpack.c.bf16 %v231_v5, %v230_v4  ;;  %v232_v8 = vld [vmem:[#allocation4 + $0x180] sm:$0xff]  ;;  %v233_v9 = vld [vmem:[#allocation4 + $0x188] sm:$0xff]  ;;  %v234_v10 = vld [vmem:[#allocation4 + $0x190] sm:$0xff] }
  0x5b   : > { %7024 = vst [vmem:[#allocation3 + $0xa8] sm:$0xff] %v6632_v2   ;;  %v6647_v11 = vpack.c.bf16 %v233_v9, %v232_v8  ;;  %v235_v12 = vld [vmem:[#allocation4 + $0x198] sm:$0xff]  ;;  %v236_v13 = vld [vmem:[#allocation4 + $0x1a0] sm:$0xff]  ;;  %v237_v14 = vld [vmem:[#allocation4 + $0x1a8] sm:$0xff] }
  0x5c   : > { %7025 = vst [vmem:[#allocation3 + $0xb0] sm:$0xff] %v6637_v6   ;;  %7026 = vst [vmem:[#allocation3 + $0xb8] sm:$0xff] %v6642_v7   ;;  %v6652_v15 = vpack.c.bf16 %v235_v12, %v234_v10  ;;  %v6657_v16 = vpack.c.bf16 %v237_v14, %v236_v13  ;;  %v238_v17 = vld [vmem:[#allocation4 + $0x1b0] sm:$0xff]  ;;  %v239_v18 = vld [vmem:[#allocation4 + $0x1b8] sm:$0xff] }
  0x5d   : > { %v240_v19 = vld [vmem:[#allocation4 + $0x1c0] sm:$0xff]  ;;  %7027 = vst [vmem:[#allocation3 + $0xc0] sm:$0xff] %v6647_v11   ;;  %v6662_v20 = vpack.c.bf16 %v239_v18, %v238_v17  ;;  %v241_v21 = vld [vmem:[#allocation4 + $0x1c8] sm:$0xff]  ;;  %v242_v22 = vld [vmem:[#allocation4 + $0x1d0] sm:$0xff] }
  0x5e   : > { %v243_v23 = vld [vmem:[#allocation4 + $0x1d8] sm:$0xff]  ;;  %7028 = vst [vmem:[#allocation3 + $0xc8] sm:$0xff] %v6652_v15   ;;  %7029 = vst [vmem:[#allocation3 + $0xd0] sm:$0xff] %v6657_v16   ;;  %v6667_v24 = vpack.c.bf16 %v241_v21, %v240_v19  ;;  %v244_v26 = vld [vmem:[#allocation4 + $0x1e0] sm:$0xff] }
  0x5f   : > { %v6672_v25 = vpack.c.bf16 %v243_v23, %v242_v22  ;;  %v245_v27 = vld [vmem:[#allocation4 + $0x1e8] sm:$0xff]  ;;  %v246_v28 = vld [vmem:[#allocation4 + $0x1f0] sm:$0xff]  ;;  %7030 = vst [vmem:[#allocation3 + $0xd8] sm:$0xff] %v6662_v20   ;;  %v247_v30 = vld [vmem:[#allocation4 + $0x1f8] sm:$0xff] }
  0x60   : > { %v6677_v29 = vpack.c.bf16 %v245_v27, %v244_v26  ;;  %7031 = vst [vmem:[#allocation3 + $0xe0] sm:$0xff] %v6667_v24   ;;  %v6682_v31 = vpack.c.bf16 %v247_v30, %v246_v28 }
  0x61   : > { %7032 = vst [vmem:[#allocation3 + $0xe8] sm:$0xff] %v6672_v25  }
  0x62   : > { %7033 = vst [vmem:[#allocation3 + $0xf0] sm:$0xff] %v6677_v29   ;;  %7034 = vst [vmem:[#allocation3 + $0xf8] sm:$0xff] %v6682_v31  }
  0x63 PF: > { %p635_p1 = scmp.lt.s32.totalorder %s7909_s15, 0  ;;  %s636_s19 = ssub.s32 0, %s7909_s15  ;;  %v7926_v32 = vmov 0.0  }
  0x64   : > { %571 = vst [vmem:[#allocation5 + $0xb0] sm:$0xff] %v7926_v32  ;;  %572 = vst [vmem:[#allocation5 + $0x1b0] sm:$0xff] %v7926_v32  ;;  %s5862_s18 = smin.u32 %s7909_s15, %s636_s19 }
  0x65   : > { %573 = vst [vmem:[#allocation5 + $0xd8] sm:$0xff] %v7926_v32  ;;  %574 = vst [vmem:[#allocation5 + $0x18] sm:$0xff] %v7926_v32  ;;  %s638_s21 = sand.u32 1, %s5862_s18  }
  0x66   : > { %575 = vst [vmem:[#allocation5 + $0x50] sm:$0xff] %v7926_v32  ;;  %576 = vst [vmem:[#allocation5 + $0x168] sm:$0xff] %v7926_v32  ;;  %s639_s22 = ssub.s32 0, %s638_s21 }
  0x67   : > { %577 = vst [vmem:[#allocation5 + $0x130] sm:$0xff] %v7926_v32  ;;  %578 = vst [vmem:[#allocation5 + $0x48] sm:$0xff] %v7926_v32  ;;  %s9387_s22 = smov (!%p635_p1, %s639_s22), %s638_s21 }
  0x68   : > { %579 = vst [vmem:[#allocation5 + $0x180] sm:$0xff] %v7926_v32  ;;  %580 = vst [vmem:[#allocation5 + $0x110] sm:$0xff] %v7926_v32  ;;  %p5864_p4 = scmp.lt.s32.totalorder %s9387_s22, 0  ;;  %s645_s24 = sadd.s32 2, %s9387_s22 }
  0x69   : > { %581 = vst [vmem:[#allocation5 + $0x118] sm:$0xff] %v7926_v32  ;;  %582 = vst [vmem:[#allocation5 + $0x98] sm:$0xff] %v7926_v32 }
  0x6a   : > { %583 = vst [vmem:[#allocation5 + $0x120] sm:$0xff] %v7926_v32  ;;  %584 = vst [vmem:[#allocation5 + $0x150] sm:$0xff] %v7926_v32  ;;  %s9389_s24 = smov (!%p5864_p4, %s645_s24), %s9387_s22 }
  0x6b   : > { %585 = vst [vmem:[#allocation5 + $0x108] sm:$0xff] %v7926_v32  ;;  %586 = vst [vmem:[#allocation5 + $0x60] sm:$0xff] %v7926_v32  ;;  %p5865_p0 = scmp.ne.s32.totalorder %s9389_s24, 0 }
  0x6c   : > { %587 = vst [vmem:[#allocation5 + $0xe0] sm:$0xff] %v7926_v32  ;;  %588 = vst [vmem:[#allocation5 + $0x188] sm:$0xff] %v7926_v32 }
  0x6d   : > { %589 = vst [vmem:[#allocation5 + $0x138] sm:$0xff] %v7926_v32  ;;  %590 = vst [vmem:[#allocation5 + $0x140] sm:$0xff] %v7926_v32 }
  0x6e   : > { %591 = vst [vmem:[#allocation5 + $0x80] sm:$0xff] %v7926_v32  ;;  %592 = vst [vmem:[#allocation5 + $0x1a8] sm:$0xff] %v7926_v32 }
  0x6f   : > { %593 = vst [vmem:[#allocation5 + $0x1b8] sm:$0xff] %v7926_v32  ;;  %594 = vst [vmem:[#allocation5 + $0x28] sm:$0xff] %v7926_v32 }
  0x70   : > { %595 = vst [vmem:[#allocation5 + $0x1e8] sm:$0xff] %v7926_v32  ;;  %596 = vst [vmem:[#allocation5 + $0xf8] sm:$0xff] %v7926_v32 }
  0x71   : > { %597 = vst [vmem:[#allocation5 + $0x160] sm:$0xff] %v7926_v32  ;;  %598 = vst [vmem:[#allocation5 + $0x30] sm:$0xff] %v7926_v32 }
  0x72   : > { %599 = vst [vmem:[#allocation5 + $0x1e0] sm:$0xff] %v7926_v32  ;;  %600 = vst [vmem:[#allocation5] sm:$0xff] %v7926_v32 }
  0x73   : > { %601 = vst [vmem:[#allocation5 + $0xf0] sm:$0xff] %v7926_v32  ;;  %602 = vst [vmem:[#allocation5 + $0x8] sm:$0xff] %v7926_v32 }
  0x74   : > { %603 = vst [vmem:[#allocation5 + $0x148] sm:$0xff] %v7926_v32  ;;  %604 = vst [vmem:[#allocation5 + $0x1d0] sm:$0xff] %v7926_v32 }
  0x75   : > { %605 = vst [vmem:[#allocation5 + $0x100] sm:$0xff] %v7926_v32  ;;  %606 = vst [vmem:[#allocation5 + $0xc8] sm:$0xff] %v7926_v32 }
  0x76   : > { %607 = vst [vmem:[#allocation5 + $0x40] sm:$0xff] %v7926_v32  ;;  %608 = vst [vmem:[#allocation5 + $0x1f8] sm:$0xff] %v7926_v32 }
  0x77   : > { %609 = vst [vmem:[#allocation5 + $0x20] sm:$0xff] %v7926_v32  ;;  %610 = vst [vmem:[#allocation5 + $0x128] sm:$0xff] %v7926_v32 }
  0x78   : > { %611 = vst [vmem:[#allocation5 + $0x1a0] sm:$0xff] %v7926_v32  ;;  %612 = vst [vmem:[#allocation5 + $0x1f0] sm:$0xff] %v7926_v32 }
  0x79   : > { %613 = vst [vmem:[#allocation5 + $0xe8] sm:$0xff] %v7926_v32  ;;  %614 = vst [vmem:[#allocation5 + $0x78] sm:$0xff] %v7926_v32 }
  0x7a   : > { %615 = vst [vmem:[#allocation5 + $0x70] sm:$0xff] %v7926_v32  ;;  %616 = vst [vmem:[#allocation5 + $0x90] sm:$0xff] %v7926_v32 }
  0x7b   : > { %617 = vst [vmem:[#allocation5 + $0x1d8] sm:$0xff] %v7926_v32  ;;  %618 = vst [vmem:[#allocation5 + $0xd0] sm:$0xff] %v7926_v32 }
  0x7c   : > { %619 = vst [vmem:[#allocation5 + $0xb8] sm:$0xff] %v7926_v32  ;;  %620 = vst [vmem:[#allocation5 + $0x88] sm:$0xff] %v7926_v32 }
  0x7d   : > { %621 = vst [vmem:[#allocation5 + $0xa8] sm:$0xff] %v7926_v32  ;;  %622 = vst [vmem:[#allocation5 + $0x1c8] sm:$0xff] %v7926_v32 }
  0x7e   : > { %623 = vst [vmem:[#allocation5 + $0x170] sm:$0xff] %v7926_v32  ;;  %624 = vst [vmem:[#allocation5 + $0x178] sm:$0xff] %v7926_v32 }
  0x7f   : > { %625 = vst [vmem:[#allocation5 + $0x68] sm:$0xff] %v7926_v32  ;;  %626 = vst [vmem:[#allocation5 + $0x190] sm:$0xff] %v7926_v32  ;;  %650 = sbr.rel (%p5865_p0) target bundleno = 647 (0x287), region = 52 }
  0x80   : > { %627 = vst [vmem:[#allocation5 + $0x198] sm:$0xff] %v7926_v32  ;;  %628 = vst [vmem:[#allocation5 + $0x38] sm:$0xff] %v7926_v32 }
  0x81   : > { %629 = vst [vmem:[#allocation5 + $0xc0] sm:$0xff] %v7926_v32  ;;  %630 = vst [vmem:[#allocation5 + $0x1c0] sm:$0xff] %v7926_v32 }
  0x82   : > { %631 = vst [vmem:[#allocation5 + $0x158] sm:$0xff] %v7926_v32  ;;  %632 = vst [vmem:[#allocation5 + $0x10] sm:$0xff] %v7926_v32 }
  0x83   : > { %633 = vst [vmem:[#allocation5 + $0x58] sm:$0xff] %v7926_v32  ;;  %634 = vst [vmem:[#allocation5 + $0xa0] sm:$0xff] %v7926_v32 }
  0x84   : > { %v7309_v33 = vld [vmem:[#allocation3 + $0x38] sm:$0xff]   ;;  %v7927_v34 = vmov 0   ;;  %v7311_v36 = vld [vmem:[#allocation3 + $0x30] sm:$0xff]   ;;  %v7313_v38 = vld [vmem:[#allocation3 + $0x28] sm:$0xff]  }
  0x85   : > { %1743 = vmatprep.subr.bf16.mxu0 %v7927_v34  ;;  %2032 = vmatprep.subr.bf16.mxu1 %v7927_v34  ;;  %v7310_v35 = vld [vmem:[#allocation3 + $0xb8] sm:$0xff]   ;;  %v7312_v37 = vld [vmem:[#allocation3 + $0xb0] sm:$0xff]   ;;  %v7314_v39 = vld [vmem:[#allocation3 + $0xa8] sm:$0xff]  }
  0x86   : > { %1744 = vmatpush1.bf16.msra.mxu0 %v7309_v33  ;;  %2033 = vmatpush1.bf16.msra.mxu1 %v7310_v35  ;;  %v7315_v40 = vld [vmem:[#allocation3 + $0x20] sm:$0xff]   ;;  %v7317_v42 = vld [vmem:[#allocation3 + $0x18] sm:$0xff]   ;;  %v7319_v44 = vld [vmem:[#allocation3 + $0x10] sm:$0xff]  }
  0x87   : > { %1745 = vmatprep.subr.bf16.mxu0 %v7927_v34  ;;  %2034 = vmatprep.subr.bf16.mxu1 %v7927_v34  ;;  %v7316_v41 = vld [vmem:[#allocation3 + $0xa0] sm:$0xff]   ;;  %v7318_v43 = vld [vmem:[#allocation3 + $0x98] sm:$0xff]   ;;  %v7320_v45 = vld [vmem:[#allocation3 + $0x90] sm:$0xff]  }
  0x88   : > { %v7321_v46 = vld [vmem:[#allocation3 + $0x8] sm:$0xff]   ;;  %v7323_v48 = vld [vmem:[#allocation3] sm:$0xff]   ;;  %v7325_v50 = vld [vmem:[#allocation3 + $0x78] sm:$0xff]  }
  0x89   : > { %v7322_v47 = vld [vmem:[#allocation3 + $0x88] sm:$0xff]   ;;  %v7324_v49 = vld [vmem:[#allocation3 + $0x80] sm:$0xff]   ;;  %v7326_v51 = vld [vmem:[#allocation3 + $0xf8] sm:$0xff]  }
  0x8a   : > { %1746 = vmatpush1.bf16.msra.mxu0 %v7311_v36  ;;  %2035 = vmatpush1.bf16.msra.mxu1 %v7312_v37  ;;  %v7343_v52 = vld [vmem:[%s8035_s8 + $0x4] ss:$16 sps:$4 sm:$0xff]   ;;  %v7346_v54 = vld [vmem:[%s8035_s8 + $0xc] ss:$16 sps:$4 sm:$0xff]   ;;  %v7341_v4 = vld [vmem:[%s8035_s8] ss:$16 sps:$4 sm:$0xff]  }
  0x8b   : > { %1747 = vmatprep.subr.bf16.mxu0 %v7927_v34  ;;  %2036 = vmatprep.subr.bf16.mxu1 %v7927_v34  ;;  %v7327_v53 = vld [vmem:[#allocation3 + $0x70] sm:$0xff]   ;;  %v7329_v56 = vld [vmem:[#allocation3 + $0x68] sm:$0xff]   ;;  %v7331_v58 = vld [vmem:[#allocation3 + $0x60] sm:$0xff]  }
  0x8c   : > { %v7328_v55 = vld [vmem:[#allocation3 + $0xf0] sm:$0xff]   ;;  %1775 = vmatprep.mubr.bf16.mxu0 %v7343_v52  ;;  %2064 = vmatprep.mubr.bf16.mxu1 %v7346_v54  ;;  %v7330_v57 = vld [vmem:[#allocation3 + $0xe8] sm:$0xff]   ;;  %v7332_v59 = vld [vmem:[#allocation3 + $0xe0] sm:$0xff]  }
  0x8d   : > { %v7333_v60 = vld [vmem:[#allocation3 + $0x58] sm:$0xff]   ;;  %v7335_v62 = vld [vmem:[#allocation3 + $0x50] sm:$0xff]   ;;  %v7337_v0 = vld [vmem:[#allocation3 + $0x48] sm:$0xff]  }
  0x8e   : > { %1748 = vmatpush1.bf16.msra.mxu0 %v7313_v38  ;;  %2037 = vmatpush1.bf16.msra.mxu1 %v7314_v39  ;;  %v7334_v61 = vld [vmem:[#allocation3 + $0xd8] sm:$0xff]   ;;  %v7336_v63 = vld [vmem:[#allocation3 + $0xd0] sm:$0xff]   ;;  %v7338_v1 = vld [vmem:[#allocation3 + $0xc8] sm:$0xff]  }
  0x8f   : > { %1749 = vmatprep.subr.bf16.mxu0 %v7927_v34  ;;  %2038 = vmatprep.subr.bf16.mxu1 %v7927_v34  ;;  %v7339_v2 = vld [vmem:[#allocation3 + $0x40] sm:$0xff]   ;;  %v7344_v5 = vld [vmem:[%s8035_s8 + $0x8] ss:$16 sps:$4 sm:$0xff]   ;;  %v7349_v7 = vld [vmem:[%s8035_s8 + $0x2c] ss:$16 sps:$4 sm:$0xff]  }
  0x90   : > { %v7340_v3 = vld [vmem:[#allocation3 + $0xc0] sm:$0xff]   ;;  %v7352_v9 = vld [vmem:[%s8035_s8 + $0x28] ss:$16 sps:$4 sm:$0xff]   ;;  %v7355_v11 = vld [vmem:[%s8035_s8 + $0x4c] ss:$16 sps:$4 sm:$0xff]  }
  0x91   : > { %v7347_v6 = vld [vmem:[%s8035_s8 + $0x24] ss:$16 sps:$4 sm:$0xff]   ;;  %v7351_v8 = vld [vmem:[%s8035_s8 + $0x20] ss:$16 sps:$4 sm:$0xff]   ;;  %v7358_v13 = vld [vmem:[%s8035_s8 + $0x48] ss:$16 sps:$4 sm:$0xff]  }
  0x92   : > { %1750 = vmatpush1.bf16.msra.mxu0 %v7315_v40  ;;  %2039 = vmatpush1.bf16.msra.mxu1 %v7316_v41  ;;  %v7353_v10 = vld [vmem:[%s8035_s8 + $0x44] ss:$16 sps:$4 sm:$0xff]   ;;  %v7357_v12 = vld [vmem:[%s8035_s8 + $0x40] ss:$16 sps:$4 sm:$0xff]   ;;  %v7361_v15 = vld [vmem:[%s8035_s8 + $0x6c] ss:$16 sps:$4 sm:$0xff]  }
  0x93   : > { %1751 = vmatprep.subr.bf16.mxu0 %v7927_v34  ;;  %2040 = vmatprep.subr.bf16.mxu1 %v7927_v34  ;;  %v7359_v14 = vld [vmem:[%s8035_s8 + $0x64] ss:$16 sps:$4 sm:$0xff]   ;;  %v7363_v16 = vld [vmem:[%s8035_s8 + $0x60] ss:$16 sps:$4 sm:$0xff]   ;;  %v7364_v17 = vld [vmem:[%s8035_s8 + $0x68] ss:$16 sps:$4 sm:$0xff]  }
  0x94   : > { %v7365_v18 = vld [vmem:[%s8035_s8 + $0x84] ss:$16 sps:$4 sm:$0xff]   ;;  %v7367_v19 = vld [vmem:[%s8035_s8 + $0x8c] ss:$16 sps:$4 sm:$0xff]   ;;  %v7369_v20 = vld [vmem:[%s8035_s8 + $0x80] ss:$16 sps:$4 sm:$0xff]  }
  0x95   : > { %v7370_v21 = vld [vmem:[%s8035_s8 + $0x88] ss:$16 sps:$4 sm:$0xff]   ;;  %v7371_v22 = vld [vmem:[%s8035_s8 + $0xa4] ss:$16 sps:$4 sm:$0xff]   ;;  %v7373_v23 = vld [vmem:[%s8035_s8 + $0xac] ss:$16 sps:$4 sm:$0xff]  }
  0x96   : > { %1752 = vmatpush1.bf16.msra.mxu0 %v7317_v42  ;;  %2041 = vmatpush1.bf16.msra.mxu1 %v7318_v43  ;;  %v7375_v24 = vld [vmem:[%s8035_s8 + $0xa0] ss:$16 sps:$4 sm:$0xff]   ;;  %v7376_v25 = vld [vmem:[%s8035_s8 + $0xa8] ss:$16 sps:$4 sm:$0xff]   ;;  %v7377_v26 = vld [vmem:[%s8035_s8 + $0xc4] ss:$16 sps:$4 sm:$0xff]  }
  0x97   : > { %1753 = vmatprep.subr.bf16.mxu0 %v7927_v34  ;;  %2042 = vmatprep.subr.bf16.mxu1 %v7927_v34  ;;  %v7379_v27 = vld [vmem:[%s8035_s8 + $0xcc] ss:$16 sps:$4 sm:$0xff]   ;;  %v7381_v28 = vld [vmem:[%s8035_s8 + $0xc0] ss:$16 sps:$4 sm:$0xff]   ;;  %v7382_v29 = vld [vmem:[%s8035_s8 + $0xc8] ss:$16 sps:$4 sm:$0xff]  }
  0x98   : > { %v7383_v30 = vld [vmem:[%s8035_s8 + $0xe4] ss:$16 sps:$4 sm:$0xff]   ;;  %v7385_v31 = vld [vmem:[%s8035_s8 + $0xec] ss:$16 sps:$4 sm:$0xff]   ;;  %v7387_v32 = vld [vmem:[%s8035_s8 + $0xe0] ss:$16 sps:$4 sm:$0xff]  }
  0x99   : > { %v7388_v33 = vld [vmem:[%s8035_s8 + $0xe8] ss:$16 sps:$4 sm:$0xff]   ;;  %v7391_v35 = vld [vmem:[%s8035_s8 + $0x10c] ss:$16 sps:$4 sm:$0xff]   ;;  %v7393_v36 = vld [vmem:[%s8035_s8 + $0x100] ss:$16 sps:$4 sm:$0xff]  }
  0x9a   : > { %1754 = vmatpush1.bf16.msra.mxu0 %v7319_v44  ;;  %2043 = vmatpush1.bf16.msra.mxu1 %v7320_v45  ;;  %v7394_v37 = vld [vmem:[%s8035_s8 + $0x108] ss:$16 sps:$4 sm:$0xff]   ;;  %v7395_v38 = vld [vmem:[%s8035_s8 + $0x124] ss:$16 sps:$4 sm:$0xff]   ;;  %v7397_v39 = vld [vmem:[%s8035_s8 + $0x12c] ss:$16 sps:$4 sm:$0xff]  }
  0x9b   : > { %1755 = vmatprep.subr.bf16.mxu0 %v7927_v34  ;;  %2044 = vmatprep.subr.bf16.mxu1 %v7927_v34  ;;  %v7399_v40 = vld [vmem:[%s8035_s8 + $0x120] ss:$16 sps:$4 sm:$0xff]   ;;  %v7400_v41 = vld [vmem:[%s8035_s8 + $0x128] ss:$16 sps:$4 sm:$0xff]   ;;  %v7401_v42 = vld [vmem:[%s8035_s8 + $0x144] ss:$16 sps:$4 sm:$0xff]  }
  0x9c   : > { %v7403_v43 = vld [vmem:[%s8035_s8 + $0x14c] ss:$16 sps:$4 sm:$0xff]   ;;  %v7405_v44 = vld [vmem:[%s8035_s8 + $0x140] ss:$16 sps:$4 sm:$0xff]   ;;  %v7406_v45 = vld [vmem:[%s8035_s8 + $0x148] ss:$16 sps:$4 sm:$0xff]  }
  0x9d   : > { %v7417_v52 = vld [vmem:[%s8035_s8 + $0x180] ss:$16 sps:$4 sm:$0xff]   ;;  %v7419_v54 = vld [vmem:[%s8035_s8 + $0x1a4] ss:$16 sps:$4 sm:$0xff]  }
  0x9e   : > { %1756 = vmatpush1.bf16.msra.mxu0 %v7321_v46  ;;  %2045 = vmatpush1.bf16.msra.mxu1 %v7322_v47  ;;  %v7407_v46 = vld [vmem:[%s8035_s8 + $0x164] ss:$16 sps:$4 sm:$0xff]   ;;  %v7409_v47 = vld [vmem:[%s8035_s8 + $0x16c] ss:$16 sps:$4 sm:$0xff]  }
  0x9f   : > { %1757 = vmatprep.subr.bf16.mxu0 %v7927_v34  ;;  %2046 = vmatprep.subr.bf16.mxu1 %v7927_v34 }
  0xa2   : > { %1758 = vmatpush1.bf16.msra.mxu0 %v7323_v48  ;;  %2047 = vmatpush1.bf16.msra.mxu1 %v7324_v49  ;;  %v7411_v48 = vld [vmem:[%s8035_s8 + $0x160] ss:$16 sps:$4 sm:$0xff]   ;;  %v7412_v49 = vld [vmem:[%s8035_s8 + $0x168] ss:$16 sps:$4 sm:$0xff]  }
  0xa3   : > { %1759 = vmatprep.subr.bf16.mxu0 %v7927_v34  ;;  %2048 = vmatprep.subr.bf16.mxu1 %v7927_v34 }
  0xa6   : > { %1760 = vmatpush2.bf16.msra.mxu0 %v7325_v50  ;;  %2049 = vmatpush2.bf16.msra.mxu1 %v7326_v51  ;;  %v7413_v50 = vld [vmem:[%s8035_s8 + $0x184] ss:$16 sps:$4 sm:$0xff]   ;;  %v7415_v51 = vld [vmem:[%s8035_s8 + $0x18c] ss:$16 sps:$4 sm:$0xff]  }
  0xa7   : > { %1761 = vmatprep.subr.bf16.mxu0 %v7927_v34  ;;  %2050 = vmatprep.subr.bf16.mxu1 %v7927_v34 }
  0xaa   : > { %1762 = vmatpush2.bf16.msra.mxu0 %v7327_v53  ;;  %2051 = vmatpush2.bf16.msra.mxu1 %v7328_v55  ;;  %v7418_v53 = vld [vmem:[%s8035_s8 + $0x188] ss:$16 sps:$4 sm:$0xff]   ;;  %v7421_v55 = vld [vmem:[%s8035_s8 + $0x1ac] ss:$16 sps:$4 sm:$0xff]  }
  0xab   : > { %1763 = vmatprep.subr.bf16.mxu0 %v7927_v34  ;;  %2052 = vmatprep.subr.bf16.mxu1 %v7927_v34 }
  0xae   : > { %1764 = vmatpush2.bf16.msra.mxu0 %v7329_v56  ;;  %2053 = vmatpush2.bf16.msra.mxu1 %v7330_v57  ;;  %v7423_v56 = vld [vmem:[%s8035_s8 + $0x1a0] ss:$16 sps:$4 sm:$0xff]   ;;  %v7424_v57 = vld [vmem:[%s8035_s8 + $0x1a8] ss:$16 sps:$4 sm:$0xff]  }
  0xaf   : > { %1765 = vmatprep.subr.bf16.mxu0 %v7927_v34  ;;  %2054 = vmatprep.subr.bf16.mxu1 %v7927_v34 }
  0xb2   : > { %1766 = vmatpush2.bf16.msra.mxu0 %v7331_v58  ;;  %2055 = vmatpush2.bf16.msra.mxu1 %v7332_v59  ;;  %v7425_v58 = vld [vmem:[%s8035_s8 + $0x1c4] ss:$16 sps:$4 sm:$0xff]   ;;  %v7427_v59 = vld [vmem:[%s8035_s8 + $0x1cc] ss:$16 sps:$4 sm:$0xff]  }
  0xb3   : > { %1767 = vmatprep.subr.bf16.mxu0 %v7927_v34  ;;  %2056 = vmatprep.subr.bf16.mxu1 %v7927_v34 }
  0xb6   : > { %1768 = vmatpush2.bf16.msra.mxu0 %v7333_v60  ;;  %2057 = vmatpush2.bf16.msra.mxu1 %v7334_v61  ;;  %v7429_v60 = vld [vmem:[%s8035_s8 + $0x1c0] ss:$16 sps:$4 sm:$0xff]   ;;  %v7430_v61 = vld [vmem:[%s8035_s8 + $0x1c8] ss:$16 sps:$4 sm:$0xff]  }
  0xb7   : > { %1769 = vmatprep.subr.bf16.mxu0 %v7927_v34  ;;  %2058 = vmatprep.subr.bf16.mxu1 %v7927_v34 }
  0xba   : > { %1770 = vmatpush2.bf16.msra.mxu0 %v7335_v62  ;;  %2059 = vmatpush2.bf16.msra.mxu1 %v7336_v63  ;;  %v7431_v62 = vld [vmem:[%s8035_s8 + $0x1e4] ss:$16 sps:$4 sm:$0xff]   ;;  %v7433_v63 = vld [vmem:[%s8035_s8 + $0x1ec] ss:$16 sps:$4 sm:$0xff]  }
  0xbb   : > { %1771 = vmatprep.subr.bf16.mxu0 %v7927_v34  ;;  %2060 = vmatprep.subr.bf16.mxu1 %v7927_v34 }
  0xbe   : > { %1772 = vmatpush2.bf16.msra.mxu0 %v7337_v0  ;;  %2061 = vmatpush2.bf16.msra.mxu1 %v7338_v1  ;;  %v7435_v0 = vld [vmem:[%s8035_s8 + $0x1e0] ss:$16 sps:$4 sm:$0xff]   ;;  %v7436_v1 = vld [vmem:[%s8035_s8 + $0x1e8] ss:$16 sps:$4 sm:$0xff]  }
  0xbf   : > { %1773 = vmatprep.subr.bf16.mxu0 %v7927_v34  ;;  %2062 = vmatprep.subr.bf16.mxu1 %v7927_v34  ;;  %v7389_v34 = vld [vmem:[%s8035_s8 + $0x104] ss:$16 sps:$4 sm:$0xff]  }
  0xc2   : > { %1774 = vmatpush2.bf16.msra.mxu0 %v7339_v2  ;;  %2063 = vmatpush2.bf16.msra.mxu1 %v7340_v3  ;;  %v7437_v2 = vld [vmem:[%s8035_s8 + $0x204] ss:$16 sps:$4 sm:$0xff]   ;;  %v7439_v3 = vld [vmem:[%s8035_s8 + $0x20c] ss:$16 sps:$4 sm:$0xff]  }
  0xc5   : > { %1776 = vmatmul.mubr.bf16.vlgmr.msra.gmra.mxu0 %v7341_v4  ;;  %2065 = vmatmul.mubr.bf16.vlgmr.msra.gmra.mxu1 %v7344_v5  ;;  %v7441_v4 = vld [vmem:[%s8035_s8 + $0x200] ss:$16 sps:$4 sm:$0xff]   ;;  %v7442_v5 = vld [vmem:[%s8035_s8 + $0x208] ss:$16 sps:$4 sm:$0xff]  }
  0xc6   : > { %1783 = vmatprep.mubr.bf16.mxu0 %v7347_v6  ;;  %2072 = vmatprep.mubr.bf16.mxu1 %v7349_v7  ;;  %v7443_v6 = vld [vmem:[%s8035_s8 + $0x224] ss:$16 sps:$4 sm:$0xff]   ;;  %v7445_v7 = vld [vmem:[%s8035_s8 + $0x22c] ss:$16 sps:$4 sm:$0xff]  }
  0xcd   : > { %1784 = vmatmul.mubr.bf16.gmra.mxu0 %v7351_v8  ;;  %2073 = vmatmul.mubr.bf16.gmra.mxu1 %v7352_v9  ;;  %v7447_v8 = vld [vmem:[%s8035_s8 + $0x220] ss:$16 sps:$4 sm:$0xff]   ;;  %v7448_v9 = vld [vmem:[%s8035_s8 + $0x228] ss:$16 sps:$4 sm:$0xff]  }
  0xce   : > { %1791 = vmatprep.mubr.bf16.mxu0 %v7353_v10  ;;  %2080 = vmatprep.mubr.bf16.mxu1 %v7355_v11  ;;  %v7449_v10 = vld [vmem:[%s8035_s8 + $0x244] ss:$16 sps:$4 sm:$0xff]   ;;  %v7451_v11 = vld [vmem:[%s8035_s8 + $0x24c] ss:$16 sps:$4 sm:$0xff]  }
  0xd5   : > { %1792 = vmatmul.mubr.bf16.gmra.mxu0 %v7357_v12  ;;  %2081 = vmatmul.mubr.bf16.gmra.mxu1 %v7358_v13  ;;  %v7453_v12 = vld [vmem:[%s8035_s8 + $0x240] ss:$16 sps:$4 sm:$0xff]   ;;  %v7454_v13 = vld [vmem:[%s8035_s8 + $0x248] ss:$16 sps:$4 sm:$0xff]  }
  0xd6   : > { %1799 = vmatprep.mubr.bf16.mxu0 %v7359_v14  ;;  %2088 = vmatprep.mubr.bf16.mxu1 %v7361_v15  ;;  %v7455_v14 = vld [vmem:[%s8035_s8 + $0x264] ss:$16 sps:$4 sm:$0xff]   ;;  %v7457_v15 = vld [vmem:[%s8035_s8 + $0x26c] ss:$16 sps:$4 sm:$0xff]  }
  0xdd   : > { %1800 = vmatmul.mubr.bf16.gmra.mxu0 %v7363_v16  ;;  %2089 = vmatmul.mubr.bf16.gmra.mxu1 %v7364_v17  ;;  %v7459_v16 = vld [vmem:[%s8035_s8 + $0x260] ss:$16 sps:$4 sm:$0xff]   ;;  %v7460_v17 = vld [vmem:[%s8035_s8 + $0x268] ss:$16 sps:$4 sm:$0xff]  }
  0xde   : > { %1807 = vmatprep.mubr.bf16.mxu0 %v7365_v18  ;;  %2096 = vmatprep.mubr.bf16.mxu1 %v7367_v19  ;;  %v7461_v18 = vld [vmem:[%s8035_s8 + $0x284] ss:$16 sps:$4 sm:$0xff]   ;;  %v7463_v19 = vld [vmem:[%s8035_s8 + $0x28c] ss:$16 sps:$4 sm:$0xff]  }
  0xe5   : > { %1808 = vmatmul.mubr.bf16.gmra.mxu0 %v7369_v20  ;;  %2097 = vmatmul.mubr.bf16.gmra.mxu1 %v7370_v21  ;;  %v7465_v20 = vld [vmem:[%s8035_s8 + $0x280] ss:$16 sps:$4 sm:$0xff]   ;;  %v7466_v21 = vld [vmem:[%s8035_s8 + $0x288] ss:$16 sps:$4 sm:$0xff]  }
  0xe6   : > { %1815 = vmatprep.mubr.bf16.mxu0 %v7371_v22  ;;  %2104 = vmatprep.mubr.bf16.mxu1 %v7373_v23  ;;  %v7467_v22 = vld [vmem:[%s8035_s8 + $0x2a4] ss:$16 sps:$4 sm:$0xff]   ;;  %v7469_v23 = vld [vmem:[%s8035_s8 + $0x2ac] ss:$16 sps:$4 sm:$0xff]  }
  0xed   : > { %1816 = vmatmul.mubr.bf16.gmra.mxu0 %v7375_v24  ;;  %2105 = vmatmul.mubr.bf16.gmra.mxu1 %v7376_v25  ;;  %v7471_v24 = vld [vmem:[%s8035_s8 + $0x2a0] ss:$16 sps:$4 sm:$0xff]   ;;  %v7472_v25 = vld [vmem:[%s8035_s8 + $0x2a8] ss:$16 sps:$4 sm:$0xff]  }
  0xee   : > { %1823 = vmatprep.mubr.bf16.mxu0 %v7377_v26  ;;  %2112 = vmatprep.mubr.bf16.mxu1 %v7379_v27  ;;  %v7473_v26 = vld [vmem:[%s8035_s8 + $0x2c4] ss:$16 sps:$4 sm:$0xff]   ;;  %v7475_v27 = vld [vmem:[%s8035_s8 + $0x2cc] ss:$16 sps:$4 sm:$0xff]  }
  0xf5   : > { %1824 = vmatmul.mubr.bf16.gmra.mxu0 %v7381_v28  ;;  %2113 = vmatmul.mubr.bf16.gmra.mxu1 %v7382_v29  ;;  %v7477_v28 = vld [vmem:[%s8035_s8 + $0x2c0] ss:$16 sps:$4 sm:$0xff]   ;;  %v7478_v29 = vld [vmem:[%s8035_s8 + $0x2c8] ss:$16 sps:$4 sm:$0xff]  }
  0xf6   : > { %1831 = vmatprep.mubr.bf16.mxu0 %v7383_v30  ;;  %2120 = vmatprep.mubr.bf16.mxu1 %v7385_v31  ;;  %v7479_v30 = vld [vmem:[%s8035_s8 + $0x2e4] ss:$16 sps:$4 sm:$0xff]   ;;  %v7481_v31 = vld [vmem:[%s8035_s8 + $0x2ec] ss:$16 sps:$4 sm:$0xff]  }
  0xfd   : > { %1832 = vmatmul.mubr.bf16.gmra.mxu0 %v7387_v32  ;;  %2121 = vmatmul.mubr.bf16.gmra.mxu1 %v7388_v33  ;;  %v7483_v32 = vld [vmem:[%s8035_s8 + $0x2e0] ss:$16 sps:$4 sm:$0xff]   ;;  %v7484_v33 = vld [vmem:[%s8035_s8 + $0x2e8] ss:$16 sps:$4 sm:$0xff]  }
  0xfe   : > { %1839 = vmatprep.mubr.bf16.mxu0 %v7389_v34  ;;  %2128 = vmatprep.mubr.bf16.mxu1 %v7391_v35  ;;  %v7485_v34 = vld [vmem:[%s8035_s8 + $0x304] ss:$16 sps:$4 sm:$0xff]   ;;  %v7487_v35 = vld [vmem:[%s8035_s8 + $0x30c] ss:$16 sps:$4 sm:$0xff]  }
 0x105   : > { %1840 = vmatmul.mubr.bf16.gmra.mxu0 %v7393_v36  ;;  %2129 = vmatmul.mubr.bf16.gmra.mxu1 %v7394_v37  ;;  %v7489_v36 = vld [vmem:[%s8035_s8 + $0x300] ss:$16 sps:$4 sm:$0xff]   ;;  %v7490_v37 = vld [vmem:[%s8035_s8 + $0x308] ss:$16 sps:$4 sm:$0xff]  }
 0x106   : > { %1847 = vmatprep.mubr.bf16.mxu0 %v7395_v38  ;;  %2136 = vmatprep.mubr.bf16.mxu1 %v7397_v39  ;;  %v7491_v38 = vld [vmem:[%s8035_s8 + $0x324] ss:$16 sps:$4 sm:$0xff]   ;;  %v7493_v39 = vld [vmem:[%s8035_s8 + $0x32c] ss:$16 sps:$4 sm:$0xff]  }
 0x10d   : > { %1848 = vmatmul.mubr.bf16.gmra.mxu0 %v7399_v40  ;;  %2137 = vmatmul.mubr.bf16.gmra.mxu1 %v7400_v41  ;;  %v651_v41 = vld [vmem:[#allocation5 + $0xb0] sm:$0xff] }
 0x10e   : > { %1855 = vmatprep.mubr.bf16.mxu0 %v7401_v42  ;;  %2144 = vmatprep.mubr.bf16.mxu1 %v7403_v43 }
 0x115   : > { %1856 = vmatmul.mubr.bf16.gmra.mxu0 %v7405_v44  ;;  %2145 = vmatmul.mubr.bf16.gmra.mxu1 %v7406_v45 }
 0x116   : > { %1863 = vmatprep.mubr.bf16.mxu0 %v7407_v46  ;;  %2152 = vmatprep.mubr.bf16.mxu1 %v7409_v47 }
 0x11d   : > { %1864 = vmatmul.mubr.bf16.gmra.mxu0 %v7411_v48  ;;  %2153 = vmatmul.mubr.bf16.gmra.mxu1 %v7412_v49  ;;  %v7495_v48 = vld [vmem:[%s8035_s8 + $0x320] ss:$16 sps:$4 sm:$0xff]  }
 0x11e   : > { %1871 = vmatprep.mubr.bf16.mxu0 %v7413_v50  ;;  %2160 = vmatprep.mubr.bf16.mxu1 %v7415_v51  ;;  %v652_v49 = vld [vmem:[#allocation5 + $0x1b0] sm:$0xff]  ;;  %v7496_v51 = vld [vmem:[%s8035_s8 + $0x328] ss:$16 sps:$4 sm:$0xff]  }
 0x125   : > { %1872 = vmatmul.mubr.bf16.gmra.mxu0 %v7417_v52  ;;  %2161 = vmatmul.mubr.bf16.gmra.mxu1 %v7418_v53  ;;  %v7497_v52 = vld [vmem:[%s8035_s8 + $0x344] ss:$16 sps:$4 sm:$0xff]  }
 0x126   : > { %1879 = vmatprep.mubr.bf16.mxu0 %v7419_v54  ;;  %2168 = vmatprep.mubr.bf16.mxu1 %v7421_v55  ;;  %v7499_v55 = vld [vmem:[%s8035_s8 + $0x34c] ss:$16 sps:$4 sm:$0xff]  }
 0x12d   : > { %1880 = vmatmul.mubr.bf16.gmra.mxu0 %v7423_v56  ;;  %2169 = vmatmul.mubr.bf16.gmra.mxu1 %v7424_v57 }
 0x12e   : > { %1887 = vmatprep.mubr.bf16.mxu0 %v7425_v58  ;;  %2176 = vmatprep.mubr.bf16.mxu1 %v7427_v59  ;;  %v653_v59 = vld [vmem:[#allocation5 + $0xd8] sm:$0xff] }
 0x135   : > { %1888 = vmatmul.mubr.bf16.gmra.mxu0 %v7429_v60  ;;  %2177 = vmatmul.mubr.bf16.gmra.mxu1 %v7430_v61 }
 0x136   : > { %1895 = vmatprep.mubr.bf16.mxu0 %v7431_v62  ;;  %2184 = vmatprep.mubr.bf16.mxu1 %v7433_v63 }
 0x13d   : > { %1896 = vmatmul.mubr.bf16.gmra.mxu0 %v7435_v0  ;;  %2185 = vmatmul.mubr.bf16.gmra.mxu1 %v7436_v1 }
 0x13e   : > { %1903 = vmatprep.mubr.bf16.mxu0 %v7437_v2  ;;  %2192 = vmatprep.mubr.bf16.mxu1 %v7439_v3  ;;  %v7501_v2 = vld [vmem:[%s8035_s8 + $0x340] ss:$16 sps:$4 sm:$0xff]   ;;  %v654_v3 = vld [vmem:[#allocation5 + $0x18] sm:$0xff] }
 0x145   : > { %1904 = vmatmul.mubr.bf16.gmra.mxu0 %v7441_v4  ;;  %2193 = vmatmul.mubr.bf16.gmra.mxu1 %v7442_v5  ;;  %v7502_v5 = vld [vmem:[%s8035_s8 + $0x348] ss:$16 sps:$4 sm:$0xff]  }
 0x146   : > { %1911 = vmatprep.mubr.bf16.mxu0 %v7443_v6  ;;  %2200 = vmatprep.mubr.bf16.mxu1 %v7445_v7  ;;  %v7503_v6 = vld [vmem:[%s8035_s8 + $0x364] ss:$16 sps:$4 sm:$0xff]  }
 0x14d   : > { %1912 = vmatmul.mubr.bf16.gmra.mxu0 %v7447_v8  ;;  %2201 = vmatmul.mubr.bf16.gmra.mxu1 %v7448_v9  ;;  %v7505_v9 = vld [vmem:[%s8035_s8 + $0x36c] ss:$16 sps:$4 sm:$0xff]  }
 0x14e   : > { %1919 = vmatprep.mubr.bf16.mxu0 %v7449_v10  ;;  %2208 = vmatprep.mubr.bf16.mxu1 %v7451_v11 }
 0x155   : > { %1920 = vmatmul.mubr.bf16.gmra.mxu0 %v7453_v12  ;;  %2209 = vmatmul.mubr.bf16.gmra.mxu1 %v7454_v13  ;;  %v655_v13 = vld [vmem:[#allocation5 + $0x50] sm:$0xff] }
 0x156   : > { %1927 = vmatprep.mubr.bf16.mxu0 %v7455_v14  ;;  %2216 = vmatprep.mubr.bf16.mxu1 %v7457_v15 }
 0x15d   : > { %1928 = vmatmul.mubr.bf16.gmra.mxu0 %v7459_v16  ;;  %2217 = vmatmul.mubr.bf16.gmra.mxu1 %v7460_v17 }
 0x15e   : > { %1935 = vmatprep.mubr.bf16.mxu0 %v7461_v18  ;;  %2224 = vmatprep.mubr.bf16.mxu1 %v7463_v19 }
 0x165   : > { %1936 = vmatmul.mubr.bf16.gmra.mxu0 %v7465_v20  ;;  %2225 = vmatmul.mubr.bf16.gmra.mxu1 %v7466_v21  ;;  %v7507_v20 = vld [vmem:[%s8035_s8 + $0x360] ss:$16 sps:$4 sm:$0xff]   ;;  %v656_v21 = vld [vmem:[#allocation5 + $0x168] sm:$0xff] }
 0x166   : > { %1943 = vmatprep.mubr.bf16.mxu0 %v7467_v22  ;;  %2232 = vmatprep.mubr.bf16.mxu1 %v7469_v23  ;;  %v7508_v23 = vld [vmem:[%s8035_s8 + $0x368] ss:$16 sps:$4 sm:$0xff]  }
 0x16d   : > { %1944 = vmatmul.mubr.bf16.gmra.mxu0 %v7471_v24  ;;  %2233 = vmatmul.mubr.bf16.gmra.mxu1 %v7472_v25  ;;  %v7511_v24 = vld [vmem:[%s8035_s8 + $0x384] ss:$16 sps:$4 sm:$0xff]  }
 0x16e   : > { %1951 = vmatprep.mubr.bf16.mxu0 %v7473_v26  ;;  %2240 = vmatprep.mubr.bf16.mxu1 %v7475_v27  ;;  %v7514_v27 = vld [vmem:[%s8035_s8 + $0x38c] ss:$16 sps:$4 sm:$0xff]  }
 0x175   : > { %1952 = vmatmul.mubr.bf16.gmra.mxu0 %v7477_v28  ;;  %2241 = vmatmul.mubr.bf16.gmra.mxu1 %v7478_v29 }
 0x176   : > { %1959 = vmatprep.mubr.bf16.mxu0 %v7479_v30  ;;  %2248 = vmatprep.mubr.bf16.mxu1 %v7481_v31  ;;  %v657_v31 = vld [vmem:[#allocation5 + $0x130] sm:$0xff] }
 0x17d   : > { %1960 = vmatmul.mubr.bf16.gmra.mxu0 %v7483_v32  ;;  %2249 = vmatmul.mubr.bf16.gmra.mxu1 %v7484_v33 }
 0x17e   : > { %1967 = vmatprep.mubr.bf16.mxu0 %v7485_v34  ;;  %2256 = vmatprep.mubr.bf16.mxu1 %v7487_v35 }
 0x185   : > { %v1777_v40 = vpop.f32.mrf.mxu0  ;;  %1968 = vmatmul.mubr.bf16.gmra.mxu0 %v7489_v36  ;;  %v2066_v42 = vpop.f32.mrf.mxu1  ;;  %2257 = vmatmul.mubr.bf16.gmra.mxu1 %v7490_v37 }
 0x186   : > { %1975 = vmatprep.mubr.bf16.mxu0 %v7491_v38  ;;  %v2067_v43 = vadd.f32 %v2066_v42, %v1777_v40  ;;  %2264 = vmatprep.mubr.bf16.mxu1 %v7493_v39  ;;  %v7509_v38 = vld [vmem:[%s8035_s8 + $0x380] ss:$16 sps:$4 sm:$0xff]   ;;  %v658_v39 = vld [vmem:[#allocation5 + $0x48] sm:$0xff]  ;;  %v7517_v42 = vld [vmem:[%s8035_s8 + $0x3a4] ss:$16 sps:$4 sm:$0xff]  }
 0x187   : > { %v1779_v44 = vpop.f32.mrf.mxu0  ;;  %v2068_v45 = vpop.f32.mrf.mxu1 }
 0x188   : > { %v2321_v46 = vadd.f32 %v2067_v43, %v651_v41  ;;  %v7512_v41 = vld [vmem:[%s8035_s8 + $0x388] ss:$16 sps:$4 sm:$0xff]   ;;  %v7520_v45 = vld [vmem:[%s8035_s8 + $0x3ac] ss:$16 sps:$4 sm:$0xff]  }
 0x189   : > { %v1780_v47 = vpop.f32.mrf.mxu0  ;;  %v2069_v50 = vpop.f32.mrf.mxu1 }
 0x18a   : > { %2385 = vst [vmem:[#allocation5 + $0xb0] sm:$0xff] %v2321_v46  ;;  %v2070_v53 = vadd.f32 %v2069_v50, %v1780_v47 }
 0x18b   : > { %v1782_v54 = vpop.f32.mrf.mxu0  ;;  %v2071_v56 = vpop.f32.mrf.mxu1 }
 0x18c   : > { %v2322_v57 = vadd.f32 %v2070_v53, %v652_v49  ;;  %v659_v49 = vld [vmem:[#allocation5 + $0x180] sm:$0xff] }
 0x18d   : > { %v1785_v58 = vpop.f32.mrf.mxu0  ;;  %1976 = vmatmul.mubr.bf16.gmra.mxu0 %v7495_v48  ;;  %v2074_v60 = vpop.f32.mrf.mxu1  ;;  %2265 = vmatmul.mubr.bf16.gmra.mxu1 %v7496_v51  ;;  %v7515_v56 = vld [vmem:[%s8035_s8 + $0x3a0] ss:$16 sps:$4 sm:$0xff]  }
 0x18e   : > { %1983 = vmatprep.mubr.bf16.mxu0 %v7497_v52  ;;  %2386 = vst [vmem:[#allocation5 + $0x1b0] sm:$0xff] %v2322_v57  ;;  %v2075_v61 = vadd.f32 %v2074_v60, %v1785_v58  ;;  %2272 = vmatprep.mubr.bf16.mxu1 %v7499_v55  ;;  %v660_v57 = vld [vmem:[#allocation5 + $0x110] sm:$0xff] }
 0x18f   : > { %v1787_v62 = vpop.f32.mrf.mxu0  ;;  %v2076_v63 = vpop.f32.mrf.mxu1  ;;  %v7523_v60 = vld [vmem:[%s8035_s8 + $0x3c4] ss:$16 sps:$4 sm:$0xff]  }
 0x190   : > { %v2323_v0 = vadd.f32 %v2075_v61, %v653_v59  ;;  %v7518_v59 = vld [vmem:[%s8035_s8 + $0x3a8] ss:$16 sps:$4 sm:$0xff]   ;;  %v7526_v63 = vld [vmem:[%s8035_s8 + $0x3cc] ss:$16 sps:$4 sm:$0xff]  }
 0x191   : > { %v1788_v1 = vpop.f32.mrf.mxu0  ;;  %v2077_v4 = vpop.f32.mrf.mxu1 }
 0x192   : > { %2387 = vst [vmem:[#allocation5 + $0xd8] sm:$0xff] %v2323_v0  ;;  %v2078_v7 = vadd.f32 %v2077_v4, %v1788_v1 }
 0x193   : > { %v1790_v8 = vpop.f32.mrf.mxu0  ;;  %v2079_v10 = vpop.f32.mrf.mxu1 }
 0x194   : > { %v2324_v11 = vadd.f32 %v2078_v7, %v654_v3  ;;  %v661_v3 = vld [vmem:[#allocation5 + $0x118] sm:$0xff]  ;;  %v7521_v10 = vld [vmem:[%s8035_s8 + $0x3c0] ss:$16 sps:$4 sm:$0xff]  }
 0x195   : > { %v1793_v12 = vpop.f32.mrf.mxu0  ;;  %1984 = vmatmul.mubr.bf16.gmra.mxu0 %v7501_v2  ;;  %v2082_v14 = vpop.f32.mrf.mxu1  ;;  %2273 = vmatmul.mubr.bf16.gmra.mxu1 %v7502_v5 }
 0x196   : > { %1991 = vmatprep.mubr.bf16.mxu0 %v7503_v6  ;;  %2388 = vst [vmem:[#allocation5 + $0x18] sm:$0xff] %v2324_v11  ;;  %v2083_v15 = vadd.f32 %v2082_v14, %v1793_v12  ;;  %2280 = vmatprep.mubr.bf16.mxu1 %v7505_v9  ;;  %v662_v11 = vld [vmem:[#allocation5 + $0x98] sm:$0xff]  ;;  %v7529_v14 = vld [vmem:[%s8035_s8 + $0x3e4] ss:$16 sps:$4 sm:$0xff]  }
 0x197   : > { %v1795_v16 = vpop.f32.mrf.mxu0  ;;  %v2084_v17 = vpop.f32.mrf.mxu1 }
 0x198   : > { %v2325_v18 = vadd.f32 %v2083_v15, %v655_v13  ;;  %v7524_v13 = vld [vmem:[%s8035_s8 + $0x3c8] ss:$16 sps:$4 sm:$0xff]   ;;  %v7532_v17 = vld [vmem:[%s8035_s8 + $0x3ec] ss:$16 sps:$4 sm:$0xff]  }
 0x199   : > { %v1796_v19 = vpop.f32.mrf.mxu0  ;;  %v2085_v22 = vpop.f32.mrf.mxu1 }
 0x19a   : > { %2389 = vst [vmem:[#allocation5 + $0x50] sm:$0xff] %v2325_v18  ;;  %v2086_v25 = vadd.f32 %v2085_v22, %v1796_v19 }
 0x19b   : > { %v1798_v26 = vpop.f32.mrf.mxu0  ;;  %v2087_v28 = vpop.f32.mrf.mxu1 }
 0x19c   : > { %v2326_v29 = vadd.f32 %v2086_v25, %v656_v21  ;;  %v663_v21 = vld [vmem:[#allocation5 + $0x120] sm:$0xff] }
 0x19d   : > { %v1801_v30 = vpop.f32.mrf.mxu0  ;;  %1992 = vmatmul.mubr.bf16.gmra.mxu0 %v7507_v20  ;;  %v2090_v32 = vpop.f32.mrf.mxu1  ;;  %2281 = vmatmul.mubr.bf16.gmra.mxu1 %v7508_v23  ;;  %v7527_v28 = vld [vmem:[%s8035_s8 + $0x3e0] ss:$16 sps:$4 sm:$0xff]  }
 0x19e   : > { %1999 = vmatprep.mubr.bf16.mxu0 %v7511_v24  ;;  %2390 = vst [vmem:[#allocation5 + $0x168] sm:$0xff] %v2326_v29  ;;  %v2091_v33 = vadd.f32 %v2090_v32, %v1801_v30  ;;  %2288 = vmatprep.mubr.bf16.mxu1 %v7514_v27  ;;  %v664_v29 = vld [vmem:[#allocation5 + $0x150] sm:$0xff] }
 0x19f   : > { %v1803_v34 = vpop.f32.mrf.mxu0  ;;  %v2092_v35 = vpop.f32.mrf.mxu1 }
 0x1a0   : > { %v2327_v36 = vadd.f32 %v2091_v33, %v657_v31  ;;  %v7530_v31 = vld [vmem:[%s8035_s8 + $0x3e8] ss:$16 sps:$4 sm:$0xff]  }
 0x1a1   : > { %v1804_v37 = vpop.f32.mrf.mxu0  ;;  %v2093_v40 = vpop.f32.mrf.mxu1 }
 0x1a2   : > { %2391 = vst [vmem:[#allocation5 + $0x130] sm:$0xff] %v2327_v36  ;;  %v2094_v43 = vadd.f32 %v2093_v40, %v1804_v37  ;;  %v665_v37 = vld [vmem:[#allocation5 + $0x108] sm:$0xff] }
 0x1a3   : > { %v1806_v44 = vpop.f32.mrf.mxu0  ;;  %v2095_v46 = vpop.f32.mrf.mxu1 }
 0x1a4   : > { %v2328_v47 = vadd.f32 %v2094_v43, %v658_v39  ;;  %v666_v44 = vld [vmem:[#allocation5 + $0x60] sm:$0xff] }
 0x1a5   : > { %v1809_v48 = vpop.f32.mrf.mxu0  ;;  %2000 = vmatmul.mubr.bf16.gmra.mxu0 %v7509_v38  ;;  %v2098_v50 = vpop.f32.mrf.mxu1  ;;  %2289 = vmatmul.mubr.bf16.gmra.mxu1 %v7512_v41 }
 0x1a6   : > { %2007 = vmatprep.mubr.bf16.mxu0 %v7517_v42  ;;  %2392 = vst [vmem:[#allocation5 + $0x48] sm:$0xff] %v2328_v47  ;;  %v2099_v51 = vadd.f32 %v2098_v50, %v1809_v48  ;;  %2296 = vmatprep.mubr.bf16.mxu1 %v7520_v45 }
 0x1a7   : > { %v1811_v52 = vpop.f32.mrf.mxu0  ;;  %v2100_v53 = vpop.f32.mrf.mxu1 }
 0x1a8   : > { %v2329_v54 = vadd.f32 %v2099_v51, %v659_v49  ;;  %v667_v51 = vld [vmem:[#allocation5 + $0xe0] sm:$0xff] }
 0x1a9   : > { %v1812_v55 = vpop.f32.mrf.mxu0  ;;  %v2101_v58 = vpop.f32.mrf.mxu1 }
 0x1aa   : > { %2393 = vst [vmem:[#allocation5 + $0x180] sm:$0xff] %v2329_v54  ;;  %v2102_v61 = vadd.f32 %v2101_v58, %v1812_v55  ;;  %v668_v58 = vld [vmem:[#allocation5 + $0x188] sm:$0xff] }
 0x1ab   : > { %v1814_v62 = vpop.f32.mrf.mxu0  ;;  %v2103_v0 = vpop.f32.mrf.mxu1 }
 0x1ac   : > { %v2330_v1 = vadd.f32 %v2102_v61, %v660_v57 }
 0x1ad   : > { %v1817_v2 = vpop.f32.mrf.mxu0  ;;  %2008 = vmatmul.mubr.bf16.gmra.mxu0 %v7515_v56  ;;  %v2106_v4 = vpop.f32.mrf.mxu1  ;;  %2297 = vmatmul.mubr.bf16.gmra.mxu1 %v7518_v59 }
 0x1ae   : > { %2015 = vmatprep.mubr.bf16.mxu0 %v7523_v60  ;;  %2394 = vst [vmem:[#allocation5 + $0x110] sm:$0xff] %v2330_v1  ;;  %v2107_v5 = vadd.f32 %v2106_v4, %v1817_v2  ;;  %2304 = vmatprep.mubr.bf16.mxu1 %v7526_v63  ;;  %v669_v1 = vld [vmem:[#allocation5 + $0x138] sm:$0xff] }
 0x1af   : > { %v1819_v6 = vpop.f32.mrf.mxu0  ;;  %v2108_v7 = vpop.f32.mrf.mxu1 }
 0x1b0   : > { %v2331_v8 = vadd.f32 %v2107_v5, %v661_v3 }
 0x1b1   : > { %v1820_v9 = vpop.f32.mrf.mxu0  ;;  %v2109_v12 = vpop.f32.mrf.mxu1 }
 0x1b2   : > { %2395 = vst [vmem:[#allocation5 + $0x118] sm:$0xff] %v2331_v8  ;;  %v2110_v15 = vadd.f32 %v2109_v12, %v1820_v9  ;;  %v670_v8 = vld [vmem:[#allocation5 + $0x140] sm:$0xff] }
 0x1b3   : > { %v1822_v16 = vpop.f32.mrf.mxu0  ;;  %v2111_v18 = vpop.f32.mrf.mxu1 }
 0x1b4   : > { %v2332_v19 = vadd.f32 %v2110_v15, %v662_v11  ;;  %v671_v15 = vld [vmem:[#allocation5 + $0x80] sm:$0xff] }
 0x1b5   : > { %v1825_v20 = vpop.f32.mrf.mxu0  ;;  %2016 = vmatmul.mubr.bf16.gmra.mxu0 %v7521_v10  ;;  %v2114_v22 = vpop.f32.mrf.mxu1  ;;  %2305 = vmatmul.mubr.bf16.gmra.mxu1 %v7524_v13 }
 0x1b6   : > { %2023 = vmatprep.mubr.bf16.mxu0 %v7529_v14  ;;  %2396 = vst [vmem:[#allocation5 + $0x98] sm:$0xff] %v2332_v19  ;;  %v2115_v23 = vadd.f32 %v2114_v22, %v1825_v20  ;;  %2312 = vmatprep.mubr.bf16.mxu1 %v7532_v17  ;;  %v672_v22 = vld [vmem:[#allocation5 + $0x1a8] sm:$0xff] }
 0x1b7   : > { %v1827_v24 = vpop.f32.mrf.mxu0  ;;  %v2116_v25 = vpop.f32.mrf.mxu1 }
 0x1b8   : > { %v2333_v26 = vadd.f32 %v2115_v23, %v663_v21 }
 0x1b9   : > { %v1828_v27 = vpop.f32.mrf.mxu0  ;;  %v2117_v30 = vpop.f32.mrf.mxu1 }
 0x1ba   : > { %2397 = vst [vmem:[#allocation5 + $0x120] sm:$0xff] %v2333_v26  ;;  %v2118_v32 = vadd.f32 %v2117_v30, %v1828_v27 }
 0x1bb   : > { %v1830_v33 = vpop.f32.mrf.mxu0  ;;  %v2119_v34 = vpop.f32.mrf.mxu1 }
 0x1bc   : > { %v2334_v35 = vadd.f32 %v2118_v32, %v664_v29  ;;  %v673_v29 = vld [vmem:[#allocation5 + $0x1b8] sm:$0xff] }
 0x1bd   : > { %v1833_v36 = vpop.f32.mrf.mxu0  ;;  %2024 = vmatmul.mubr.bf16.gmra.mxu0 %v7527_v28  ;;  %v2122_v38 = vpop.f32.mrf.mxu1  ;;  %2313 = vmatmul.mubr.bf16.gmra.mxu1 %v7530_v31 }
 0x1be   : > { %2398 = vst [vmem:[#allocation5 + $0x150] sm:$0xff] %v2334_v35  ;;  %v2123_v39 = vadd.f32 %v2122_v38, %v1833_v36  ;;  %v674_v36 = vld [vmem:[#allocation5 + $0x28] sm:$0xff] }
 0x1bf   : > { %v1835_v40 = vpop.f32.mrf.mxu0  ;;  %v2124_v41 = vpop.f32.mrf.mxu1 }
 0x1c0   : > { %v2335_v42 = vadd.f32 %v2123_v39, %v665_v37 }
 0x1c1   : > { %v1836_v43 = vpop.f32.mrf.mxu0  ;;  %v2125_v45 = vpop.f32.mrf.mxu1 }
 0x1c2   : > { %2399 = vst [vmem:[#allocation5 + $0x108] sm:$0xff] %v2335_v42  ;;  %v2126_v46 = vadd.f32 %v2125_v45, %v1836_v43  ;;  %v675_v43 = vld [vmem:[#allocation5 + $0x1e8] sm:$0xff] }
 0x1c3   : > { %v1838_v47 = vpop.f32.mrf.mxu0  ;;  %v2127_v48 = vpop.f32.mrf.mxu1 }
 0x1c4   : > { %v2336_v49 = vadd.f32 %v2126_v46, %v666_v44 }
 0x1c5   : > { %v1841_v50 = vpop.f32.mrf.mxu0  ;;  %v2130_v52 = vpop.f32.mrf.mxu1 }
 0x1c6   : > { %2400 = vst [vmem:[#allocation5 + $0x60] sm:$0xff] %v2336_v49  ;;  %v2131_v53 = vadd.f32 %v2130_v52, %v1841_v50  ;;  %v676_v50 = vld [vmem:[#allocation5 + $0xf8] sm:$0xff] }
 0x1c7   : > { %v1843_v54 = vpop.f32.mrf.mxu0  ;;  %v2132_v55 = vpop.f32.mrf.mxu1 }
 0x1c8   : > { %v2337_v56 = vadd.f32 %v2131_v53, %v667_v51 }
 0x1c9   : > { %v1844_v57 = vpop.f32.mrf.mxu0  ;;  %v2133_v59 = vpop.f32.mrf.mxu1 }
 0x1ca   : > { %2401 = vst [vmem:[#allocation5 + $0xe0] sm:$0xff] %v2337_v56  ;;  %v2134_v60 = vadd.f32 %v2133_v59, %v1844_v57  ;;  %v677_v57 = vld [vmem:[#allocation5 + $0x160] sm:$0xff] }
 0x1cb   : > { %v1846_v61 = vpop.f32.mrf.mxu0  ;;  %v2135_v62 = vpop.f32.mrf.mxu1 }
 0x1cc   : > { %v2338_v63 = vadd.f32 %v2134_v60, %v668_v58 }
 0x1cd   : > { %v1849_v0 = vpop.f32.mrf.mxu0  ;;  %v2138_v2 = vpop.f32.mrf.mxu1 }
 0x1ce   : > { %2402 = vst [vmem:[#allocation5 + $0x188] sm:$0xff] %v2338_v63  ;;  %v2139_v3 = vadd.f32 %v2138_v2, %v1849_v0  ;;  %v678_v0 = vld [vmem:[#allocation5 + $0x30] sm:$0xff] }
 0x1cf   : > { %v1851_v4 = vpop.f32.mrf.mxu0  ;;  %v2140_v5 = vpop.f32.mrf.mxu1 }
 0x1d0   : > { %v2339_v6 = vadd.f32 %v2139_v3, %v669_v1 }
 0x1d1   : > { %v1852_v7 = vpop.f32.mrf.mxu0  ;;  %v2141_v9 = vpop.f32.mrf.mxu1 }
 0x1d2   : > { %2403 = vst [vmem:[#allocation5 + $0x138] sm:$0xff] %v2339_v6  ;;  %v2142_v10 = vadd.f32 %v2141_v9, %v1852_v7  ;;  %v679_v7 = vld [vmem:[#allocation5 + $0x1e0] sm:$0xff] }
 0x1d3   : > { %v1854_v11 = vpop.f32.mrf.mxu0  ;;  %v2143_v12 = vpop.f32.mrf.mxu1 }
 0x1d4   : > { %v2340_v13 = vadd.f32 %v2142_v10, %v670_v8 }
 0x1d5   : > { %v1857_v14 = vpop.f32.mrf.mxu0  ;;  %v2146_v16 = vpop.f32.mrf.mxu1 }
 0x1d6   : > { %2404 = vst [vmem:[#allocation5 + $0x140] sm:$0xff] %v2340_v13  ;;  %v2147_v17 = vadd.f32 %v2146_v16, %v1857_v14  ;;  %v680_v14 = vld [vmem:[#allocation5] sm:$0xff] }
 0x1d7   : > { %v1859_v18 = vpop.f32.mrf.mxu0  ;;  %v2148_v19 = vpop.f32.mrf.mxu1 }
 0x1d8   : > { %v2341_v20 = vadd.f32 %v2147_v17, %v671_v15 }
 0x1d9   : > { %v1860_v21 = vpop.f32.mrf.mxu0  ;;  %v2149_v23 = vpop.f32.mrf.mxu1 }
 0x1da   : > { %2405 = vst [vmem:[#allocation5 + $0x80] sm:$0xff] %v2341_v20  ;;  %v2150_v24 = vadd.f32 %v2149_v23, %v1860_v21  ;;  %v681_v21 = vld [vmem:[#allocation5 + $0xf0] sm:$0xff] }
 0x1db   : > { %v1862_v25 = vpop.f32.mrf.mxu0  ;;  %v2151_v26 = vpop.f32.mrf.mxu1 }
 0x1dc   : > { %v2342_v27 = vadd.f32 %v2150_v24, %v672_v22 }
 0x1dd   : > { %v1865_v28 = vpop.f32.mrf.mxu0  ;;  %v2154_v30 = vpop.f32.mrf.mxu1 }
 0x1de   : > { %2406 = vst [vmem:[#allocation5 + $0x1a8] sm:$0xff] %v2342_v27  ;;  %v2155_v31 = vadd.f32 %v2154_v30, %v1865_v28  ;;  %v682_v28 = vld [vmem:[#allocation5 + $0x8] sm:$0xff] }
 0x1df   : > { %v1867_v32 = vpop.f32.mrf.mxu0  ;;  %v2156_v33 = vpop.f32.mrf.mxu1 }
 0x1e0   : > { %v2343_v34 = vadd.f32 %v2155_v31, %v673_v29 }
 0x1e1   : > { %v1868_v35 = vpop.f32.mrf.mxu0  ;;  %v2157_v37 = vpop.f32.mrf.mxu1 }
 0x1e2   : > { %2407 = vst [vmem:[#allocation5 + $0x1b8] sm:$0xff] %v2343_v34  ;;  %v2158_v38 = vadd.f32 %v2157_v37, %v1868_v35  ;;  %v683_v35 = vld [vmem:[#allocation5 + $0x148] sm:$0xff] }
 0x1e3   : > { %v1870_v39 = vpop.f32.mrf.mxu0  ;;  %v2159_v40 = vpop.f32.mrf.mxu1 }
 0x1e4   : > { %v2344_v41 = vadd.f32 %v2158_v38, %v674_v36 }
 0x1e5   : > { %v1873_v42 = vpop.f32.mrf.mxu0  ;;  %v2162_v44 = vpop.f32.mrf.mxu1 }
 0x1e6   : > { %2408 = vst [vmem:[#allocation5 + $0x28] sm:$0xff] %v2344_v41  ;;  %v2163_v45 = vadd.f32 %v2162_v44, %v1873_v42  ;;  %v684_v42 = vld [vmem:[#allocation5 + $0x1d0] sm:$0xff] }
 0x1e7   : > { %v1875_v46 = vpop.f32.mrf.mxu0  ;;  %v2164_v47 = vpop.f32.mrf.mxu1 }
 0x1e8   : > { %v2345_v48 = vadd.f32 %v2163_v45, %v675_v43 }
 0x1e9   : > { %v1876_v49 = vpop.f32.mrf.mxu0  ;;  %v2165_v51 = vpop.f32.mrf.mxu1 }
 0x1ea   : > { %2409 = vst [vmem:[#allocation5 + $0x1e8] sm:$0xff] %v2345_v48  ;;  %v2166_v52 = vadd.f32 %v2165_v51, %v1876_v49  ;;  %v685_v49 = vld [vmem:[#allocation5 + $0x100] sm:$0xff] }
 0x1eb   : > { %v1878_v53 = vpop.f32.mrf.mxu0  ;;  %v2167_v54 = vpop.f32.mrf.mxu1 }
 0x1ec   : > { %v2346_v55 = vadd.f32 %v2166_v52, %v676_v50 }
 0x1ed   : > { %v1881_v56 = vpop.f32.mrf.mxu0  ;;  %v2170_v58 = vpop.f32.mrf.mxu1 }
 0x1ee   : > { %2410 = vst [vmem:[#allocation5 + $0xf8] sm:$0xff] %v2346_v55  ;;  %v2171_v59 = vadd.f32 %v2170_v58, %v1881_v56  ;;  %v686_v56 = vld [vmem:[#allocation5 + $0xc8] sm:$0xff] }
 0x1ef   : > { %v1883_v60 = vpop.f32.mrf.mxu0  ;;  %v2172_v61 = vpop.f32.mrf.mxu1 }
 0x1f0   : > { %v2347_v62 = vadd.f32 %v2171_v59, %v677_v57 }
 0x1f1   : > { %v1884_v63 = vpop.f32.mrf.mxu0  ;;  %v2173_v1 = vpop.f32.mrf.mxu1 }
 0x1f2   : > { %2411 = vst [vmem:[#allocation5 + $0x160] sm:$0xff] %v2347_v62  ;;  %v2174_v2 = vadd.f32 %v2173_v1, %v1884_v63  ;;  %v687_v63 = vld [vmem:[#allocation5 + $0x40] sm:$0xff] }
 0x1f3   : > { %v1886_v3 = vpop.f32.mrf.mxu0  ;;  %v2175_v4 = vpop.f32.mrf.mxu1 }
 0x1f4   : > { %v2348_v5 = vadd.f32 %v2174_v2, %v678_v0 }
 0x1f5   : > { %v1889_v6 = vpop.f32.mrf.mxu0  ;;  %v2178_v8 = vpop.f32.mrf.mxu1 }
 0x1f6   : > { %2412 = vst [vmem:[#allocation5 + $0x30] sm:$0xff] %v2348_v5  ;;  %v2179_v9 = vadd.f32 %v2178_v8, %v1889_v6  ;;  %v688_v6 = vld [vmem:[#allocation5 + $0x1f8] sm:$0xff] }
 0x1f7   : > { %v1891_v10 = vpop.f32.mrf.mxu0  ;;  %v2180_v11 = vpop.f32.mrf.mxu1 }
 0x1f8   : > { %v2349_v12 = vadd.f32 %v2179_v9, %v679_v7 }
 0x1f9   : > { %v1892_v13 = vpop.f32.mrf.mxu0  ;;  %v2181_v15 = vpop.f32.mrf.mxu1 }
 0x1fa   : > { %2413 = vst [vmem:[#allocation5 + $0x1e0] sm:$0xff] %v2349_v12  ;;  %v2182_v16 = vadd.f32 %v2181_v15, %v1892_v13  ;;  %v689_v13 = vld [vmem:[#allocation5 + $0x20] sm:$0xff] }
 0x1fb   : > { %v1894_v17 = vpop.f32.mrf.mxu0  ;;  %v2183_v18 = vpop.f32.mrf.mxu1 }
 0x1fc   : > { %v2350_v19 = vadd.f32 %v2182_v16, %v680_v14 }
 0x1fd   : > { %v1897_v20 = vpop.f32.mrf.mxu0  ;;  %v2186_v22 = vpop.f32.mrf.mxu1 }
 0x1fe   : > { %2414 = vst [vmem:[#allocation5] sm:$0xff] %v2350_v19  ;;  %v2187_v23 = vadd.f32 %v2186_v22, %v1897_v20  ;;  %v690_v20 = vld [vmem:[#allocation5 + $0x128] sm:$0xff] }
 0x1ff   : > { %v1899_v24 = vpop.f32.mrf.mxu0  ;;  %v2188_v25 = vpop.f32.mrf.mxu1 }
 0x200   : > { %v2351_v26 = vadd.f32 %v2187_v23, %v681_v21 }
 0x201   : > { %v1900_v27 = vpop.f32.mrf.mxu0  ;;  %v2189_v29 = vpop.f32.mrf.mxu1 }
 0x202   : > { %2415 = vst [vmem:[#allocation5 + $0xf0] sm:$0xff] %v2351_v26  ;;  %v2190_v30 = vadd.f32 %v2189_v29, %v1900_v27  ;;  %v691_v27 = vld [vmem:[#allocation5 + $0x1a0] sm:$0xff] }
 0x203   : > { %v1902_v31 = vpop.f32.mrf.mxu0  ;;  %v2191_v32 = vpop.f32.mrf.mxu1 }
 0x204   : > { %v2352_v33 = vadd.f32 %v2190_v30, %v682_v28 }
 0x205   : > { %v1905_v34 = vpop.f32.mrf.mxu0  ;;  %v2194_v36 = vpop.f32.mrf.mxu1 }
 0x206   : > { %2416 = vst [vmem:[#allocation5 + $0x8] sm:$0xff] %v2352_v33  ;;  %v2195_v37 = vadd.f32 %v2194_v36, %v1905_v34  ;;  %v692_v34 = vld [vmem:[#allocation5 + $0x1f0] sm:$0xff] }
 0x207   : > { %v1907_v38 = vpop.f32.mrf.mxu0  ;;  %v2196_v39 = vpop.f32.mrf.mxu1 }
 0x208   : > { %v2353_v40 = vadd.f32 %v2195_v37, %v683_v35 }
 0x209   : > { %v1908_v41 = vpop.f32.mrf.mxu0  ;;  %v2197_v43 = vpop.f32.mrf.mxu1 }
 0x20a   : > { %2417 = vst [vmem:[#allocation5 + $0x148] sm:$0xff] %v2353_v40  ;;  %v2198_v44 = vadd.f32 %v2197_v43, %v1908_v41  ;;  %v693_v41 = vld [vmem:[#allocation5 + $0xe8] sm:$0xff] }
 0x20b   : > { %v1910_v45 = vpop.f32.mrf.mxu0  ;;  %v2199_v46 = vpop.f32.mrf.mxu1 }
 0x20c   : > { %v2354_v47 = vadd.f32 %v2198_v44, %v684_v42 }
 0x20d   : > { %v1913_v48 = vpop.f32.mrf.mxu0  ;;  %v2202_v50 = vpop.f32.mrf.mxu1 }
 0x20e   : > { %2418 = vst [vmem:[#allocation5 + $0x1d0] sm:$0xff] %v2354_v47  ;;  %v2203_v51 = vadd.f32 %v2202_v50, %v1913_v48  ;;  %v694_v48 = vld [vmem:[#allocation5 + $0x78] sm:$0xff] }
 0x20f   : > { %v1915_v52 = vpop.f32.mrf.mxu0  ;;  %v2204_v53 = vpop.f32.mrf.mxu1 }
 0x210   : > { %v2355_v54 = vadd.f32 %v2203_v51, %v685_v49 }
 0x211   : > { %v1916_v55 = vpop.f32.mrf.mxu0  ;;  %v2205_v57 = vpop.f32.mrf.mxu1 }
 0x212   : > { %2419 = vst [vmem:[#allocation5 + $0x100] sm:$0xff] %v2355_v54  ;;  %v2206_v58 = vadd.f32 %v2205_v57, %v1916_v55  ;;  %v695_v55 = vld [vmem:[#allocation5 + $0x70] sm:$0xff] }
 0x213   : > { %v1918_v59 = vpop.f32.mrf.mxu0  ;;  %v2207_v60 = vpop.f32.mrf.mxu1 }
 0x214   : > { %v2356_v61 = vadd.f32 %v2206_v58, %v686_v56 }
 0x215   : > { %v1921_v62 = vpop.f32.mrf.mxu0  ;;  %v2210_v0 = vpop.f32.mrf.mxu1 }
 0x216   : > { %2420 = vst [vmem:[#allocation5 + $0xc8] sm:$0xff] %v2356_v61  ;;  %v2211_v1 = vadd.f32 %v2210_v0, %v1921_v62  ;;  %v696_v62 = vld [vmem:[#allocation5 + $0x90] sm:$0xff] }
 0x217   : > { %v1923_v2 = vpop.f32.mrf.mxu0  ;;  %v2212_v3 = vpop.f32.mrf.mxu1 }
 0x218   : > { %v2357_v4 = vadd.f32 %v2211_v1, %v687_v63 }
 0x219   : > { %v1924_v5 = vpop.f32.mrf.mxu0  ;;  %v2213_v7 = vpop.f32.mrf.mxu1 }
 0x21a   : > { %2421 = vst [vmem:[#allocation5 + $0x40] sm:$0xff] %v2357_v4  ;;  %v2214_v8 = vadd.f32 %v2213_v7, %v1924_v5  ;;  %v697_v5 = vld [vmem:[#allocation5 + $0x1d8] sm:$0xff] }
 0x21b   : > { %v1926_v9 = vpop.f32.mrf.mxu0  ;;  %v2215_v10 = vpop.f32.mrf.mxu1 }
 0x21c   : > { %v2358_v11 = vadd.f32 %v2214_v8, %v688_v6 }
 0x21d   : > { %v1929_v12 = vpop.f32.mrf.mxu0  ;;  %v2218_v14 = vpop.f32.mrf.mxu1 }
 0x21e   : > { %2422 = vst [vmem:[#allocation5 + $0x1f8] sm:$0xff] %v2358_v11  ;;  %v2219_v15 = vadd.f32 %v2218_v14, %v1929_v12  ;;  %v698_v12 = vld [vmem:[#allocation5 + $0xd0] sm:$0xff] }
 0x21f   : > { %v1931_v16 = vpop.f32.mrf.mxu0  ;;  %v2220_v17 = vpop.f32.mrf.mxu1 }
 0x220   : > { %v2359_v18 = vadd.f32 %v2219_v15, %v689_v13 }
 0x221   : > { %v1932_v19 = vpop.f32.mrf.mxu0  ;;  %v2221_v21 = vpop.f32.mrf.mxu1 }
 0x222   : > { %2423 = vst [vmem:[#allocation5 + $0x20] sm:$0xff] %v2359_v18  ;;  %v2222_v22 = vadd.f32 %v2221_v21, %v1932_v19  ;;  %v699_v19 = vld [vmem:[#allocation5 + $0xb8] sm:$0xff] }
 0x223   : > { %v1934_v23 = vpop.f32.mrf.mxu0  ;;  %v2223_v24 = vpop.f32.mrf.mxu1 }
 0x224   : > { %v2360_v25 = vadd.f32 %v2222_v22, %v690_v20 }
 0x225   : > { %v1937_v26 = vpop.f32.mrf.mxu0  ;;  %v2226_v28 = vpop.f32.mrf.mxu1 }
 0x226   : > { %2424 = vst [vmem:[#allocation5 + $0x128] sm:$0xff] %v2360_v25  ;;  %v2227_v29 = vadd.f32 %v2226_v28, %v1937_v26  ;;  %v700_v26 = vld [vmem:[#allocation5 + $0x88] sm:$0xff] }
 0x227   : > { %v1939_v30 = vpop.f32.mrf.mxu0  ;;  %v2228_v31 = vpop.f32.mrf.mxu1 }
 0x228   : > { %v2361_v32 = vadd.f32 %v2227_v29, %v691_v27 }
 0x229   : > { %v1940_v33 = vpop.f32.mrf.mxu0  ;;  %v2229_v35 = vpop.f32.mrf.mxu1 }
 0x22a   : > { %2425 = vst [vmem:[#allocation5 + $0x1a0] sm:$0xff] %v2361_v32  ;;  %v2230_v36 = vadd.f32 %v2229_v35, %v1940_v33  ;;  %v701_v33 = vld [vmem:[#allocation5 + $0xa8] sm:$0xff] }
 0x22b   : > { %v1942_v37 = vpop.f32.mrf.mxu0  ;;  %v2231_v38 = vpop.f32.mrf.mxu1 }
 0x22c   : > { %v2362_v39 = vadd.f32 %v2230_v36, %v692_v34 }
 0x22d   : > { %v1945_v40 = vpop.f32.mrf.mxu0  ;;  %v2234_v42 = vpop.f32.mrf.mxu1 }
 0x22e   : > { %2426 = vst [vmem:[#allocation5 + $0x1f0] sm:$0xff] %v2362_v39  ;;  %v2235_v43 = vadd.f32 %v2234_v42, %v1945_v40  ;;  %v702_v40 = vld [vmem:[#allocation5 + $0x1c8] sm:$0xff] }
 0x22f   : > { %v1947_v44 = vpop.f32.mrf.mxu0  ;;  %v2236_v45 = vpop.f32.mrf.mxu1 }
 0x230   : > { %v2363_v46 = vadd.f32 %v2235_v43, %v693_v41 }
 0x231   : > { %v1948_v47 = vpop.f32.mrf.mxu0  ;;  %v2237_v49 = vpop.f32.mrf.mxu1 }
 0x232   : > { %2427 = vst [vmem:[#allocation5 + $0xe8] sm:$0xff] %v2363_v46  ;;  %v2238_v50 = vadd.f32 %v2237_v49, %v1948_v47  ;;  %v703_v47 = vld [vmem:[#allocation5 + $0x170] sm:$0xff] }
 0x233   : > { %v1950_v51 = vpop.f32.mrf.mxu0  ;;  %v2239_v52 = vpop.f32.mrf.mxu1 }
 0x234   : > { %v2364_v53 = vadd.f32 %v2238_v50, %v694_v48 }
 0x235   : > { %v1953_v54 = vpop.f32.mrf.mxu0  ;;  %v2242_v56 = vpop.f32.mrf.mxu1 }
 0x236   : > { %2428 = vst [vmem:[#allocation5 + $0x78] sm:$0xff] %v2364_v53  ;;  %v2243_v57 = vadd.f32 %v2242_v56, %v1953_v54  ;;  %v704_v54 = vld [vmem:[#allocation5 + $0x178] sm:$0xff] }
 0x237   : > { %v1955_v58 = vpop.f32.mrf.mxu0  ;;  %v2244_v59 = vpop.f32.mrf.mxu1 }
 0x238   : > { %v2365_v60 = vadd.f32 %v2243_v57, %v695_v55 }
 0x239   : > { %v1956_v61 = vpop.f32.mrf.mxu0  ;;  %v2245_v63 = vpop.f32.mrf.mxu1 }
 0x23a   : > { %2429 = vst [vmem:[#allocation5 + $0x70] sm:$0xff] %v2365_v60  ;;  %v2246_v0 = vadd.f32 %v2245_v63, %v1956_v61  ;;  %v705_v61 = vld [vmem:[#allocation5 + $0x68] sm:$0xff] }
 0x23b   : > { %v1958_v1 = vpop.f32.mrf.mxu0  ;;  %v2247_v2 = vpop.f32.mrf.mxu1 }
 0x23c   : > { %v2366_v3 = vadd.f32 %v2246_v0, %v696_v62 }
 0x23d   : > { %v1961_v4 = vpop.f32.mrf.mxu0  ;;  %v2250_v6 = vpop.f32.mrf.mxu1 }
 0x23e   : > { %2430 = vst [vmem:[#allocation5 + $0x90] sm:$0xff] %v2366_v3  ;;  %v2251_v7 = vadd.f32 %v2250_v6, %v1961_v4  ;;  %v706_v4 = vld [vmem:[#allocation5 + $0x190] sm:$0xff] }
 0x23f   : > { %v1963_v8 = vpop.f32.mrf.mxu0  ;;  %v2252_v9 = vpop.f32.mrf.mxu1 }
 0x240   : > { %v2367_v10 = vadd.f32 %v2251_v7, %v697_v5 }
 0x241   : > { %v1964_v11 = vpop.f32.mrf.mxu0  ;;  %v2253_v13 = vpop.f32.mrf.mxu1 }
 0x242   : > { %2431 = vst [vmem:[#allocation5 + $0x1d8] sm:$0xff] %v2367_v10  ;;  %v2254_v14 = vadd.f32 %v2253_v13, %v1964_v11  ;;  %v707_v11 = vld [vmem:[#allocation5 + $0x198] sm:$0xff] }
 0x243   : > { %v1966_v15 = vpop.f32.mrf.mxu0  ;;  %v2255_v16 = vpop.f32.mrf.mxu1 }
 0x244   : > { %v2368_v17 = vadd.f32 %v2254_v14, %v698_v12 }
 0x245   : > { %v1969_v18 = vpop.f32.mrf.mxu0  ;;  %v2258_v20 = vpop.f32.mrf.mxu1 }
 0x246   : > { %2432 = vst [vmem:[#allocation5 + $0xd0] sm:$0xff] %v2368_v17  ;;  %v2259_v21 = vadd.f32 %v2258_v20, %v1969_v18  ;;  %v708_v18 = vld [vmem:[#allocation5 + $0x38] sm:$0xff] }
 0x247   : > { %v1971_v22 = vpop.f32.mrf.mxu0  ;;  %v2260_v23 = vpop.f32.mrf.mxu1 }
 0x248   : > { %v2369_v24 = vadd.f32 %v2259_v21, %v699_v19 }
 0x249   : > { %v1972_v25 = vpop.f32.mrf.mxu0  ;;  %v2261_v27 = vpop.f32.mrf.mxu1 }
 0x24a   : > { %2433 = vst [vmem:[#allocation5 + $0xb8] sm:$0xff] %v2369_v24  ;;  %v2262_v28 = vadd.f32 %v2261_v27, %v1972_v25  ;;  %v709_v25 = vld [vmem:[#allocation5 + $0xc0] sm:$0xff] }
 0x24b   : > { %v1974_v29 = vpop.f32.mrf.mxu0  ;;  %v2263_v30 = vpop.f32.mrf.mxu1 }
 0x24c   : > { %v2370_v31 = vadd.f32 %v2262_v28, %v700_v26 }
 0x24d   : > { %v1977_v32 = vpop.f32.mrf.mxu0  ;;  %v2266_v34 = vpop.f32.mrf.mxu1 }
 0x24e   : > { %2434 = vst [vmem:[#allocation5 + $0x88] sm:$0xff] %v2370_v31  ;;  %v2267_v35 = vadd.f32 %v2266_v34, %v1977_v32  ;;  %v710_v32 = vld [vmem:[#allocation5 + $0x1c0] sm:$0xff] }
 0x24f   : > { %v1979_v36 = vpop.f32.mrf.mxu0  ;;  %v2268_v37 = vpop.f32.mrf.mxu1 }
 0x250   : > { %v2371_v38 = vadd.f32 %v2267_v35, %v701_v33 }
 0x251   : > { %v1980_v39 = vpop.f32.mrf.mxu0  ;;  %v2269_v41 = vpop.f32.mrf.mxu1 }
 0x252   : > { %2435 = vst [vmem:[#allocation5 + $0xa8] sm:$0xff] %v2371_v38  ;;  %v2270_v42 = vadd.f32 %v2269_v41, %v1980_v39  ;;  %v711_v39 = vld [vmem:[#allocation5 + $0x158] sm:$0xff] }
 0x253   : > { %v1982_v43 = vpop.f32.mrf.mxu0  ;;  %v2271_v44 = vpop.f32.mrf.mxu1 }
 0x254   : > { %v2372_v45 = vadd.f32 %v2270_v42, %v702_v40 }
 0x255   : > { %v1985_v46 = vpop.f32.mrf.mxu0  ;;  %v2274_v48 = vpop.f32.mrf.mxu1 }
 0x256   : > { %2436 = vst [vmem:[#allocation5 + $0x1c8] sm:$0xff] %v2372_v45  ;;  %v2275_v49 = vadd.f32 %v2274_v48, %v1985_v46  ;;  %v712_v46 = vld [vmem:[#allocation5 + $0x10] sm:$0xff] }
 0x257   : > { %v1987_v50 = vpop.f32.mrf.mxu0  ;;  %v2276_v51 = vpop.f32.mrf.mxu1 }
 0x258   : > { %v2373_v52 = vadd.f32 %v2275_v49, %v703_v47 }
 0x259   : > { %v1988_v53 = vpop.f32.mrf.mxu0  ;;  %v2277_v55 = vpop.f32.mrf.mxu1 }
 0x25a   : > { %2437 = vst [vmem:[#allocation5 + $0x170] sm:$0xff] %v2373_v52  ;;  %v2278_v56 = vadd.f32 %v2277_v55, %v1988_v53  ;;  %v713_v53 = vld [vmem:[#allocation5 + $0x58] sm:$0xff] }
 0x25b   : > { %v1990_v57 = vpop.f32.mrf.mxu0  ;;  %v2279_v58 = vpop.f32.mrf.mxu1 }
 0x25c   : > { %v2374_v59 = vadd.f32 %v2278_v56, %v704_v54 }
 0x25d   : > { %v1993_v60 = vpop.f32.mrf.mxu0  ;;  %v2282_v62 = vpop.f32.mrf.mxu1 }
 0x25e   : > { %2438 = vst [vmem:[#allocation5 + $0x178] sm:$0xff] %v2374_v59  ;;  %v2283_v63 = vadd.f32 %v2282_v62, %v1993_v60  ;;  %v714_v60 = vld [vmem:[#allocation5 + $0xa0] sm:$0xff] }
 0x25f   : > { %v1995_v0 = vpop.f32.mrf.mxu0  ;;  %v2284_v1 = vpop.f32.mrf.mxu1 }
 0x260   : > { %v2375_v2 = vadd.f32 %v2283_v63, %v705_v61 }
 0x261   : > { %v1996_v3 = vpop.f32.mrf.mxu0  ;;  %v2285_v5 = vpop.f32.mrf.mxu1 }
 0x262   : > { %2439 = vst [vmem:[#allocation5 + $0x68] sm:$0xff] %v2375_v2  ;;  %v2286_v6 = vadd.f32 %v2285_v5, %v1996_v3 }
 0x263   : > { %v1998_v7 = vpop.f32.mrf.mxu0  ;;  %v2287_v8 = vpop.f32.mrf.mxu1 }
 0x264   : > { %v2376_v9 = vadd.f32 %v2286_v6, %v706_v4 }
 0x265   : > { %v2001_v10 = vpop.f32.mrf.mxu0  ;;  %v2290_v12 = vpop.f32.mrf.mxu1 }
 0x266   : > { %2440 = vst [vmem:[#allocation5 + $0x190] sm:$0xff] %v2376_v9  ;;  %v2291_v13 = vadd.f32 %v2290_v12, %v2001_v10 }
 0x267   : > { %v2003_v14 = vpop.f32.mrf.mxu0  ;;  %v2292_v15 = vpop.f32.mrf.mxu1 }
 0x268   : > { %v2377_v16 = vadd.f32 %v2291_v13, %v707_v11 }
 0x269   : > { %v2004_v17 = vpop.f32.mrf.mxu0  ;;  %v2293_v19 = vpop.f32.mrf.mxu1 }
 0x26a   : > { %2441 = vst [vmem:[#allocation5 + $0x198] sm:$0xff] %v2377_v16  ;;  %v2294_v20 = vadd.f32 %v2293_v19, %v2004_v17 }
 0x26b   : > { %v2006_v21 = vpop.f32.mrf.mxu0  ;;  %v2295_v22 = vpop.f32.mrf.mxu1 }
 0x26c   : > { %v2378_v23 = vadd.f32 %v2294_v20, %v708_v18 }
 0x26d   : > { %v2009_v24 = vpop.f32.mrf.mxu0  ;;  %v2298_v26 = vpop.f32.mrf.mxu1 }
 0x26e   : > { %2442 = vst [vmem:[#allocation5 + $0x38] sm:$0xff] %v2378_v23  ;;  %v2299_v27 = vadd.f32 %v2298_v26, %v2009_v24 }
 0x26f   : > { %v2011_v28 = vpop.f32.mrf.mxu0  ;;  %v2300_v29 = vpop.f32.mrf.mxu1 }
 0x270   : > { %v2379_v30 = vadd.f32 %v2299_v27, %v709_v25 }
 0x271   : > { %v2012_v31 = vpop.f32.mrf.mxu0  ;;  %v2301_v33 = vpop.f32.mrf.mxu1 }
 0x272   : > { %2443 = vst [vmem:[#allocation5 + $0xc0] sm:$0xff] %v2379_v30  ;;  %v2302_v34 = vadd.f32 %v2301_v33, %v2012_v31 }
 0x273   : > { %v2014_v35 = vpop.f32.mrf.mxu0  ;;  %v2303_v36 = vpop.f32.mrf.mxu1 }
 0x274   : > { %v2380_v37 = vadd.f32 %v2302_v34, %v710_v32 }
 0x275   : > { %v2017_v38 = vpop.f32.mrf.mxu0  ;;  %v2306_v40 = vpop.f32.mrf.mxu1 }
 0x276   : > { %2444 = vst [vmem:[#allocation5 + $0x1c0] sm:$0xff] %v2380_v37  ;;  %v2307_v41 = vadd.f32 %v2306_v40, %v2017_v38 }
 0x277   : > { %v2019_v42 = vpop.f32.mrf.mxu0  ;;  %v2308_v43 = vpop.f32.mrf.mxu1 }
 0x278   : > { %v2381_v44 = vadd.f32 %v2307_v41, %v711_v39 }
 0x279   : > { %v2020_v45 = vpop.f32.mrf.mxu0  ;;  %v2309_v47 = vpop.f32.mrf.mxu1 }
 0x27a   : > { %2445 = vst [vmem:[#allocation5 + $0x158] sm:$0xff] %v2381_v44  ;;  %v2310_v48 = vadd.f32 %v2309_v47, %v2020_v45 }
 0x27b   : > { %v2022_v49 = vpop.f32.mrf.mxu0  ;;  %v2311_v50 = vpop.f32.mrf.mxu1 }
 0x27c   : > { %v2382_v51 = vadd.f32 %v2310_v48, %v712_v46 }
 0x27d   : > { %v2025_v52 = vpop.f32.mrf.mxu0  ;;  %v2314_v54 = vpop.f32.mrf.mxu1 }
 0x27e   : > { %2446 = vst [vmem:[#allocation5 + $0x10] sm:$0xff] %v2382_v51  ;;  %v2315_v55 = vadd.f32 %v2314_v54, %v2025_v52 }
 0x27f   : > { %v2027_v56 = vpop.f32.mrf.mxu0  ;;  %v2316_v57 = vpop.f32.mrf.mxu1 }
 0x280   : > { %v2383_v58 = vadd.f32 %v2315_v55, %v713_v53 }
 0x281   : > { %v2028_v59 = vpop.f32.mrf.mxu0  ;;  %v2317_v61 = vpop.f32.mrf.mxu1 }
 0x282   : > { %2447 = vst [vmem:[#allocation5 + $0x58] sm:$0xff] %v2383_v58  ;;  %v2318_v62 = vadd.f32 %v2317_v61, %v2028_v59 }
 0x283   : > { %v2030_v63 = vpop.f32.mrf.mxu0  ;;  %v2319_v0 = vpop.f32.mrf.mxu1 }
 0x284   : > { %v2384_v1 = vadd.f32 %v2318_v62, %v714_v60 }
 0x286   : > { %2448 = vst [vmem:[#allocation5 + $0xa0] sm:$0xff] %v2384_v1 }
 0x287 PF: > { %p6026_p3 = scmp.eq.s32.totalorder %s9389_s24, 0 }
 0x289   : > { %2452 = sbr.rel (%p6026_p3) target bundleno = 1169 (0x491), region = 56 }
 0x28e   : > { %v7533_v2 = vld [vmem:[#allocation2 + $0x38] sm:$0xff]   ;;  %v7928_v3 = vmov 0   ;;  %v7535_v5 = vld [vmem:[#allocation2 + $0x30] sm:$0xff]   ;;  %v7537_v7 = vld [vmem:[#allocation2 + $0x28] sm:$0xff]  }
 0x28f   : > { %3545 = vmatprep.subr.bf16.mxu0 %v7928_v3  ;;  %3834 = vmatprep.subr.bf16.mxu1 %v7928_v3  ;;  %v7534_v4 = vld [vmem:[#allocation2 + $0xb8] sm:$0xff]   ;;  %v7536_v6 = vld [vmem:[#allocation2 + $0xb0] sm:$0xff]   ;;  %v7538_v8 = vld [vmem:[#allocation2 + $0xa8] sm:$0xff]  }
 0x290   : > { %3546 = vmatpush1.bf16.msra.mxu0 %v7533_v2  ;;  %3835 = vmatpush1.bf16.msra.mxu1 %v7534_v4  ;;  %v7539_v9 = vld [vmem:[#allocation2 + $0x20] sm:$0xff]   ;;  %v7541_v11 = vld [vmem:[#allocation2 + $0x18] sm:$0xff]   ;;  %v7543_v13 = vld [vmem:[#allocation2 + $0x10] sm:$0xff]  }
 0x291   : > { %3547 = vmatprep.subr.bf16.mxu0 %v7928_v3  ;;  %3836 = vmatprep.subr.bf16.mxu1 %v7928_v3  ;;  %v7540_v10 = vld [vmem:[#allocation2 + $0xa0] sm:$0xff]   ;;  %v7542_v12 = vld [vmem:[#allocation2 + $0x98] sm:$0xff]   ;;  %v7544_v14 = vld [vmem:[#allocation2 + $0x90] sm:$0xff]  }
 0x292   : > { %v7545_v15 = vld [vmem:[#allocation2 + $0x8] sm:$0xff]   ;;  %v7547_v17 = vld [vmem:[#allocation2] sm:$0xff]   ;;  %v7549_v19 = vld [vmem:[#allocation2 + $0x78] sm:$0xff]  }
 0x293   : > { %v7546_v16 = vld [vmem:[#allocation2 + $0x88] sm:$0xff]   ;;  %v7548_v18 = vld [vmem:[#allocation2 + $0x80] sm:$0xff]   ;;  %v7550_v20 = vld [vmem:[#allocation2 + $0xf8] sm:$0xff]  }
 0x294   : > { %3548 = vmatpush1.bf16.msra.mxu0 %v7535_v5  ;;  %3837 = vmatpush1.bf16.msra.mxu1 %v7536_v6  ;;  %v7567_v21 = vld [vmem:[%s8035_s8 + $0x4] ss:$16 sps:$4 sm:$0xff]   ;;  %v7570_v23 = vld [vmem:[%s8035_s8 + $0xc] ss:$16 sps:$4 sm:$0xff]   ;;  %v7565_v37 = vld [vmem:[%s8035_s8] ss:$16 sps:$4 sm:$0xff]  }
 0x295   : > { %3549 = vmatprep.subr.bf16.mxu0 %v7928_v3  ;;  %3838 = vmatprep.subr.bf16.mxu1 %v7928_v3  ;;  %v7551_v22 = vld [vmem:[#allocation2 + $0x70] sm:$0xff]   ;;  %v7553_v25 = vld [vmem:[#allocation2 + $0x68] sm:$0xff]   ;;  %v7555_v27 = vld [vmem:[#allocation2 + $0x60] sm:$0xff]  }
 0x296   : > { %v7552_v24 = vld [vmem:[#allocation2 + $0xf0] sm:$0xff]   ;;  %3577 = vmatprep.mubr.bf16.mxu0 %v7567_v21  ;;  %3866 = vmatprep.mubr.bf16.mxu1 %v7570_v23  ;;  %v7554_v26 = vld [vmem:[#allocation2 + $0xe8] sm:$0xff]   ;;  %v7556_v28 = vld [vmem:[#allocation2 + $0xe0] sm:$0xff]  }
 0x297   : > { %v7557_v29 = vld [vmem:[#allocation2 + $0x58] sm:$0xff]   ;;  %v7559_v31 = vld [vmem:[#allocation2 + $0x50] sm:$0xff]   ;;  %v7561_v33 = vld [vmem:[#allocation2 + $0x48] sm:$0xff]  }
 0x298   : > { %3550 = vmatpush1.bf16.msra.mxu0 %v7537_v7  ;;  %3839 = vmatpush1.bf16.msra.mxu1 %v7538_v8  ;;  %v7558_v30 = vld [vmem:[#allocation2 + $0xd8] sm:$0xff]   ;;  %v7560_v32 = vld [vmem:[#allocation2 + $0xd0] sm:$0xff]   ;;  %v7562_v34 = vld [vmem:[#allocation2 + $0xc8] sm:$0xff]  }
 0x299   : > { %3551 = vmatprep.subr.bf16.mxu0 %v7928_v3  ;;  %3840 = vmatprep.subr.bf16.mxu1 %v7928_v3  ;;  %v7563_v35 = vld [vmem:[#allocation2 + $0x40] sm:$0xff]   ;;  %v7568_v38 = vld [vmem:[%s8035_s8 + $0x8] ss:$16 sps:$4 sm:$0xff]   ;;  %v7573_v40 = vld [vmem:[%s8035_s8 + $0x2c] ss:$16 sps:$4 sm:$0xff]  }
 0x29a   : > { %v7564_v36 = vld [vmem:[#allocation2 + $0xc0] sm:$0xff]   ;;  %v7576_v42 = vld [vmem:[%s8035_s8 + $0x28] ss:$16 sps:$4 sm:$0xff]   ;;  %v7579_v44 = vld [vmem:[%s8035_s8 + $0x4c] ss:$16 sps:$4 sm:$0xff]  }
 0x29b   : > { %v7571_v39 = vld [vmem:[%s8035_s8 + $0x24] ss:$16 sps:$4 sm:$0xff]   ;;  %v7575_v41 = vld [vmem:[%s8035_s8 + $0x20] ss:$16 sps:$4 sm:$0xff]   ;;  %v7582_v46 = vld [vmem:[%s8035_s8 + $0x48] ss:$16 sps:$4 sm:$0xff]  }
 0x29c   : > { %3552 = vmatpush1.bf16.msra.mxu0 %v7539_v9  ;;  %3841 = vmatpush1.bf16.msra.mxu1 %v7540_v10  ;;  %v7577_v43 = vld [vmem:[%s8035_s8 + $0x44] ss:$16 sps:$4 sm:$0xff]   ;;  %v7581_v45 = vld [vmem:[%s8035_s8 + $0x40] ss:$16 sps:$4 sm:$0xff]   ;;  %v7585_v48 = vld [vmem:[%s8035_s8 + $0x6c] ss:$16 sps:$4 sm:$0xff]  }
 0x29d   : > { %3553 = vmatprep.subr.bf16.mxu0 %v7928_v3  ;;  %3842 = vmatprep.subr.bf16.mxu1 %v7928_v3  ;;  %v7583_v47 = vld [vmem:[%s8035_s8 + $0x64] ss:$16 sps:$4 sm:$0xff]   ;;  %v7587_v49 = vld [vmem:[%s8035_s8 + $0x60] ss:$16 sps:$4 sm:$0xff]   ;;  %v7588_v50 = vld [vmem:[%s8035_s8 + $0x68] ss:$16 sps:$4 sm:$0xff]  }
 0x29e   : > { %v7589_v51 = vld [vmem:[%s8035_s8 + $0x84] ss:$16 sps:$4 sm:$0xff]   ;;  %v7591_v52 = vld [vmem:[%s8035_s8 + $0x8c] ss:$16 sps:$4 sm:$0xff]   ;;  %v7593_v53 = vld [vmem:[%s8035_s8 + $0x80] ss:$16 sps:$4 sm:$0xff]  }
 0x29f   : > { %v7594_v54 = vld [vmem:[%s8035_s8 + $0x88] ss:$16 sps:$4 sm:$0xff]   ;;  %v7595_v55 = vld [vmem:[%s8035_s8 + $0xa4] ss:$16 sps:$4 sm:$0xff]   ;;  %v7597_v56 = vld [vmem:[%s8035_s8 + $0xac] ss:$16 sps:$4 sm:$0xff]  }
 0x2a0   : > { %3554 = vmatpush1.bf16.msra.mxu0 %v7541_v11  ;;  %3843 = vmatpush1.bf16.msra.mxu1 %v7542_v12  ;;  %v7599_v57 = vld [vmem:[%s8035_s8 + $0xa0] ss:$16 sps:$4 sm:$0xff]   ;;  %v7600_v58 = vld [vmem:[%s8035_s8 + $0xa8] ss:$16 sps:$4 sm:$0xff]   ;;  %v7601_v59 = vld [vmem:[%s8035_s8 + $0xc4] ss:$16 sps:$4 sm:$0xff]  }
 0x2a1   : > { %3555 = vmatprep.subr.bf16.mxu0 %v7928_v3  ;;  %3844 = vmatprep.subr.bf16.mxu1 %v7928_v3  ;;  %v7603_v60 = vld [vmem:[%s8035_s8 + $0xcc] ss:$16 sps:$4 sm:$0xff]   ;;  %v7605_v61 = vld [vmem:[%s8035_s8 + $0xc0] ss:$16 sps:$4 sm:$0xff]   ;;  %v7606_v62 = vld [vmem:[%s8035_s8 + $0xc8] ss:$16 sps:$4 sm:$0xff]  }
 0x2a2   : > { %v7607_v63 = vld [vmem:[%s8035_s8 + $0xe4] ss:$16 sps:$4 sm:$0xff]   ;;  %v7609_v0 = vld [vmem:[%s8035_s8 + $0xec] ss:$16 sps:$4 sm:$0xff]   ;;  %v7611_v1 = vld [vmem:[%s8035_s8 + $0xe0] ss:$16 sps:$4 sm:$0xff]  }
 0x2a3   : > { %v7612_v2 = vld [vmem:[%s8035_s8 + $0xe8] ss:$16 sps:$4 sm:$0xff]   ;;  %v7615_v4 = vld [vmem:[%s8035_s8 + $0x10c] ss:$16 sps:$4 sm:$0xff]   ;;  %v7617_v5 = vld [vmem:[%s8035_s8 + $0x100] ss:$16 sps:$4 sm:$0xff]  }
 0x2a4   : > { %3556 = vmatpush1.bf16.msra.mxu0 %v7543_v13  ;;  %3845 = vmatpush1.bf16.msra.mxu1 %v7544_v14  ;;  %v7618_v6 = vld [vmem:[%s8035_s8 + $0x108] ss:$16 sps:$4 sm:$0xff]   ;;  %v7619_v7 = vld [vmem:[%s8035_s8 + $0x124] ss:$16 sps:$4 sm:$0xff]   ;;  %v7621_v8 = vld [vmem:[%s8035_s8 + $0x12c] ss:$16 sps:$4 sm:$0xff]  }
 0x2a5   : > { %3557 = vmatprep.subr.bf16.mxu0 %v7928_v3  ;;  %3846 = vmatprep.subr.bf16.mxu1 %v7928_v3  ;;  %v7623_v9 = vld [vmem:[%s8035_s8 + $0x120] ss:$16 sps:$4 sm:$0xff]   ;;  %v7624_v10 = vld [vmem:[%s8035_s8 + $0x128] ss:$16 sps:$4 sm:$0xff]   ;;  %v7625_v11 = vld [vmem:[%s8035_s8 + $0x144] ss:$16 sps:$4 sm:$0xff]  }
 0x2a6   : > { %v7627_v12 = vld [vmem:[%s8035_s8 + $0x14c] ss:$16 sps:$4 sm:$0xff]   ;;  %v7629_v13 = vld [vmem:[%s8035_s8 + $0x140] ss:$16 sps:$4 sm:$0xff]   ;;  %v7630_v14 = vld [vmem:[%s8035_s8 + $0x148] ss:$16 sps:$4 sm:$0xff]  }
 0x2a7   : > { %v7641_v21 = vld [vmem:[%s8035_s8 + $0x180] ss:$16 sps:$4 sm:$0xff]   ;;  %v7643_v23 = vld [vmem:[%s8035_s8 + $0x1a4] ss:$16 sps:$4 sm:$0xff]  }
 0x2a8   : > { %3558 = vmatpush1.bf16.msra.mxu0 %v7545_v15  ;;  %3847 = vmatpush1.bf16.msra.mxu1 %v7546_v16  ;;  %v7631_v15 = vld [vmem:[%s8035_s8 + $0x164] ss:$16 sps:$4 sm:$0xff]   ;;  %v7633_v16 = vld [vmem:[%s8035_s8 + $0x16c] ss:$16 sps:$4 sm:$0xff]  }
 0x2a9   : > { %3559 = vmatprep.subr.bf16.mxu0 %v7928_v3  ;;  %3848 = vmatprep.subr.bf16.mxu1 %v7928_v3 }
 0x2ac   : > { %3560 = vmatpush1.bf16.msra.mxu0 %v7547_v17  ;;  %3849 = vmatpush1.bf16.msra.mxu1 %v7548_v18  ;;  %v7635_v17 = vld [vmem:[%s8035_s8 + $0x160] ss:$16 sps:$4 sm:$0xff]   ;;  %v7636_v18 = vld [vmem:[%s8035_s8 + $0x168] ss:$16 sps:$4 sm:$0xff]  }
 0x2ad   : > { %3561 = vmatprep.subr.bf16.mxu0 %v7928_v3  ;;  %3850 = vmatprep.subr.bf16.mxu1 %v7928_v3 }
 0x2b0   : > { %3562 = vmatpush2.bf16.msra.mxu0 %v7549_v19  ;;  %3851 = vmatpush2.bf16.msra.mxu1 %v7550_v20  ;;  %v7637_v19 = vld [vmem:[%s8035_s8 + $0x184] ss:$16 sps:$4 sm:$0xff]   ;;  %v7639_v20 = vld [vmem:[%s8035_s8 + $0x18c] ss:$16 sps:$4 sm:$0xff]  }
 0x2b1   : > { %3563 = vmatprep.subr.bf16.mxu0 %v7928_v3  ;;  %3852 = vmatprep.subr.bf16.mxu1 %v7928_v3 }
 0x2b4   : > { %3564 = vmatpush2.bf16.msra.mxu0 %v7551_v22  ;;  %3853 = vmatpush2.bf16.msra.mxu1 %v7552_v24  ;;  %v7642_v22 = vld [vmem:[%s8035_s8 + $0x188] ss:$16 sps:$4 sm:$0xff]   ;;  %v7645_v24 = vld [vmem:[%s8035_s8 + $0x1ac] ss:$16 sps:$4 sm:$0xff]  }
 0x2b5   : > { %3565 = vmatprep.subr.bf16.mxu0 %v7928_v3  ;;  %3854 = vmatprep.subr.bf16.mxu1 %v7928_v3 }
 0x2b8   : > { %3566 = vmatpush2.bf16.msra.mxu0 %v7553_v25  ;;  %3855 = vmatpush2.bf16.msra.mxu1 %v7554_v26  ;;  %v7647_v25 = vld [vmem:[%s8035_s8 + $0x1a0] ss:$16 sps:$4 sm:$0xff]   ;;  %v7648_v26 = vld [vmem:[%s8035_s8 + $0x1a8] ss:$16 sps:$4 sm:$0xff]  }
 0x2b9   : > { %3567 = vmatprep.subr.bf16.mxu0 %v7928_v3  ;;  %3856 = vmatprep.subr.bf16.mxu1 %v7928_v3 }
 0x2bc   : > { %3568 = vmatpush2.bf16.msra.mxu0 %v7555_v27  ;;  %3857 = vmatpush2.bf16.msra.mxu1 %v7556_v28  ;;  %v7649_v27 = vld [vmem:[%s8035_s8 + $0x1c4] ss:$16 sps:$4 sm:$0xff]   ;;  %v7651_v28 = vld [vmem:[%s8035_s8 + $0x1cc] ss:$16 sps:$4 sm:$0xff]  }
 0x2bd   : > { %3569 = vmatprep.subr.bf16.mxu0 %v7928_v3  ;;  %3858 = vmatprep.subr.bf16.mxu1 %v7928_v3 }
 0x2c0   : > { %3570 = vmatpush2.bf16.msra.mxu0 %v7557_v29  ;;  %3859 = vmatpush2.bf16.msra.mxu1 %v7558_v30  ;;  %v7653_v29 = vld [vmem:[%s8035_s8 + $0x1c0] ss:$16 sps:$4 sm:$0xff]   ;;  %v7654_v30 = vld [vmem:[%s8035_s8 + $0x1c8] ss:$16 sps:$4 sm:$0xff]  }
 0x2c1   : > { %3571 = vmatprep.subr.bf16.mxu0 %v7928_v3  ;;  %3860 = vmatprep.subr.bf16.mxu1 %v7928_v3 }
 0x2c4   : > { %3572 = vmatpush2.bf16.msra.mxu0 %v7559_v31  ;;  %3861 = vmatpush2.bf16.msra.mxu1 %v7560_v32  ;;  %v7655_v31 = vld [vmem:[%s8035_s8 + $0x1e4] ss:$16 sps:$4 sm:$0xff]   ;;  %v7657_v32 = vld [vmem:[%s8035_s8 + $0x1ec] ss:$16 sps:$4 sm:$0xff]  }
 0x2c5   : > { %3573 = vmatprep.subr.bf16.mxu0 %v7928_v3  ;;  %3862 = vmatprep.subr.bf16.mxu1 %v7928_v3 }
 0x2c8   : > { %3574 = vmatpush2.bf16.msra.mxu0 %v7561_v33  ;;  %3863 = vmatpush2.bf16.msra.mxu1 %v7562_v34  ;;  %v7659_v33 = vld [vmem:[%s8035_s8 + $0x1e0] ss:$16 sps:$4 sm:$0xff]   ;;  %v7660_v34 = vld [vmem:[%s8035_s8 + $0x1e8] ss:$16 sps:$4 sm:$0xff]  }
 0x2c9   : > { %3575 = vmatprep.subr.bf16.mxu0 %v7928_v3  ;;  %3864 = vmatprep.subr.bf16.mxu1 %v7928_v3  ;;  %v7613_v3 = vld [vmem:[%s8035_s8 + $0x104] ss:$16 sps:$4 sm:$0xff]  }
 0x2cc   : > { %3576 = vmatpush2.bf16.msra.mxu0 %v7563_v35  ;;  %3865 = vmatpush2.bf16.msra.mxu1 %v7564_v36  ;;  %v7661_v35 = vld [vmem:[%s8035_s8 + $0x204] ss:$16 sps:$4 sm:$0xff]   ;;  %v7663_v36 = vld [vmem:[%s8035_s8 + $0x20c] ss:$16 sps:$4 sm:$0xff]  }
 0x2cf   : > { %3578 = vmatmul.mubr.bf16.vlgmr.msra.gmra.mxu0 %v7565_v37  ;;  %3867 = vmatmul.mubr.bf16.vlgmr.msra.gmra.mxu1 %v7568_v38  ;;  %v7665_v37 = vld [vmem:[%s8035_s8 + $0x200] ss:$16 sps:$4 sm:$0xff]   ;;  %v7666_v38 = vld [vmem:[%s8035_s8 + $0x208] ss:$16 sps:$4 sm:$0xff]  }
 0x2d0   : > { %3585 = vmatprep.mubr.bf16.mxu0 %v7571_v39  ;;  %3874 = vmatprep.mubr.bf16.mxu1 %v7573_v40  ;;  %v7667_v39 = vld [vmem:[%s8035_s8 + $0x224] ss:$16 sps:$4 sm:$0xff]   ;;  %v7669_v40 = vld [vmem:[%s8035_s8 + $0x22c] ss:$16 sps:$4 sm:$0xff]  }
 0x2d7   : > { %3586 = vmatmul.mubr.bf16.gmra.mxu0 %v7575_v41  ;;  %3875 = vmatmul.mubr.bf16.gmra.mxu1 %v7576_v42  ;;  %v7671_v41 = vld [vmem:[%s8035_s8 + $0x220] ss:$16 sps:$4 sm:$0xff]   ;;  %v7672_v42 = vld [vmem:[%s8035_s8 + $0x228] ss:$16 sps:$4 sm:$0xff]  }
 0x2d8   : > { %3593 = vmatprep.mubr.bf16.mxu0 %v7577_v43  ;;  %3882 = vmatprep.mubr.bf16.mxu1 %v7579_v44  ;;  %v7673_v43 = vld [vmem:[%s8035_s8 + $0x244] ss:$16 sps:$4 sm:$0xff]   ;;  %v7675_v44 = vld [vmem:[%s8035_s8 + $0x24c] ss:$16 sps:$4 sm:$0xff]  }
 0x2df   : > { %3594 = vmatmul.mubr.bf16.gmra.mxu0 %v7581_v45  ;;  %3883 = vmatmul.mubr.bf16.gmra.mxu1 %v7582_v46  ;;  %v7677_v45 = vld [vmem:[%s8035_s8 + $0x240] ss:$16 sps:$4 sm:$0xff]   ;;  %v7678_v46 = vld [vmem:[%s8035_s8 + $0x248] ss:$16 sps:$4 sm:$0xff]  }
 0x2e0   : > { %3601 = vmatprep.mubr.bf16.mxu0 %v7583_v47  ;;  %3890 = vmatprep.mubr.bf16.mxu1 %v7585_v48  ;;  %v7679_v47 = vld [vmem:[%s8035_s8 + $0x264] ss:$16 sps:$4 sm:$0xff]   ;;  %v7681_v48 = vld [vmem:[%s8035_s8 + $0x26c] ss:$16 sps:$4 sm:$0xff]  }
 0x2e7   : > { %3602 = vmatmul.mubr.bf16.gmra.mxu0 %v7587_v49  ;;  %3891 = vmatmul.mubr.bf16.gmra.mxu1 %v7588_v50  ;;  %v7683_v49 = vld [vmem:[%s8035_s8 + $0x260] ss:$16 sps:$4 sm:$0xff]   ;;  %v7684_v50 = vld [vmem:[%s8035_s8 + $0x268] ss:$16 sps:$4 sm:$0xff]  }
 0x2e8   : > { %3609 = vmatprep.mubr.bf16.mxu0 %v7589_v51  ;;  %3898 = vmatprep.mubr.bf16.mxu1 %v7591_v52  ;;  %v7685_v51 = vld [vmem:[%s8035_s8 + $0x284] ss:$16 sps:$4 sm:$0xff]   ;;  %v7687_v52 = vld [vmem:[%s8035_s8 + $0x28c] ss:$16 sps:$4 sm:$0xff]  }
 0x2ef   : > { %3610 = vmatmul.mubr.bf16.gmra.mxu0 %v7593_v53  ;;  %3899 = vmatmul.mubr.bf16.gmra.mxu1 %v7594_v54  ;;  %v7689_v53 = vld [vmem:[%s8035_s8 + $0x280] ss:$16 sps:$4 sm:$0xff]   ;;  %v7690_v54 = vld [vmem:[%s8035_s8 + $0x288] ss:$16 sps:$4 sm:$0xff]  }
 0x2f0   : > { %3617 = vmatprep.mubr.bf16.mxu0 %v7595_v55  ;;  %3906 = vmatprep.mubr.bf16.mxu1 %v7597_v56  ;;  %v7691_v55 = vld [vmem:[%s8035_s8 + $0x2a4] ss:$16 sps:$4 sm:$0xff]   ;;  %v7693_v56 = vld [vmem:[%s8035_s8 + $0x2ac] ss:$16 sps:$4 sm:$0xff]  }
 0x2f7   : > { %3618 = vmatmul.mubr.bf16.gmra.mxu0 %v7599_v57  ;;  %3907 = vmatmul.mubr.bf16.gmra.mxu1 %v7600_v58  ;;  %v7695_v57 = vld [vmem:[%s8035_s8 + $0x2a0] ss:$16 sps:$4 sm:$0xff]   ;;  %v7696_v58 = vld [vmem:[%s8035_s8 + $0x2a8] ss:$16 sps:$4 sm:$0xff]  }
 0x2f8   : > { %3625 = vmatprep.mubr.bf16.mxu0 %v7601_v59  ;;  %3914 = vmatprep.mubr.bf16.mxu1 %v7603_v60  ;;  %v7697_v59 = vld [vmem:[%s8035_s8 + $0x2c4] ss:$16 sps:$4 sm:$0xff]   ;;  %v7699_v60 = vld [vmem:[%s8035_s8 + $0x2cc] ss:$16 sps:$4 sm:$0xff]  }
 0x2ff   : > { %3626 = vmatmul.mubr.bf16.gmra.mxu0 %v7605_v61  ;;  %3915 = vmatmul.mubr.bf16.gmra.mxu1 %v7606_v62  ;;  %v7701_v61 = vld [vmem:[%s8035_s8 + $0x2c0] ss:$16 sps:$4 sm:$0xff]   ;;  %v7702_v62 = vld [vmem:[%s8035_s8 + $0x2c8] ss:$16 sps:$4 sm:$0xff]  }
 0x300   : > { %3633 = vmatprep.mubr.bf16.mxu0 %v7607_v63  ;;  %3922 = vmatprep.mubr.bf16.mxu1 %v7609_v0  ;;  %v7703_v63 = vld [vmem:[%s8035_s8 + $0x2e4] ss:$16 sps:$4 sm:$0xff]   ;;  %v7705_v0 = vld [vmem:[%s8035_s8 + $0x2ec] ss:$16 sps:$4 sm:$0xff]  }
 0x307   : > { %3634 = vmatmul.mubr.bf16.gmra.mxu0 %v7611_v1  ;;  %3923 = vmatmul.mubr.bf16.gmra.mxu1 %v7612_v2  ;;  %v7707_v1 = vld [vmem:[%s8035_s8 + $0x2e0] ss:$16 sps:$4 sm:$0xff]   ;;  %v7708_v2 = vld [vmem:[%s8035_s8 + $0x2e8] ss:$16 sps:$4 sm:$0xff]  }
 0x308   : > { %3641 = vmatprep.mubr.bf16.mxu0 %v7613_v3  ;;  %3930 = vmatprep.mubr.bf16.mxu1 %v7615_v4  ;;  %v7709_v3 = vld [vmem:[%s8035_s8 + $0x304] ss:$16 sps:$4 sm:$0xff]   ;;  %v7711_v4 = vld [vmem:[%s8035_s8 + $0x30c] ss:$16 sps:$4 sm:$0xff]  }
 0x30f   : > { %3642 = vmatmul.mubr.bf16.gmra.mxu0 %v7617_v5  ;;  %3931 = vmatmul.mubr.bf16.gmra.mxu1 %v7618_v6  ;;  %v7713_v5 = vld [vmem:[%s8035_s8 + $0x300] ss:$16 sps:$4 sm:$0xff]   ;;  %v7714_v6 = vld [vmem:[%s8035_s8 + $0x308] ss:$16 sps:$4 sm:$0xff]  }
 0x310   : > { %3649 = vmatprep.mubr.bf16.mxu0 %v7619_v7  ;;  %3938 = vmatprep.mubr.bf16.mxu1 %v7621_v8  ;;  %v7715_v7 = vld [vmem:[%s8035_s8 + $0x324] ss:$16 sps:$4 sm:$0xff]   ;;  %v7717_v8 = vld [vmem:[%s8035_s8 + $0x32c] ss:$16 sps:$4 sm:$0xff]  }
 0x317   : > { %3650 = vmatmul.mubr.bf16.gmra.mxu0 %v7623_v9  ;;  %3939 = vmatmul.mubr.bf16.gmra.mxu1 %v7624_v10  ;;  %v2453_v10 = vld [vmem:[#allocation5 + $0xb0] sm:$0xff] }
 0x318   : > { %3657 = vmatprep.mubr.bf16.mxu0 %v7625_v11  ;;  %3946 = vmatprep.mubr.bf16.mxu1 %v7627_v12 }
 0x31f   : > { %3658 = vmatmul.mubr.bf16.gmra.mxu0 %v7629_v13  ;;  %3947 = vmatmul.mubr.bf16.gmra.mxu1 %v7630_v14 }
 0x320   : > { %3665 = vmatprep.mubr.bf16.mxu0 %v7631_v15  ;;  %3954 = vmatprep.mubr.bf16.mxu1 %v7633_v16 }
 0x327   : > { %3666 = vmatmul.mubr.bf16.gmra.mxu0 %v7635_v17  ;;  %3955 = vmatmul.mubr.bf16.gmra.mxu1 %v7636_v18  ;;  %v7719_v17 = vld [vmem:[%s8035_s8 + $0x320] ss:$16 sps:$4 sm:$0xff]  }
 0x328   : > { %3673 = vmatprep.mubr.bf16.mxu0 %v7637_v19  ;;  %3962 = vmatprep.mubr.bf16.mxu1 %v7639_v20  ;;  %v2454_v18 = vld [vmem:[#allocation5 + $0x1b0] sm:$0xff]  ;;  %v7720_v20 = vld [vmem:[%s8035_s8 + $0x328] ss:$16 sps:$4 sm:$0xff]  }
 0x32f   : > { %3674 = vmatmul.mubr.bf16.gmra.mxu0 %v7641_v21  ;;  %3963 = vmatmul.mubr.bf16.gmra.mxu1 %v7642_v22  ;;  %v7721_v21 = vld [vmem:[%s8035_s8 + $0x344] ss:$16 sps:$4 sm:$0xff]  }
 0x330   : > { %3681 = vmatprep.mubr.bf16.mxu0 %v7643_v23  ;;  %3970 = vmatprep.mubr.bf16.mxu1 %v7645_v24  ;;  %v7723_v24 = vld [vmem:[%s8035_s8 + $0x34c] ss:$16 sps:$4 sm:$0xff]  }
 0x337   : > { %3682 = vmatmul.mubr.bf16.gmra.mxu0 %v7647_v25  ;;  %3971 = vmatmul.mubr.bf16.gmra.mxu1 %v7648_v26 }
 0x338   : > { %3689 = vmatprep.mubr.bf16.mxu0 %v7649_v27  ;;  %3978 = vmatprep.mubr.bf16.mxu1 %v7651_v28  ;;  %v2455_v28 = vld [vmem:[#allocation5 + $0xd8] sm:$0xff] }
 0x33f   : > { %3690 = vmatmul.mubr.bf16.gmra.mxu0 %v7653_v29  ;;  %3979 = vmatmul.mubr.bf16.gmra.mxu1 %v7654_v30 }
 0x340   : > { %3697 = vmatprep.mubr.bf16.mxu0 %v7655_v31  ;;  %3986 = vmatprep.mubr.bf16.mxu1 %v7657_v32 }
 0x347   : > { %3698 = vmatmul.mubr.bf16.gmra.mxu0 %v7659_v33  ;;  %3987 = vmatmul.mubr.bf16.gmra.mxu1 %v7660_v34 }
 0x348   : > { %3705 = vmatprep.mubr.bf16.mxu0 %v7661_v35  ;;  %3994 = vmatprep.mubr.bf16.mxu1 %v7663_v36  ;;  %v7725_v35 = vld [vmem:[%s8035_s8 + $0x340] ss:$16 sps:$4 sm:$0xff]   ;;  %v2456_v36 = vld [vmem:[#allocation5 + $0x18] sm:$0xff] }
 0x34f   : > { %3706 = vmatmul.mubr.bf16.gmra.mxu0 %v7665_v37  ;;  %3995 = vmatmul.mubr.bf16.gmra.mxu1 %v7666_v38  ;;  %v7726_v38 = vld [vmem:[%s8035_s8 + $0x348] ss:$16 sps:$4 sm:$0xff]  }
 0x350   : > { %3713 = vmatprep.mubr.bf16.mxu0 %v7667_v39  ;;  %4002 = vmatprep.mubr.bf16.mxu1 %v7669_v40  ;;  %v7727_v39 = vld [vmem:[%s8035_s8 + $0x364] ss:$16 sps:$4 sm:$0xff]  }
 0x357   : > { %3714 = vmatmul.mubr.bf16.gmra.mxu0 %v7671_v41  ;;  %4003 = vmatmul.mubr.bf16.gmra.mxu1 %v7672_v42  ;;  %v7729_v42 = vld [vmem:[%s8035_s8 + $0x36c] ss:$16 sps:$4 sm:$0xff]  }
 0x358   : > { %3721 = vmatprep.mubr.bf16.mxu0 %v7673_v43  ;;  %4010 = vmatprep.mubr.bf16.mxu1 %v7675_v44 }
 0x35f   : > { %3722 = vmatmul.mubr.bf16.gmra.mxu0 %v7677_v45  ;;  %4011 = vmatmul.mubr.bf16.gmra.mxu1 %v7678_v46  ;;  %v2457_v46 = vld [vmem:[#allocation5 + $0x50] sm:$0xff] }
 0x360   : > { %3729 = vmatprep.mubr.bf16.mxu0 %v7679_v47  ;;  %4018 = vmatprep.mubr.bf16.mxu1 %v7681_v48 }
 0x367   : > { %3730 = vmatmul.mubr.bf16.gmra.mxu0 %v7683_v49  ;;  %4019 = vmatmul.mubr.bf16.gmra.mxu1 %v7684_v50 }
 0x368   : > { %3737 = vmatprep.mubr.bf16.mxu0 %v7685_v51  ;;  %4026 = vmatprep.mubr.bf16.mxu1 %v7687_v52 }
 0x36f   : > { %3738 = vmatmul.mubr.bf16.gmra.mxu0 %v7689_v53  ;;  %4027 = vmatmul.mubr.bf16.gmra.mxu1 %v7690_v54  ;;  %v7731_v53 = vld [vmem:[%s8035_s8 + $0x360] ss:$16 sps:$4 sm:$0xff]   ;;  %v2458_v54 = vld [vmem:[#allocation5 + $0x168] sm:$0xff] }
 0x370   : > { %3745 = vmatprep.mubr.bf16.mxu0 %v7691_v55  ;;  %4034 = vmatprep.mubr.bf16.mxu1 %v7693_v56  ;;  %v7732_v56 = vld [vmem:[%s8035_s8 + $0x368] ss:$16 sps:$4 sm:$0xff]  }
 0x377   : > { %3746 = vmatmul.mubr.bf16.gmra.mxu0 %v7695_v57  ;;  %4035 = vmatmul.mubr.bf16.gmra.mxu1 %v7696_v58  ;;  %v7735_v57 = vld [vmem:[%s8035_s8 + $0x384] ss:$16 sps:$4 sm:$0xff]  }
 0x378   : > { %3753 = vmatprep.mubr.bf16.mxu0 %v7697_v59  ;;  %4042 = vmatprep.mubr.bf16.mxu1 %v7699_v60  ;;  %v7738_v60 = vld [vmem:[%s8035_s8 + $0x38c] ss:$16 sps:$4 sm:$0xff]  }
 0x37f   : > { %3754 = vmatmul.mubr.bf16.gmra.mxu0 %v7701_v61  ;;  %4043 = vmatmul.mubr.bf16.gmra.mxu1 %v7702_v62 }
 0x380   : > { %3761 = vmatprep.mubr.bf16.mxu0 %v7703_v63  ;;  %4050 = vmatprep.mubr.bf16.mxu1 %v7705_v0  ;;  %v2459_v0 = vld [vmem:[#allocation5 + $0x130] sm:$0xff] }
 0x387   : > { %3762 = vmatmul.mubr.bf16.gmra.mxu0 %v7707_v1  ;;  %4051 = vmatmul.mubr.bf16.gmra.mxu1 %v7708_v2 }
 0x388   : > { %3769 = vmatprep.mubr.bf16.mxu0 %v7709_v3  ;;  %4058 = vmatprep.mubr.bf16.mxu1 %v7711_v4 }
 0x38f   : > { %v3579_v9 = vpop.f32.mrf.mxu0  ;;  %3770 = vmatmul.mubr.bf16.gmra.mxu0 %v7713_v5  ;;  %v3868_v11 = vpop.f32.mrf.mxu1  ;;  %4059 = vmatmul.mubr.bf16.gmra.mxu1 %v7714_v6 }
 0x390   : > { %3777 = vmatprep.mubr.bf16.mxu0 %v7715_v7  ;;  %v3869_v12 = vadd.f32 %v3868_v11, %v3579_v9  ;;  %4066 = vmatprep.mubr.bf16.mxu1 %v7717_v8  ;;  %v7733_v7 = vld [vmem:[%s8035_s8 + $0x380] ss:$16 sps:$4 sm:$0xff]   ;;  %v2460_v8 = vld [vmem:[#allocation5 + $0x48] sm:$0xff]  ;;  %v7741_v11 = vld [vmem:[%s8035_s8 + $0x3a4] ss:$16 sps:$4 sm:$0xff]  }
 0x391   : > { %v3581_v13 = vpop.f32.mrf.mxu0  ;;  %v3870_v14 = vpop.f32.mrf.mxu1 }
 0x392   : > { %v4123_v15 = vadd.f32 %v3869_v12, %v2453_v10  ;;  %v7736_v10 = vld [vmem:[%s8035_s8 + $0x388] ss:$16 sps:$4 sm:$0xff]   ;;  %v7744_v14 = vld [vmem:[%s8035_s8 + $0x3ac] ss:$16 sps:$4 sm:$0xff]  }
 0x393   : > { %v3582_v16 = vpop.f32.mrf.mxu0  ;;  %v3871_v19 = vpop.f32.mrf.mxu1 }
 0x394   : > { %4187 = vst [vmem:[#allocation5 + $0xb0] sm:$0xff] %v4123_v15  ;;  %v3872_v22 = vadd.f32 %v3871_v19, %v3582_v16 }
 0x395   : > { %v3584_v23 = vpop.f32.mrf.mxu0  ;;  %v3873_v25 = vpop.f32.mrf.mxu1 }
 0x396   : > { %v4124_v26 = vadd.f32 %v3872_v22, %v2454_v18  ;;  %v2461_v18 = vld [vmem:[#allocation5 + $0x180] sm:$0xff] }
 0x397   : > { %v3587_v27 = vpop.f32.mrf.mxu0  ;;  %3778 = vmatmul.mubr.bf16.gmra.mxu0 %v7719_v17  ;;  %v3876_v29 = vpop.f32.mrf.mxu1  ;;  %4067 = vmatmul.mubr.bf16.gmra.mxu1 %v7720_v20  ;;  %v7739_v25 = vld [vmem:[%s8035_s8 + $0x3a0] ss:$16 sps:$4 sm:$0xff]  }
 0x398   : > { %3785 = vmatprep.mubr.bf16.mxu0 %v7721_v21  ;;  %4188 = vst [vmem:[#allocation5 + $0x1b0] sm:$0xff] %v4124_v26  ;;  %v3877_v30 = vadd.f32 %v3876_v29, %v3587_v27  ;;  %4074 = vmatprep.mubr.bf16.mxu1 %v7723_v24  ;;  %v2462_v26 = vld [vmem:[#allocation5 + $0x110] sm:$0xff] }
 0x399   : > { %v3589_v31 = vpop.f32.mrf.mxu0  ;;  %v3878_v32 = vpop.f32.mrf.mxu1  ;;  %v7747_v29 = vld [vmem:[%s8035_s8 + $0x3c4] ss:$16 sps:$4 sm:$0xff]  }
 0x39a   : > { %v4125_v33 = vadd.f32 %v3877_v30, %v2455_v28  ;;  %v7742_v28 = vld [vmem:[%s8035_s8 + $0x3a8] ss:$16 sps:$4 sm:$0xff]   ;;  %v7750_v32 = vld [vmem:[%s8035_s8 + $0x3cc] ss:$16 sps:$4 sm:$0xff]  }
 0x39b   : > { %v3590_v34 = vpop.f32.mrf.mxu0  ;;  %v3879_v37 = vpop.f32.mrf.mxu1 }
 0x39c   : > { %4189 = vst [vmem:[#allocation5 + $0xd8] sm:$0xff] %v4125_v33  ;;  %v3880_v40 = vadd.f32 %v3879_v37, %v3590_v34 }
 0x39d   : > { %v3592_v41 = vpop.f32.mrf.mxu0  ;;  %v3881_v43 = vpop.f32.mrf.mxu1 }
 0x39e   : > { %v4126_v44 = vadd.f32 %v3880_v40, %v2456_v36  ;;  %v2463_v36 = vld [vmem:[#allocation5 + $0x118] sm:$0xff]  ;;  %v7745_v43 = vld [vmem:[%s8035_s8 + $0x3c0] ss:$16 sps:$4 sm:$0xff]  }
 0x39f   : > { %v3595_v45 = vpop.f32.mrf.mxu0  ;;  %3786 = vmatmul.mubr.bf16.gmra.mxu0 %v7725_v35  ;;  %v3884_v47 = vpop.f32.mrf.mxu1  ;;  %4075 = vmatmul.mubr.bf16.gmra.mxu1 %v7726_v38 }
 0x3a0   : > { %3793 = vmatprep.mubr.bf16.mxu0 %v7727_v39  ;;  %4190 = vst [vmem:[#allocation5 + $0x18] sm:$0xff] %v4126_v44  ;;  %v3885_v48 = vadd.f32 %v3884_v47, %v3595_v45  ;;  %4082 = vmatprep.mubr.bf16.mxu1 %v7729_v42  ;;  %v2464_v44 = vld [vmem:[#allocation5 + $0x98] sm:$0xff]  ;;  %v7753_v47 = vld [vmem:[%s8035_s8 + $0x3e4] ss:$16 sps:$4 sm:$0xff]  }
 0x3a1   : > { %v3597_v49 = vpop.f32.mrf.mxu0  ;;  %v3886_v50 = vpop.f32.mrf.mxu1 }
 0x3a2   : > { %v4127_v51 = vadd.f32 %v3885_v48, %v2457_v46  ;;  %v7748_v46 = vld [vmem:[%s8035_s8 + $0x3c8] ss:$16 sps:$4 sm:$0xff]   ;;  %v7756_v50 = vld [vmem:[%s8035_s8 + $0x3ec] ss:$16 sps:$4 sm:$0xff]  }
 0x3a3   : > { %v3598_v52 = vpop.f32.mrf.mxu0  ;;  %v3887_v55 = vpop.f32.mrf.mxu1 }
 0x3a4   : > { %4191 = vst [vmem:[#allocation5 + $0x50] sm:$0xff] %v4127_v51  ;;  %v3888_v58 = vadd.f32 %v3887_v55, %v3598_v52 }
 0x3a5   : > { %v3600_v59 = vpop.f32.mrf.mxu0  ;;  %v3889_v61 = vpop.f32.mrf.mxu1 }
 0x3a6   : > { %v4128_v62 = vadd.f32 %v3888_v58, %v2458_v54  ;;  %v2465_v54 = vld [vmem:[#allocation5 + $0x120] sm:$0xff] }
 0x3a7   : > { %v3603_v63 = vpop.f32.mrf.mxu0  ;;  %3794 = vmatmul.mubr.bf16.gmra.mxu0 %v7731_v53  ;;  %v3892_v1 = vpop.f32.mrf.mxu1  ;;  %4083 = vmatmul.mubr.bf16.gmra.mxu1 %v7732_v56  ;;  %v7751_v61 = vld [vmem:[%s8035_s8 + $0x3e0] ss:$16 sps:$4 sm:$0xff]  }
 0x3a8   : > { %3801 = vmatprep.mubr.bf16.mxu0 %v7735_v57  ;;  %4192 = vst [vmem:[#allocation5 + $0x168] sm:$0xff] %v4128_v62  ;;  %v3893_v2 = vadd.f32 %v3892_v1, %v3603_v63  ;;  %4090 = vmatprep.mubr.bf16.mxu1 %v7738_v60  ;;  %v2466_v62 = vld [vmem:[#allocation5 + $0x150] sm:$0xff] }
 0x3a9   : > { %v3605_v3 = vpop.f32.mrf.mxu0  ;;  %v3894_v4 = vpop.f32.mrf.mxu1 }
 0x3aa   : > { %v4129_v5 = vadd.f32 %v3893_v2, %v2459_v0  ;;  %v7754_v0 = vld [vmem:[%s8035_s8 + $0x3e8] ss:$16 sps:$4 sm:$0xff]  }
 0x3ab   : > { %v3606_v6 = vpop.f32.mrf.mxu0  ;;  %v3895_v9 = vpop.f32.mrf.mxu1 }
 0x3ac   : > { %4193 = vst [vmem:[#allocation5 + $0x130] sm:$0xff] %v4129_v5  ;;  %v3896_v12 = vadd.f32 %v3895_v9, %v3606_v6  ;;  %v2467_v6 = vld [vmem:[#allocation5 + $0x108] sm:$0xff] }
 0x3ad   : > { %v3608_v13 = vpop.f32.mrf.mxu0  ;;  %v3897_v15 = vpop.f32.mrf.mxu1 }
 0x3ae   : > { %v4130_v16 = vadd.f32 %v3896_v12, %v2460_v8  ;;  %v2468_v13 = vld [vmem:[#allocation5 + $0x60] sm:$0xff] }
 0x3af   : > { %v3611_v17 = vpop.f32.mrf.mxu0  ;;  %3802 = vmatmul.mubr.bf16.gmra.mxu0 %v7733_v7  ;;  %v3900_v19 = vpop.f32.mrf.mxu1  ;;  %4091 = vmatmul.mubr.bf16.gmra.mxu1 %v7736_v10 }
 0x3b0   : > { %3809 = vmatprep.mubr.bf16.mxu0 %v7741_v11  ;;  %4194 = vst [vmem:[#allocation5 + $0x48] sm:$0xff] %v4130_v16  ;;  %v3901_v20 = vadd.f32 %v3900_v19, %v3611_v17  ;;  %4098 = vmatprep.mubr.bf16.mxu1 %v7744_v14 }
 0x3b1   : > { %v3613_v21 = vpop.f32.mrf.mxu0  ;;  %v3902_v22 = vpop.f32.mrf.mxu1 }
 0x3b2   : > { %v4131_v23 = vadd.f32 %v3901_v20, %v2461_v18  ;;  %v2469_v20 = vld [vmem:[#allocation5 + $0xe0] sm:$0xff] }
 0x3b3   : > { %v3614_v24 = vpop.f32.mrf.mxu0  ;;  %v3903_v27 = vpop.f32.mrf.mxu1 }
 0x3b4   : > { %4195 = vst [vmem:[#allocation5 + $0x180] sm:$0xff] %v4131_v23  ;;  %v3904_v30 = vadd.f32 %v3903_v27, %v3614_v24  ;;  %v2470_v27 = vld [vmem:[#allocation5 + $0x188] sm:$0xff] }
 0x3b5   : > { %v3616_v31 = vpop.f32.mrf.mxu0  ;;  %v3905_v33 = vpop.f32.mrf.mxu1 }
 0x3b6   : > { %v4132_v34 = vadd.f32 %v3904_v30, %v2462_v26 }
 0x3b7   : > { %v3619_v35 = vpop.f32.mrf.mxu0  ;;  %3810 = vmatmul.mubr.bf16.gmra.mxu0 %v7739_v25  ;;  %v3908_v37 = vpop.f32.mrf.mxu1  ;;  %4099 = vmatmul.mubr.bf16.gmra.mxu1 %v7742_v28 }
 0x3b8   : > { %3817 = vmatprep.mubr.bf16.mxu0 %v7747_v29  ;;  %4196 = vst [vmem:[#allocation5 + $0x110] sm:$0xff] %v4132_v34  ;;  %v3909_v38 = vadd.f32 %v3908_v37, %v3619_v35  ;;  %4106 = vmatprep.mubr.bf16.mxu1 %v7750_v32  ;;  %v2471_v34 = vld [vmem:[#allocation5 + $0x138] sm:$0xff] }
 0x3b9   : > { %v3621_v39 = vpop.f32.mrf.mxu0  ;;  %v3910_v40 = vpop.f32.mrf.mxu1 }
 0x3ba   : > { %v4133_v41 = vadd.f32 %v3909_v38, %v2463_v36 }
 0x3bb   : > { %v3622_v42 = vpop.f32.mrf.mxu0  ;;  %v3911_v45 = vpop.f32.mrf.mxu1 }
 0x3bc   : > { %4197 = vst [vmem:[#allocation5 + $0x118] sm:$0xff] %v4133_v41  ;;  %v3912_v48 = vadd.f32 %v3911_v45, %v3622_v42  ;;  %v2472_v41 = vld [vmem:[#allocation5 + $0x140] sm:$0xff] }
 0x3bd   : > { %v3624_v49 = vpop.f32.mrf.mxu0  ;;  %v3913_v51 = vpop.f32.mrf.mxu1 }
 0x3be   : > { %v4134_v52 = vadd.f32 %v3912_v48, %v2464_v44  ;;  %v2473_v48 = vld [vmem:[#allocation5 + $0x80] sm:$0xff] }
 0x3bf   : > { %v3627_v53 = vpop.f32.mrf.mxu0  ;;  %3818 = vmatmul.mubr.bf16.gmra.mxu0 %v7745_v43  ;;  %v3916_v55 = vpop.f32.mrf.mxu1  ;;  %4107 = vmatmul.mubr.bf16.gmra.mxu1 %v7748_v46 }
 0x3c0   : > { %3825 = vmatprep.mubr.bf16.mxu0 %v7753_v47  ;;  %4198 = vst [vmem:[#allocation5 + $0x98] sm:$0xff] %v4134_v52  ;;  %v3917_v56 = vadd.f32 %v3916_v55, %v3627_v53  ;;  %4114 = vmatprep.mubr.bf16.mxu1 %v7756_v50  ;;  %v2474_v55 = vld [vmem:[#allocation5 + $0x1a8] sm:$0xff] }
 0x3c1   : > { %v3629_v57 = vpop.f32.mrf.mxu0  ;;  %v3918_v58 = vpop.f32.mrf.mxu1 }
 0x3c2   : > { %v4135_v59 = vadd.f32 %v3917_v56, %v2465_v54 }
 0x3c3   : > { %v3630_v60 = vpop.f32.mrf.mxu0  ;;  %v3919_v63 = vpop.f32.mrf.mxu1 }
 0x3c4   : > { %4199 = vst [vmem:[#allocation5 + $0x120] sm:$0xff] %v4135_v59  ;;  %v3920_v1 = vadd.f32 %v3919_v63, %v3630_v60 }
 0x3c5   : > { %v3632_v2 = vpop.f32.mrf.mxu0  ;;  %v3921_v3 = vpop.f32.mrf.mxu1 }
 0x3c6   : > { %v4136_v4 = vadd.f32 %v3920_v1, %v2466_v62  ;;  %v2475_v62 = vld [vmem:[#allocation5 + $0x1b8] sm:$0xff] }
 0x3c7   : > { %v3635_v5 = vpop.f32.mrf.mxu0  ;;  %3826 = vmatmul.mubr.bf16.gmra.mxu0 %v7751_v61  ;;  %v3924_v7 = vpop.f32.mrf.mxu1  ;;  %4115 = vmatmul.mubr.bf16.gmra.mxu1 %v7754_v0 }
 0x3c8   : > { %4200 = vst [vmem:[#allocation5 + $0x150] sm:$0xff] %v4136_v4  ;;  %v3925_v8 = vadd.f32 %v3924_v7, %v3635_v5  ;;  %v2476_v5 = vld [vmem:[#allocation5 + $0x28] sm:$0xff] }
 0x3c9   : > { %v3637_v9 = vpop.f32.mrf.mxu0  ;;  %v3926_v10 = vpop.f32.mrf.mxu1 }
 0x3ca   : > { %v4137_v11 = vadd.f32 %v3925_v8, %v2467_v6 }
 0x3cb   : > { %v3638_v12 = vpop.f32.mrf.mxu0  ;;  %v3927_v14 = vpop.f32.mrf.mxu1 }
 0x3cc   : > { %4201 = vst [vmem:[#allocation5 + $0x108] sm:$0xff] %v4137_v11  ;;  %v3928_v15 = vadd.f32 %v3927_v14, %v3638_v12  ;;  %v2477_v12 = vld [vmem:[#allocation5 + $0x1e8] sm:$0xff] }
 0x3cd   : > { %v3640_v16 = vpop.f32.mrf.mxu0  ;;  %v3929_v17 = vpop.f32.mrf.mxu1 }
 0x3ce   : > { %v4138_v18 = vadd.f32 %v3928_v15, %v2468_v13 }
 0x3cf   : > { %v3643_v19 = vpop.f32.mrf.mxu0  ;;  %v3932_v21 = vpop.f32.mrf.mxu1 }
 0x3d0   : > { %4202 = vst [vmem:[#allocation5 + $0x60] sm:$0xff] %v4138_v18  ;;  %v3933_v22 = vadd.f32 %v3932_v21, %v3643_v19  ;;  %v2478_v19 = vld [vmem:[#allocation5 + $0xf8] sm:$0xff] }
 0x3d1   : > { %v3645_v23 = vpop.f32.mrf.mxu0  ;;  %v3934_v24 = vpop.f32.mrf.mxu1 }
 0x3d2   : > { %v4139_v25 = vadd.f32 %v3933_v22, %v2469_v20 }
 0x3d3   : > { %v3646_v26 = vpop.f32.mrf.mxu0  ;;  %v3935_v28 = vpop.f32.mrf.mxu1 }
 0x3d4   : > { %4203 = vst [vmem:[#allocation5 + $0xe0] sm:$0xff] %v4139_v25  ;;  %v3936_v29 = vadd.f32 %v3935_v28, %v3646_v26  ;;  %v2479_v26 = vld [vmem:[#allocation5 + $0x160] sm:$0xff] }
 0x3d5   : > { %v3648_v30 = vpop.f32.mrf.mxu0  ;;  %v3937_v31 = vpop.f32.mrf.mxu1 }
 0x3d6   : > { %v4140_v32 = vadd.f32 %v3936_v29, %v2470_v27 }
 0x3d7   : > { %v3651_v33 = vpop.f32.mrf.mxu0  ;;  %v3940_v35 = vpop.f32.mrf.mxu1 }
 0x3d8   : > { %4204 = vst [vmem:[#allocation5 + $0x188] sm:$0xff] %v4140_v32  ;;  %v3941_v36 = vadd.f32 %v3940_v35, %v3651_v33  ;;  %v2480_v33 = vld [vmem:[#allocation5 + $0x30] sm:$0xff] }
 0x3d9   : > { %v3653_v37 = vpop.f32.mrf.mxu0  ;;  %v3942_v38 = vpop.f32.mrf.mxu1 }
 0x3da   : > { %v4141_v39 = vadd.f32 %v3941_v36, %v2471_v34 }
 0x3db   : > { %v3654_v40 = vpop.f32.mrf.mxu0  ;;  %v3943_v42 = vpop.f32.mrf.mxu1 }
 0x3dc   : > { %4205 = vst [vmem:[#allocation5 + $0x138] sm:$0xff] %v4141_v39  ;;  %v3944_v43 = vadd.f32 %v3943_v42, %v3654_v40  ;;  %v2481_v40 = vld [vmem:[#allocation5 + $0x1e0] sm:$0xff] }
 0x3dd   : > { %v3656_v44 = vpop.f32.mrf.mxu0  ;;  %v3945_v45 = vpop.f32.mrf.mxu1 }
 0x3de   : > { %v4142_v46 = vadd.f32 %v3944_v43, %v2472_v41 }
 0x3df   : > { %v3659_v47 = vpop.f32.mrf.mxu0  ;;  %v3948_v49 = vpop.f32.mrf.mxu1 }
 0x3e0   : > { %4206 = vst [vmem:[#allocation5 + $0x140] sm:$0xff] %v4142_v46  ;;  %v3949_v50 = vadd.f32 %v3948_v49, %v3659_v47  ;;  %v2482_v47 = vld [vmem:[#allocation5] sm:$0xff] }
 0x3e1   : > { %v3661_v51 = vpop.f32.mrf.mxu0  ;;  %v3950_v52 = vpop.f32.mrf.mxu1 }
 0x3e2   : > { %v4143_v53 = vadd.f32 %v3949_v50, %v2473_v48 }
 0x3e3   : > { %v3662_v54 = vpop.f32.mrf.mxu0  ;;  %v3951_v56 = vpop.f32.mrf.mxu1 }
 0x3e4   : > { %4207 = vst [vmem:[#allocation5 + $0x80] sm:$0xff] %v4143_v53  ;;  %v3952_v57 = vadd.f32 %v3951_v56, %v3662_v54  ;;  %v2483_v54 = vld [vmem:[#allocation5 + $0xf0] sm:$0xff] }
 0x3e5   : > { %v3664_v58 = vpop.f32.mrf.mxu0  ;;  %v3953_v59 = vpop.f32.mrf.mxu1 }
 0x3e6   : > { %v4144_v60 = vadd.f32 %v3952_v57, %v2474_v55 }
 0x3e7   : > { %v3667_v61 = vpop.f32.mrf.mxu0  ;;  %v3956_v63 = vpop.f32.mrf.mxu1 }
 0x3e8   : > { %4208 = vst [vmem:[#allocation5 + $0x1a8] sm:$0xff] %v4144_v60  ;;  %v3957_v0 = vadd.f32 %v3956_v63, %v3667_v61  ;;  %v2484_v61 = vld [vmem:[#allocation5 + $0x8] sm:$0xff] }
 0x3e9   : > { %v3669_v1 = vpop.f32.mrf.mxu0  ;;  %v3958_v2 = vpop.f32.mrf.mxu1 }
 0x3ea   : > { %v4145_v3 = vadd.f32 %v3957_v0, %v2475_v62 }
 0x3eb   : > { %v3670_v4 = vpop.f32.mrf.mxu0  ;;  %v3959_v6 = vpop.f32.mrf.mxu1 }
 0x3ec   : > { %4209 = vst [vmem:[#allocation5 + $0x1b8] sm:$0xff] %v4145_v3  ;;  %v3960_v7 = vadd.f32 %v3959_v6, %v3670_v4  ;;  %v2485_v4 = vld [vmem:[#allocation5 + $0x148] sm:$0xff] }
 0x3ed   : > { %v3672_v8 = vpop.f32.mrf.mxu0  ;;  %v3961_v9 = vpop.f32.mrf.mxu1 }
 0x3ee   : > { %v4146_v10 = vadd.f32 %v3960_v7, %v2476_v5 }
 0x3ef   : > { %v3675_v11 = vpop.f32.mrf.mxu0  ;;  %v3964_v13 = vpop.f32.mrf.mxu1 }
 0x3f0   : > { %4210 = vst [vmem:[#allocation5 + $0x28] sm:$0xff] %v4146_v10  ;;  %v3965_v14 = vadd.f32 %v3964_v13, %v3675_v11  ;;  %v2486_v11 = vld [vmem:[#allocation5 + $0x1d0] sm:$0xff] }
 0x3f1   : > { %v3677_v15 = vpop.f32.mrf.mxu0  ;;  %v3966_v16 = vpop.f32.mrf.mxu1 }
 0x3f2   : > { %v4147_v17 = vadd.f32 %v3965_v14, %v2477_v12 }
 0x3f3   : > { %v3678_v18 = vpop.f32.mrf.mxu0  ;;  %v3967_v20 = vpop.f32.mrf.mxu1 }
 0x3f4   : > { %4211 = vst [vmem:[#allocation5 + $0x1e8] sm:$0xff] %v4147_v17  ;;  %v3968_v21 = vadd.f32 %v3967_v20, %v3678_v18  ;;  %v2487_v18 = vld [vmem:[#allocation5 + $0x100] sm:$0xff] }
 0x3f5   : > { %v3680_v22 = vpop.f32.mrf.mxu0  ;;  %v3969_v23 = vpop.f32.mrf.mxu1 }
 0x3f6   : > { %v4148_v24 = vadd.f32 %v3968_v21, %v2478_v19 }
 0x3f7   : > { %v3683_v25 = vpop.f32.mrf.mxu0  ;;  %v3972_v27 = vpop.f32.mrf.mxu1 }
 0x3f8   : > { %4212 = vst [vmem:[#allocation5 + $0xf8] sm:$0xff] %v4148_v24  ;;  %v3973_v28 = vadd.f32 %v3972_v27, %v3683_v25  ;;  %v2488_v25 = vld [vmem:[#allocation5 + $0xc8] sm:$0xff] }
 0x3f9   : > { %v3685_v29 = vpop.f32.mrf.mxu0  ;;  %v3974_v30 = vpop.f32.mrf.mxu1 }
 0x3fa   : > { %v4149_v31 = vadd.f32 %v3973_v28, %v2479_v26 }
 0x3fb   : > { %v3686_v32 = vpop.f32.mrf.mxu0  ;;  %v3975_v34 = vpop.f32.mrf.mxu1 }
 0x3fc   : > { %4213 = vst [vmem:[#allocation5 + $0x160] sm:$0xff] %v4149_v31  ;;  %v3976_v35 = vadd.f32 %v3975_v34, %v3686_v32  ;;  %v2489_v32 = vld [vmem:[#allocation5 + $0x40] sm:$0xff] }
 0x3fd   : > { %v3688_v36 = vpop.f32.mrf.mxu0  ;;  %v3977_v37 = vpop.f32.mrf.mxu1 }
 0x3fe   : > { %v4150_v38 = vadd.f32 %v3976_v35, %v2480_v33 }
 0x3ff   : > { %v3691_v39 = vpop.f32.mrf.mxu0  ;;  %v3980_v41 = vpop.f32.mrf.mxu1 }
 0x400   : > { %4214 = vst [vmem:[#allocation5 + $0x30] sm:$0xff] %v4150_v38  ;;  %v3981_v42 = vadd.f32 %v3980_v41, %v3691_v39  ;;  %v2490_v39 = vld [vmem:[#allocation5 + $0x1f8] sm:$0xff] }
 0x401   : > { %v3693_v43 = vpop.f32.mrf.mxu0  ;;  %v3982_v44 = vpop.f32.mrf.mxu1 }
 0x402   : > { %v4151_v45 = vadd.f32 %v3981_v42, %v2481_v40 }
 0x403   : > { %v3694_v46 = vpop.f32.mrf.mxu0  ;;  %v3983_v48 = vpop.f32.mrf.mxu1 }
 0x404   : > { %4215 = vst [vmem:[#allocation5 + $0x1e0] sm:$0xff] %v4151_v45  ;;  %v3984_v49 = vadd.f32 %v3983_v48, %v3694_v46  ;;  %v2491_v46 = vld [vmem:[#allocation5 + $0x20] sm:$0xff] }
 0x405   : > { %v3696_v50 = vpop.f32.mrf.mxu0  ;;  %v3985_v51 = vpop.f32.mrf.mxu1 }
 0x406   : > { %v4152_v52 = vadd.f32 %v3984_v49, %v2482_v47 }
 0x407   : > { %v3699_v53 = vpop.f32.mrf.mxu0  ;;  %v3988_v55 = vpop.f32.mrf.mxu1 }
 0x408   : > { %4216 = vst [vmem:[#allocation5] sm:$0xff] %v4152_v52  ;;  %v3989_v56 = vadd.f32 %v3988_v55, %v3699_v53  ;;  %v2492_v53 = vld [vmem:[#allocation5 + $0x128] sm:$0xff] }
 0x409   : > { %v3701_v57 = vpop.f32.mrf.mxu0  ;;  %v3990_v58 = vpop.f32.mrf.mxu1 }
 0x40a   : > { %v4153_v59 = vadd.f32 %v3989_v56, %v2483_v54 }
 0x40b   : > { %v3702_v60 = vpop.f32.mrf.mxu0  ;;  %v3991_v62 = vpop.f32.mrf.mxu1 }
 0x40c   : > { %4217 = vst [vmem:[#allocation5 + $0xf0] sm:$0xff] %v4153_v59  ;;  %v3992_v63 = vadd.f32 %v3991_v62, %v3702_v60  ;;  %v2493_v60 = vld [vmem:[#allocation5 + $0x1a0] sm:$0xff] }
 0x40d   : > { %v3704_v0 = vpop.f32.mrf.mxu0  ;;  %v3993_v1 = vpop.f32.mrf.mxu1 }
 0x40e   : > { %v4154_v2 = vadd.f32 %v3992_v63, %v2484_v61 }
 0x40f   : > { %v3707_v3 = vpop.f32.mrf.mxu0  ;;  %v3996_v5 = vpop.f32.mrf.mxu1 }
 0x410   : > { %4218 = vst [vmem:[#allocation5 + $0x8] sm:$0xff] %v4154_v2  ;;  %v3997_v6 = vadd.f32 %v3996_v5, %v3707_v3  ;;  %v2494_v3 = vld [vmem:[#allocation5 + $0x1f0] sm:$0xff] }
 0x411   : > { %v3709_v7 = vpop.f32.mrf.mxu0  ;;  %v3998_v8 = vpop.f32.mrf.mxu1 }
 0x412   : > { %v4155_v9 = vadd.f32 %v3997_v6, %v2485_v4 }
 0x413   : > { %v3710_v10 = vpop.f32.mrf.mxu0  ;;  %v3999_v12 = vpop.f32.mrf.mxu1 }
 0x414   : > { %4219 = vst [vmem:[#allocation5 + $0x148] sm:$0xff] %v4155_v9  ;;  %v4000_v13 = vadd.f32 %v3999_v12, %v3710_v10  ;;  %v2495_v10 = vld [vmem:[#allocation5 + $0xe8] sm:$0xff] }
 0x415   : > { %v3712_v14 = vpop.f32.mrf.mxu0  ;;  %v4001_v15 = vpop.f32.mrf.mxu1 }
 0x416   : > { %v4156_v16 = vadd.f32 %v4000_v13, %v2486_v11 }
 0x417   : > { %v3715_v17 = vpop.f32.mrf.mxu0  ;;  %v4004_v19 = vpop.f32.mrf.mxu1 }
 0x418   : > { %4220 = vst [vmem:[#allocation5 + $0x1d0] sm:$0xff] %v4156_v16  ;;  %v4005_v20 = vadd.f32 %v4004_v19, %v3715_v17  ;;  %v2496_v17 = vld [vmem:[#allocation5 + $0x78] sm:$0xff] }
 0x419   : > { %v3717_v21 = vpop.f32.mrf.mxu0  ;;  %v4006_v22 = vpop.f32.mrf.mxu1 }
 0x41a   : > { %v4157_v23 = vadd.f32 %v4005_v20, %v2487_v18 }
 0x41b   : > { %v3718_v24 = vpop.f32.mrf.mxu0  ;;  %v4007_v26 = vpop.f32.mrf.mxu1 }
 0x41c   : > { %4221 = vst [vmem:[#allocation5 + $0x100] sm:$0xff] %v4157_v23  ;;  %v4008_v27 = vadd.f32 %v4007_v26, %v3718_v24  ;;  %v2497_v24 = vld [vmem:[#allocation5 + $0x70] sm:$0xff] }
 0x41d   : > { %v3720_v28 = vpop.f32.mrf.mxu0  ;;  %v4009_v29 = vpop.f32.mrf.mxu1 }
 0x41e   : > { %v4158_v30 = vadd.f32 %v4008_v27, %v2488_v25 }
 0x41f   : > { %v3723_v31 = vpop.f32.mrf.mxu0  ;;  %v4012_v33 = vpop.f32.mrf.mxu1 }
 0x420   : > { %4222 = vst [vmem:[#allocation5 + $0xc8] sm:$0xff] %v4158_v30  ;;  %v4013_v34 = vadd.f32 %v4012_v33, %v3723_v31  ;;  %v2498_v31 = vld [vmem:[#allocation5 + $0x90] sm:$0xff] }
 0x421   : > { %v3725_v35 = vpop.f32.mrf.mxu0  ;;  %v4014_v36 = vpop.f32.mrf.mxu1 }
 0x422   : > { %v4159_v37 = vadd.f32 %v4013_v34, %v2489_v32 }
 0x423   : > { %v3726_v38 = vpop.f32.mrf.mxu0  ;;  %v4015_v40 = vpop.f32.mrf.mxu1 }
 0x424   : > { %4223 = vst [vmem:[#allocation5 + $0x40] sm:$0xff] %v4159_v37  ;;  %v4016_v41 = vadd.f32 %v4015_v40, %v3726_v38  ;;  %v2499_v38 = vld [vmem:[#allocation5 + $0x1d8] sm:$0xff] }
 0x425   : > { %v3728_v42 = vpop.f32.mrf.mxu0  ;;  %v4017_v43 = vpop.f32.mrf.mxu1 }
 0x426   : > { %v4160_v44 = vadd.f32 %v4016_v41, %v2490_v39 }
 0x427   : > { %v3731_v45 = vpop.f32.mrf.mxu0  ;;  %v4020_v47 = vpop.f32.mrf.mxu1 }
 0x428   : > { %4224 = vst [vmem:[#allocation5 + $0x1f8] sm:$0xff] %v4160_v44  ;;  %v4021_v48 = vadd.f32 %v4020_v47, %v3731_v45  ;;  %v2500_v45 = vld [vmem:[#allocation5 + $0xd0] sm:$0xff] }
 0x429   : > { %v3733_v49 = vpop.f32.mrf.mxu0  ;;  %v4022_v50 = vpop.f32.mrf.mxu1 }
 0x42a   : > { %v4161_v51 = vadd.f32 %v4021_v48, %v2491_v46 }
 0x42b   : > { %v3734_v52 = vpop.f32.mrf.mxu0  ;;  %v4023_v54 = vpop.f32.mrf.mxu1 }
 0x42c   : > { %4225 = vst [vmem:[#allocation5 + $0x20] sm:$0xff] %v4161_v51  ;;  %v4024_v55 = vadd.f32 %v4023_v54, %v3734_v52  ;;  %v2501_v52 = vld [vmem:[#allocation5 + $0xb8] sm:$0xff] }
 0x42d   : > { %v3736_v56 = vpop.f32.mrf.mxu0  ;;  %v4025_v57 = vpop.f32.mrf.mxu1 }
 0x42e   : > { %v4162_v58 = vadd.f32 %v4024_v55, %v2492_v53 }
 0x42f   : > { %v3739_v59 = vpop.f32.mrf.mxu0  ;;  %v4028_v61 = vpop.f32.mrf.mxu1 }
 0x430   : > { %4226 = vst [vmem:[#allocation5 + $0x128] sm:$0xff] %v4162_v58  ;;  %v4029_v62 = vadd.f32 %v4028_v61, %v3739_v59  ;;  %v2502_v59 = vld [vmem:[#allocation5 + $0x88] sm:$0xff] }
 0x431   : > { %v3741_v63 = vpop.f32.mrf.mxu0  ;;  %v4030_v0 = vpop.f32.mrf.mxu1 }
 0x432   : > { %v4163_v1 = vadd.f32 %v4029_v62, %v2493_v60 }
 0x433   : > { %v3742_v2 = vpop.f32.mrf.mxu0  ;;  %v4031_v4 = vpop.f32.mrf.mxu1 }
 0x434   : > { %4227 = vst [vmem:[#allocation5 + $0x1a0] sm:$0xff] %v4163_v1  ;;  %v4032_v5 = vadd.f32 %v4031_v4, %v3742_v2  ;;  %v2503_v2 = vld [vmem:[#allocation5 + $0xa8] sm:$0xff] }
 0x435   : > { %v3744_v6 = vpop.f32.mrf.mxu0  ;;  %v4033_v7 = vpop.f32.mrf.mxu1 }
 0x436   : > { %v4164_v8 = vadd.f32 %v4032_v5, %v2494_v3 }
 0x437   : > { %v3747_v9 = vpop.f32.mrf.mxu0  ;;  %v4036_v11 = vpop.f32.mrf.mxu1 }
 0x438   : > { %4228 = vst [vmem:[#allocation5 + $0x1f0] sm:$0xff] %v4164_v8  ;;  %v4037_v12 = vadd.f32 %v4036_v11, %v3747_v9  ;;  %v2504_v9 = vld [vmem:[#allocation5 + $0x1c8] sm:$0xff] }
 0x439   : > { %v3749_v13 = vpop.f32.mrf.mxu0  ;;  %v4038_v14 = vpop.f32.mrf.mxu1 }
 0x43a   : > { %v4165_v15 = vadd.f32 %v4037_v12, %v2495_v10 }
 0x43b   : > { %v3750_v16 = vpop.f32.mrf.mxu0  ;;  %v4039_v18 = vpop.f32.mrf.mxu1 }
 0x43c   : > { %4229 = vst [vmem:[#allocation5 + $0xe8] sm:$0xff] %v4165_v15  ;;  %v4040_v19 = vadd.f32 %v4039_v18, %v3750_v16  ;;  %v2505_v16 = vld [vmem:[#allocation5 + $0x170] sm:$0xff] }
 0x43d   : > { %v3752_v20 = vpop.f32.mrf.mxu0  ;;  %v4041_v21 = vpop.f32.mrf.mxu1 }
 0x43e   : > { %v4166_v22 = vadd.f32 %v4040_v19, %v2496_v17 }
 0x43f   : > { %v3755_v23 = vpop.f32.mrf.mxu0  ;;  %v4044_v25 = vpop.f32.mrf.mxu1 }
 0x440   : > { %4230 = vst [vmem:[#allocation5 + $0x78] sm:$0xff] %v4166_v22  ;;  %v4045_v26 = vadd.f32 %v4044_v25, %v3755_v23  ;;  %v2506_v23 = vld [vmem:[#allocation5 + $0x178] sm:$0xff] }
 0x441   : > { %v3757_v27 = vpop.f32.mrf.mxu0  ;;  %v4046_v28 = vpop.f32.mrf.mxu1 }
 0x442   : > { %v4167_v29 = vadd.f32 %v4045_v26, %v2497_v24 }
 0x443   : > { %v3758_v30 = vpop.f32.mrf.mxu0  ;;  %v4047_v32 = vpop.f32.mrf.mxu1 }
 0x444   : > { %4231 = vst [vmem:[#allocation5 + $0x70] sm:$0xff] %v4167_v29  ;;  %v4048_v33 = vadd.f32 %v4047_v32, %v3758_v30  ;;  %v2507_v30 = vld [vmem:[#allocation5 + $0x68] sm:$0xff] }
 0x445   : > { %v3760_v34 = vpop.f32.mrf.mxu0  ;;  %v4049_v35 = vpop.f32.mrf.mxu1 }
 0x446   : > { %v4168_v36 = vadd.f32 %v4048_v33, %v2498_v31 }
 0x447   : > { %v3763_v37 = vpop.f32.mrf.mxu0  ;;  %v4052_v39 = vpop.f32.mrf.mxu1 }
 0x448   : > { %4232 = vst [vmem:[#allocation5 + $0x90] sm:$0xff] %v4168_v36  ;;  %v4053_v40 = vadd.f32 %v4052_v39, %v3763_v37  ;;  %v2508_v37 = vld [vmem:[#allocation5 + $0x190] sm:$0xff] }
 0x449   : > { %v3765_v41 = vpop.f32.mrf.mxu0  ;;  %v4054_v42 = vpop.f32.mrf.mxu1 }
 0x44a   : > { %v4169_v43 = vadd.f32 %v4053_v40, %v2499_v38 }
 0x44b   : > { %v3766_v44 = vpop.f32.mrf.mxu0  ;;  %v4055_v46 = vpop.f32.mrf.mxu1 }
 0x44c   : > { %4233 = vst [vmem:[#allocation5 + $0x1d8] sm:$0xff] %v4169_v43  ;;  %v4056_v47 = vadd.f32 %v4055_v46, %v3766_v44  ;;  %v2509_v44 = vld [vmem:[#allocation5 + $0x198] sm:$0xff] }
 0x44d   : > { %v3768_v48 = vpop.f32.mrf.mxu0  ;;  %v4057_v49 = vpop.f32.mrf.mxu1 }
 0x44e   : > { %v4170_v50 = vadd.f32 %v4056_v47, %v2500_v45 }
 0x44f   : > { %v3771_v51 = vpop.f32.mrf.mxu0  ;;  %v4060_v53 = vpop.f32.mrf.mxu1 }
 0x450   : > { %4234 = vst [vmem:[#allocation5 + $0xd0] sm:$0xff] %v4170_v50  ;;  %v4061_v54 = vadd.f32 %v4060_v53, %v3771_v51  ;;  %v2510_v51 = vld [vmem:[#allocation5 + $0x38] sm:$0xff] }
 0x451   : > { %v3773_v55 = vpop.f32.mrf.mxu0  ;;  %v4062_v56 = vpop.f32.mrf.mxu1 }
 0x452   : > { %v4171_v57 = vadd.f32 %v4061_v54, %v2501_v52 }
 0x453   : > { %v3774_v58 = vpop.f32.mrf.mxu0  ;;  %v4063_v60 = vpop.f32.mrf.mxu1 }
 0x454   : > { %4235 = vst [vmem:[#allocation5 + $0xb8] sm:$0xff] %v4171_v57  ;;  %v4064_v61 = vadd.f32 %v4063_v60, %v3774_v58  ;;  %v2511_v58 = vld [vmem:[#allocation5 + $0xc0] sm:$0xff] }
 0x455   : > { %v3776_v62 = vpop.f32.mrf.mxu0  ;;  %v4065_v63 = vpop.f32.mrf.mxu1 }
 0x456   : > { %v4172_v0 = vadd.f32 %v4064_v61, %v2502_v59 }
 0x457   : > { %v3779_v1 = vpop.f32.mrf.mxu0  ;;  %v4068_v3 = vpop.f32.mrf.mxu1 }
 0x458   : > { %4236 = vst [vmem:[#allocation5 + $0x88] sm:$0xff] %v4172_v0  ;;  %v4069_v4 = vadd.f32 %v4068_v3, %v3779_v1  ;;  %v2512_v1 = vld [vmem:[#allocation5 + $0x1c0] sm:$0xff] }
 0x459   : > { %v3781_v5 = vpop.f32.mrf.mxu0  ;;  %v4070_v6 = vpop.f32.mrf.mxu1 }
 0x45a   : > { %v4173_v7 = vadd.f32 %v4069_v4, %v2503_v2 }
 0x45b   : > { %v3782_v8 = vpop.f32.mrf.mxu0  ;;  %v4071_v10 = vpop.f32.mrf.mxu1 }
 0x45c   : > { %4237 = vst [vmem:[#allocation5 + $0xa8] sm:$0xff] %v4173_v7  ;;  %v4072_v11 = vadd.f32 %v4071_v10, %v3782_v8  ;;  %v2513_v8 = vld [vmem:[#allocation5 + $0x158] sm:$0xff] }
 0x45d   : > { %v3784_v12 = vpop.f32.mrf.mxu0  ;;  %v4073_v13 = vpop.f32.mrf.mxu1 }
 0x45e   : > { %v4174_v14 = vadd.f32 %v4072_v11, %v2504_v9 }
 0x45f   : > { %v3787_v15 = vpop.f32.mrf.mxu0  ;;  %v4076_v17 = vpop.f32.mrf.mxu1 }
 0x460   : > { %4238 = vst [vmem:[#allocation5 + $0x1c8] sm:$0xff] %v4174_v14  ;;  %v4077_v18 = vadd.f32 %v4076_v17, %v3787_v15  ;;  %v2514_v15 = vld [vmem:[#allocation5 + $0x10] sm:$0xff] }
 0x461   : > { %v3789_v19 = vpop.f32.mrf.mxu0  ;;  %v4078_v20 = vpop.f32.mrf.mxu1 }
 0x462   : > { %v4175_v21 = vadd.f32 %v4077_v18, %v2505_v16 }
 0x463   : > { %v3790_v22 = vpop.f32.mrf.mxu0  ;;  %v4079_v24 = vpop.f32.mrf.mxu1 }
 0x464   : > { %4239 = vst [vmem:[#allocation5 + $0x170] sm:$0xff] %v4175_v21  ;;  %v4080_v25 = vadd.f32 %v4079_v24, %v3790_v22  ;;  %v2515_v22 = vld [vmem:[#allocation5 + $0x58] sm:$0xff] }
 0x465   : > { %v3792_v26 = vpop.f32.mrf.mxu0  ;;  %v4081_v27 = vpop.f32.mrf.mxu1 }
 0x466   : > { %v4176_v28 = vadd.f32 %v4080_v25, %v2506_v23 }
 0x467   : > { %v3795_v29 = vpop.f32.mrf.mxu0  ;;  %v4084_v31 = vpop.f32.mrf.mxu1 }
 0x468   : > { %4240 = vst [vmem:[#allocation5 + $0x178] sm:$0xff] %v4176_v28  ;;  %v4085_v32 = vadd.f32 %v4084_v31, %v3795_v29  ;;  %v2516_v29 = vld [vmem:[#allocation5 + $0xa0] sm:$0xff] }
 0x469   : > { %v3797_v33 = vpop.f32.mrf.mxu0  ;;  %v4086_v34 = vpop.f32.mrf.mxu1 }
 0x46a   : > { %v4177_v35 = vadd.f32 %v4085_v32, %v2507_v30 }
 0x46b   : > { %v3798_v36 = vpop.f32.mrf.mxu0  ;;  %v4087_v38 = vpop.f32.mrf.mxu1 }
 0x46c   : > { %4241 = vst [vmem:[#allocation5 + $0x68] sm:$0xff] %v4177_v35  ;;  %v4088_v39 = vadd.f32 %v4087_v38, %v3798_v36 }
 0x46d   : > { %v3800_v40 = vpop.f32.mrf.mxu0  ;;  %v4089_v41 = vpop.f32.mrf.mxu1 }
 0x46e   : > { %v4178_v42 = vadd.f32 %v4088_v39, %v2508_v37 }
 0x46f   : > { %v3803_v43 = vpop.f32.mrf.mxu0  ;;  %v4092_v45 = vpop.f32.mrf.mxu1 }
 0x470   : > { %4242 = vst [vmem:[#allocation5 + $0x190] sm:$0xff] %v4178_v42  ;;  %v4093_v46 = vadd.f32 %v4092_v45, %v3803_v43 }
 0x471   : > { %v3805_v47 = vpop.f32.mrf.mxu0  ;;  %v4094_v48 = vpop.f32.mrf.mxu1 }
 0x472   : > { %v4179_v49 = vadd.f32 %v4093_v46, %v2509_v44 }
 0x473   : > { %v3806_v50 = vpop.f32.mrf.mxu0  ;;  %v4095_v52 = vpop.f32.mrf.mxu1 }
 0x474   : > { %4243 = vst [vmem:[#allocation5 + $0x198] sm:$0xff] %v4179_v49  ;;  %v4096_v53 = vadd.f32 %v4095_v52, %v3806_v50 }
 0x475   : > { %v3808_v54 = vpop.f32.mrf.mxu0  ;;  %v4097_v55 = vpop.f32.mrf.mxu1 }
 0x476   : > { %v4180_v56 = vadd.f32 %v4096_v53, %v2510_v51 }
 0x477   : > { %v3811_v57 = vpop.f32.mrf.mxu0  ;;  %v4100_v59 = vpop.f32.mrf.mxu1 }
 0x478   : > { %4244 = vst [vmem:[#allocation5 + $0x38] sm:$0xff] %v4180_v56  ;;  %v4101_v60 = vadd.f32 %v4100_v59, %v3811_v57 }
 0x479   : > { %v3813_v61 = vpop.f32.mrf.mxu0  ;;  %v4102_v62 = vpop.f32.mrf.mxu1 }
 0x47a   : > { %v4181_v63 = vadd.f32 %v4101_v60, %v2511_v58 }
 0x47b   : > { %v3814_v0 = vpop.f32.mrf.mxu0  ;;  %v4103_v2 = vpop.f32.mrf.mxu1 }
 0x47c   : > { %4245 = vst [vmem:[#allocation5 + $0xc0] sm:$0xff] %v4181_v63  ;;  %v4104_v3 = vadd.f32 %v4103_v2, %v3814_v0 }
 0x47d   : > { %v3816_v4 = vpop.f32.mrf.mxu0  ;;  %v4105_v5 = vpop.f32.mrf.mxu1 }
 0x47e   : > { %v4182_v6 = vadd.f32 %v4104_v3, %v2512_v1 }
 0x47f   : > { %v3819_v7 = vpop.f32.mrf.mxu0  ;;  %v4108_v9 = vpop.f32.mrf.mxu1 }
 0x480   : > { %4246 = vst [vmem:[#allocation5 + $0x1c0] sm:$0xff] %v4182_v6  ;;  %v4109_v10 = vadd.f32 %v4108_v9, %v3819_v7 }
 0x481   : > { %v3821_v11 = vpop.f32.mrf.mxu0  ;;  %v4110_v12 = vpop.f32.mrf.mxu1 }
 0x482   : > { %v4183_v13 = vadd.f32 %v4109_v10, %v2513_v8 }
 0x483   : > { %v3822_v14 = vpop.f32.mrf.mxu0  ;;  %v4111_v16 = vpop.f32.mrf.mxu1 }
 0x484   : > { %4247 = vst [vmem:[#allocation5 + $0x158] sm:$0xff] %v4183_v13  ;;  %v4112_v17 = vadd.f32 %v4111_v16, %v3822_v14 }
 0x485   : > { %v3824_v18 = vpop.f32.mrf.mxu0  ;;  %v4113_v19 = vpop.f32.mrf.mxu1 }
 0x486   : > { %v4184_v20 = vadd.f32 %v4112_v17, %v2514_v15 }
 0x487   : > { %v3827_v21 = vpop.f32.mrf.mxu0  ;;  %v4116_v23 = vpop.f32.mrf.mxu1 }
 0x488   : > { %4248 = vst [vmem:[#allocation5 + $0x10] sm:$0xff] %v4184_v20  ;;  %v4117_v24 = vadd.f32 %v4116_v23, %v3827_v21 }
 0x489   : > { %v3829_v25 = vpop.f32.mrf.mxu0  ;;  %v4118_v26 = vpop.f32.mrf.mxu1 }
 0x48a   : > { %v4185_v27 = vadd.f32 %v4117_v24, %v2515_v22 }
 0x48b   : > { %v3830_v28 = vpop.f32.mrf.mxu0  ;;  %v4119_v30 = vpop.f32.mrf.mxu1 }
 0x48c   : > { %4249 = vst [vmem:[#allocation5 + $0x58] sm:$0xff] %v4185_v27  ;;  %v4120_v31 = vadd.f32 %v4119_v30, %v3830_v28 }
 0x48d   : > { %v3832_v32 = vpop.f32.mrf.mxu0  ;;  %v4121_v33 = vpop.f32.mrf.mxu1 }
 0x48e   : > { %v4186_v34 = vadd.f32 %v4120_v31, %v2516_v29 }
 0x490   : > { %4250 = vst [vmem:[#allocation5 + $0xa0] sm:$0xff] %v4186_v34 }
 0x491 PF: > { %s4447_s25 = sadd.s32 1, %s7909_s15  ;;  %v8449_v35 = vld [vmem:[#allocation5 + $0xb0] sm:$0xff]  ;;  %v8453_v37 = vld [vmem:[#allocation5 + $0xd8] sm:$0xff]  ;;  %v8459_v40 = vld [vmem:[#allocation5 + $0x168] sm:$0xff] }
 0x492   : > { %9133 = vst [vmem:[#allocation22_spill] sm:$0xff] %v8449_v35  ;;  %v8451_v36 = vld [vmem:[#allocation5 + $0x1b0] sm:$0xff]  ;;  %9135 = vst [vmem:[#allocation24_spill] sm:$0xff] %v8453_v37  ;;  %v8455_v38 = vld [vmem:[#allocation5 + $0x18] sm:$0xff]  ;;  %p6187_p6 = scmp.ge.s32.totalorder %s4447_s25, 2 }
 0x493   : > { %9134 = vst [vmem:[#allocation23_spill] sm:$0xff] %v8451_v36  ;;  %9136 = vst [vmem:[#allocation25_spill] sm:$0xff] %v8455_v38  ;;  %v8457_v39 = vld [vmem:[#allocation5 + $0x50] sm:$0xff]  ;;  %v8463_v42 = vld [vmem:[#allocation5 + $0x48] sm:$0xff] }
 0x494   : > { %9137 = vst [vmem:[#allocation26_spill] sm:$0xff] %v8457_v39  ;;  %9138 = vst [vmem:[#allocation27_spill] sm:$0xff] %v8459_v40  ;;  %v8461_v41 = vld [vmem:[#allocation5 + $0x130] sm:$0xff]  ;;  %v8465_v43 = vld [vmem:[#allocation5 + $0x180] sm:$0xff] }
 0x495   : > { %9139 = vst [vmem:[#allocation28_spill] sm:$0xff] %v8461_v41  ;;  %9140 = vst [vmem:[#allocation29_spill] sm:$0xff] %v8463_v42  ;;  %v8467_v44 = vld [vmem:[#allocation5 + $0x110] sm:$0xff]  ;;  %v8469_v45 = vld [vmem:[#allocation5 + $0x118] sm:$0xff] }
 0x496   : > { %9141 = vst [vmem:[#allocation30_spill] sm:$0xff] %v8465_v43  ;;  %9142 = vst [vmem:[#allocation31_spill] sm:$0xff] %v8467_v44  ;;  %v8471_v46 = vld [vmem:[#allocation5 + $0x98] sm:$0xff]  ;;  %v8473_v47 = vld [vmem:[#allocation5 + $0x120] sm:$0xff] }
 0x497   : > { %9143 = vst [vmem:[#allocation32_spill] sm:$0xff] %v8469_v45  ;;  %9144 = vst [vmem:[#allocation33_spill] sm:$0xff] %v8471_v46  ;;  %v8475_v48 = vld [vmem:[#allocation5 + $0x150] sm:$0xff]  ;;  %v4319_v49 = vld [vmem:[#allocation4] sm:$0xff] }
 0x498   : > { %9145 = vst [vmem:[#allocation34_spill] sm:$0xff] %v8473_v47  ;;  %9146 = vst [vmem:[#allocation35_spill] sm:$0xff] %v8475_v48  ;;  %v4320_v50 = vld [vmem:[#allocation4 + $0x8] sm:$0xff]  ;;  %v8479_v52 = vld [vmem:[#allocation5 + $0x60] sm:$0xff]  ;;  %v8484_v57 = vadd.f32 %v4319_v49, %v8449_v35 }
 0x499   : > { %v8477_v51 = vld [vmem:[#allocation5 + $0x108] sm:$0xff]  ;;  %9148 = vst [vmem:[#allocation37_spill] sm:$0xff] %v8479_v52  ;;  %v8481_v53 = vld [vmem:[#allocation5 + $0xe0] sm:$0xff]  ;;  %v4321_v54 = vld [vmem:[#allocation4 + $0x10] sm:$0xff]  ;;  %v8487_v58 = vadd.f32 %v4320_v50, %v8451_v36 }
 0x49a   : > { %9147 = vst [vmem:[#allocation36_spill] sm:$0xff] %v8477_v51  ;;  %9149 = vst [vmem:[#allocation38_spill] sm:$0xff] %v8481_v53  ;;  %v4322_v55 = vld [vmem:[#allocation4 + $0x18] sm:$0xff]  ;;  %v4323_v56 = vld [vmem:[#allocation4 + $0x20] sm:$0xff]  ;;  %v8496_v1 = vadd.f32 %v4321_v54, %v8453_v37 }
 0x49b   : > { %v8489_v59 = vld [vmem:[#allocation5 + $0x188] sm:$0xff]  ;;  %v8491_v60 = vld [vmem:[#allocation5 + $0x138] sm:$0xff]  ;;  %v8493_v61 = vld [vmem:[#allocation5 + $0x140] sm:$0xff]  ;;  %v8499_v2 = vadd.f32 %v4322_v55, %v8455_v38  ;;  %v8502_v3 = vadd.f32 %v4323_v56, %v8457_v39 }
 0x49c   : > { %9150 = vst [vmem:[#allocation39_spill] sm:$0xff] %v8489_v59  ;;  %9151 = vst [vmem:[#allocation40_spill] sm:$0xff] %v8491_v60  ;;  %v4324_v62 = vld [vmem:[#allocation4 + $0x28] sm:$0xff]  ;;  %v4325_v63 = vld [vmem:[#allocation4 + $0x30] sm:$0xff] }
 0x49d   : > { %9152 = vst [vmem:[#allocation41_spill] sm:$0xff] %v8493_v61  ;;  %v4326_v0 = vld [vmem:[#allocation4 + $0x38] sm:$0xff]  ;;  %v8504_v4 = vld [vmem:[#allocation5 + $0x80] sm:$0xff]  ;;  %v8506_v5 = vld [vmem:[#allocation5 + $0x1a8] sm:$0xff]  ;;  %v8511_v10 = vadd.f32 %v4324_v62, %v8459_v40  ;;  %v8514_v11 = vadd.f32 %v4325_v63, %v8461_v41 }
 0x49e   : > { %9153 = vst [vmem:[#allocation42_spill] sm:$0xff] %v8504_v4  ;;  %9154 = vst [vmem:[#allocation43_spill] sm:$0xff] %v8506_v5  ;;  %v8508_v6 = vld [vmem:[#allocation5 + $0x1b8] sm:$0xff]  ;;  %v4327_v7 = vld [vmem:[#allocation4 + $0x40] sm:$0xff]  ;;  %v8517_v12 = vadd.f32 %v4326_v0, %v8463_v42 }
 0x49f   : > { %9155 = vst [vmem:[#allocation44_spill] sm:$0xff] %v8508_v6  ;;  %v4328_v8 = vld [vmem:[#allocation4 + $0x48] sm:$0xff]  ;;  %v4329_v9 = vld [vmem:[#allocation4 + $0x50] sm:$0xff]  ;;  %v8523_v15 = vld [vmem:[#allocation5 + $0xf8] sm:$0xff]  ;;  %v8526_v19 = vadd.f32 %v4327_v7, %v8465_v43 }
 0x4a0   : > { %v8519_v13 = vld [vmem:[#allocation5 + $0x28] sm:$0xff]  ;;  %9158 = vst [vmem:[#allocation47_spill] sm:$0xff] %v8523_v15  ;;  %v4330_v16 = vld [vmem:[#allocation4 + $0x58] sm:$0xff]  ;;  %v4331_v17 = vld [vmem:[#allocation4 + $0x60] sm:$0xff]  ;;  %v8529_v20 = vadd.f32 %v4328_v8, %v8467_v44  ;;  %v8532_v21 = vadd.f32 %v4329_v9, %v8469_v45 }
 0x4a1   : > { %9156 = vst [vmem:[#allocation45_spill] sm:$0xff] %v8519_v13  ;;  %v8521_v14 = vld [vmem:[#allocation5 + $0x1e8] sm:$0xff]  ;;  %v8534_v22 = vld [vmem:[#allocation5 + $0x160] sm:$0xff]  ;;  %v8536_v23 = vld [vmem:[#allocation5 + $0x30] sm:$0xff]  ;;  %v8541_v28 = vadd.f32 %v4330_v16, %v8471_v46  ;;  %v8544_v29 = vadd.f32 %v4331_v17, %v8473_v47 }
 0x4a2   : > { %9157 = vst [vmem:[#allocation46_spill] sm:$0xff] %v8521_v14  ;;  %v4332_v18 = vld [vmem:[#allocation4 + $0x68] sm:$0xff]  ;;  %9159 = vst [vmem:[#allocation48_spill] sm:$0xff] %v8534_v22  ;;  %v8538_v24 = vld [vmem:[#allocation5 + $0x1e0] sm:$0xff] }
 0x4a3   : > { %9160 = vst [vmem:[#allocation49_spill] sm:$0xff] %v8536_v23  ;;  %9161 = vst [vmem:[#allocation50_spill] sm:$0xff] %v8538_v24  ;;  %v4333_v25 = vld [vmem:[#allocation4 + $0x70] sm:$0xff]  ;;  %v4334_v26 = vld [vmem:[#allocation4 + $0x78] sm:$0xff]  ;;  %v8547_v30 = vadd.f32 %v4332_v18, %v8475_v48 }
 0x4a4   : > { %v4335_v27 = vld [vmem:[#allocation4 + $0x80] sm:$0xff]  ;;  %v8551_v32 = vld [vmem:[#allocation5 + $0xf0] sm:$0xff]  ;;  %v8553_v33 = vld [vmem:[#allocation5 + $0x8] sm:$0xff]  ;;  %v8556_v54 = vadd.f32 %v4333_v25, %v8477_v51  ;;  %v8559_v55 = vadd.f32 %v4334_v26, %v8479_v52 }
 0x4a5   : > { %v8549_v31 = vld [vmem:[#allocation5] sm:$0xff]  ;;  %9163 = vst [vmem:[#allocation52_spill] sm:$0xff] %v8551_v32  ;;  %9164 = vst [vmem:[#allocation53_spill] sm:$0xff] %v8553_v33  ;;  %v4336_v34 = vld [vmem:[#allocation4 + $0x88] sm:$0xff]  ;;  %v8562_v56 = vadd.f32 %v4335_v27, %v8481_v53 }
 0x4a6   : > { %9162 = vst [vmem:[#allocation51_spill] sm:$0xff] %v8549_v31  ;;  %v4337_v49 = vld [vmem:[#allocation4 + $0x90] sm:$0xff]  ;;  %v4338_v50 = vld [vmem:[#allocation4 + $0x98] sm:$0xff]  ;;  %v8564_v62 = vld [vmem:[#allocation5 + $0x148] sm:$0xff]  ;;  %v8571_v16 = vadd.f32 %v4336_v34, %v8489_v59 }
 0x4a7   : > { %9165 = vst [vmem:[#allocation54_spill] sm:$0xff] %v8564_v62  ;;  %v8566_v63 = vld [vmem:[#allocation5 + $0x1d0] sm:$0xff]  ;;  %v8568_v0 = vld [vmem:[#allocation5 + $0x100] sm:$0xff]  ;;  %v4340_v8 = vld [vmem:[#allocation4 + $0xa8] sm:$0xff]  ;;  %v8574_v17 = vadd.f32 %v4337_v49, %v8491_v60  ;;  %v8577_v18 = vadd.f32 %v4338_v50, %v8493_v61 }
 0x4a8   : > { %9166 = vst [vmem:[#allocation55_spill] sm:$0xff] %v8566_v63  ;;  %9167 = vst [vmem:[#allocation56_spill] sm:$0xff] %v8568_v0  ;;  %v4339_v7 = vld [vmem:[#allocation4 + $0xa0] sm:$0xff]  ;;  %v4341_v9 = vld [vmem:[#allocation4 + $0xb0] sm:$0xff]  ;;  %v8589_v34 = vadd.f32 %v4340_v8, %v8506_v5 }
 0x4a9   : > { %v8579_v25 = vld [vmem:[#allocation5 + $0xc8] sm:$0xff]  ;;  %v8581_v26 = vld [vmem:[#allocation5 + $0x40] sm:$0xff]  ;;  %v8583_v27 = vld [vmem:[#allocation5 + $0x1f8] sm:$0xff]  ;;  %v8586_v48 = vadd.f32 %v4339_v7, %v8504_v4  ;;  %v8592_v49 = vadd.f32 %v4341_v9, %v8508_v6 }
 0x4aa   : > { %9168 = vst [vmem:[#allocation57_spill] sm:$0xff] %v8579_v25  ;;  %9169 = vst [vmem:[#allocation58_spill] sm:$0xff] %v8581_v26  ;;  %v4342_v53 = vld [vmem:[#allocation4 + $0xb8] sm:$0xff]  ;;  %v4343_v52 = vld [vmem:[#allocation4 + $0xc0] sm:$0xff] }
 0x4ab   : > { %9170 = vst [vmem:[#allocation59_spill] sm:$0xff] %v8583_v27  ;;  %v4344_v51 = vld [vmem:[#allocation4 + $0xc8] sm:$0xff]  ;;  %9171 = vst [vmem:[#allocation60_spill] sm:$0xff] %v8592_v49  ;;  %v8594_v50 = vld [vmem:[#allocation5 + $0x20] sm:$0xff]  ;;  %v8601_v45 = vadd.f32 %v4342_v53, %v8519_v13  ;;  %v8604_v7 = vadd.f32 %v4343_v52, %v8521_v14 }
 0x4ac   : > { %9172 = vst [vmem:[#allocation61_spill] sm:$0xff] %v8594_v50  ;;  %v8596_v61 = vld [vmem:[#allocation5 + $0x128] sm:$0xff]  ;;  %v8598_v60 = vld [vmem:[#allocation5 + $0x1a0] sm:$0xff]  ;;  %v4345_v59 = vld [vmem:[#allocation4 + $0xd0] sm:$0xff]  ;;  %v8607_v8 = vadd.f32 %v4344_v51, %v8523_v15 }
 0x4ad   : > { %9173 = vst [vmem:[#allocation62_spill] sm:$0xff] %v8596_v61  ;;  %9174 = vst [vmem:[#allocation63_spill] sm:$0xff] %v8598_v60  ;;  %v4346_v47 = vld [vmem:[#allocation4 + $0xd8] sm:$0xff]  ;;  %v4347_v46 = vld [vmem:[#allocation4 + $0xe0] sm:$0xff]  ;;  %v8616_v42 = vadd.f32 %v4345_v59, %v8534_v22 }
 0x4ae   : > { %9175 = vst [vmem:[#allocation64_spill] sm:$0xff] %v8601_v45  ;;  %9176 = vst [vmem:[#allocation65_spill] sm:$0xff] %v8604_v7  ;;  %v8609_v9 = vld [vmem:[#allocation5 + $0x1f0] sm:$0xff]  ;;  %v8611_v6 = vld [vmem:[#allocation5 + $0xe8] sm:$0xff]  ;;  %v8619_v53 = vadd.f32 %v4346_v47, %v8536_v23  ;;  %v8622_v52 = vadd.f32 %v4347_v46, %v8538_v24 }
 0x4af   : > { %9177 = vst [vmem:[#allocation66_spill] sm:$0xff] %v8607_v8  ;;  %9178 = vst [vmem:[#allocation67_spill] sm:$0xff] %v8609_v9  ;;  %v8613_v5 = vld [vmem:[#allocation5 + $0x78] sm:$0xff]  ;;  %v4348_v4 = vld [vmem:[#allocation4 + $0xe8] sm:$0xff] }
 0x4b0   : > { %9179 = vst [vmem:[#allocation68_spill] sm:$0xff] %v8611_v6  ;;  %9180 = vst [vmem:[#allocation69_spill] sm:$0xff] %v8613_v5  ;;  %v4349_v44 = vld [vmem:[#allocation4 + $0xf0] sm:$0xff]  ;;  %v4350_v43 = vld [vmem:[#allocation4 + $0xf8] sm:$0xff]  ;;  %v8631_v39 = vadd.f32 %v4348_v4, %v8549_v31 }
 0x4b1   : > { %9181 = vst [vmem:[#allocation70_spill] sm:$0xff] %v8616_v42  ;;  %9182 = vst [vmem:[#allocation71_spill] sm:$0xff] %v8619_v53  ;;  %v8624_v51 = vld [vmem:[#allocation5 + $0x70] sm:$0xff]  ;;  %v8628_v14 = vld [vmem:[#allocation5 + $0x1d8] sm:$0xff]  ;;  %v8634_v59 = vadd.f32 %v4349_v44, %v8551_v32  ;;  %v8637_v47 = vadd.f32 %v4350_v43, %v8553_v33 }
 0x4b2   : > { %9183 = vst [vmem:[#allocation72_spill] sm:$0xff] %v8622_v52  ;;  %9184 = vst [vmem:[#allocation73_spill] sm:$0xff] %v8624_v51  ;;  %v8626_v15 = vld [vmem:[#allocation5 + $0x90] sm:$0xff]  ;;  %v4351_v13 = vld [vmem:[#allocation4 + $0x100] sm:$0xff] }
 0x4b3   : > { %9185 = vst [vmem:[#allocation74_spill] sm:$0xff] %v8626_v15  ;;  %9186 = vst [vmem:[#allocation75_spill] sm:$0xff] %v8628_v14  ;;  %v4352_v41 = vld [vmem:[#allocation4 + $0x108] sm:$0xff]  ;;  %v4353_v40 = vld [vmem:[#allocation4 + $0x110] sm:$0xff]  ;;  %v8646_v36 = vadd.f32 %v4351_v13, %v8564_v62 }
 0x4b4   : > { %9187 = vst [vmem:[#allocation76_spill] sm:$0xff] %v8631_v39  ;;  %9188 = vst [vmem:[#allocation77_spill] sm:$0xff] %v8634_v59  ;;  %v8639_v46 = vld [vmem:[#allocation5 + $0xd0] sm:$0xff]  ;;  %v8641_v24 = vld [vmem:[#allocation5 + $0xb8] sm:$0xff]  ;;  %v8649_v4 = vadd.f32 %v4352_v41, %v8566_v63  ;;  %v8652_v44 = vadd.f32 %v4353_v40, %v8568_v0 }
 0x4b5   : > { %9189 = vst [vmem:[#allocation78_spill] sm:$0xff] %v8637_v47  ;;  %9190 = vst [vmem:[#allocation79_spill] sm:$0xff] %v8639_v46  ;;  %v8643_v23 = vld [vmem:[#allocation5 + $0x88] sm:$0xff]  ;;  %v4354_v22 = vld [vmem:[#allocation4 + $0x118] sm:$0xff] }
 0x4b6   : > { %9191 = vst [vmem:[#allocation80_spill] sm:$0xff] %v8641_v24  ;;  %9192 = vst [vmem:[#allocation81_spill] sm:$0xff] %v8643_v23  ;;  %v4355_v38 = vld [vmem:[#allocation4 + $0x120] sm:$0xff]  ;;  %v4356_v37 = vld [vmem:[#allocation4 + $0x128] sm:$0xff]  ;;  %v8661_v59 = vadd.f32 %v4354_v22, %v8579_v25 }
 0x4b7   : > { %9193 = vst [vmem:[#allocation82_spill] sm:$0xff] %v8646_v36  ;;  %9194 = vst [vmem:[#allocation83_spill] sm:$0xff] %v8649_v4  ;;  %v8654_v43 = vld [vmem:[#allocation5 + $0xa8] sm:$0xff]  ;;  %v8658_v32 = vld [vmem:[#allocation5 + $0x170] sm:$0xff]  ;;  %v8664_v13 = vadd.f32 %v4355_v38, %v8581_v26  ;;  %v8667_v41 = vadd.f32 %v4356_v37, %v8583_v27 }
 0x4b8   : > { %9195 = vst [vmem:[#allocation84_spill] sm:$0xff] %v8652_v44  ;;  %9196 = vst [vmem:[#allocation85_spill] sm:$0xff] %v8654_v43  ;;  %v8656_v33 = vld [vmem:[#allocation5 + $0x1c8] sm:$0xff]  ;;  %v4357_v31 = vld [vmem:[#allocation4 + $0x130] sm:$0xff] }
 0x4b9   : > { %9197 = vst [vmem:[#allocation86_spill] sm:$0xff] %v8658_v32  ;;  %v4358_v35 = vld [vmem:[#allocation4 + $0x138] sm:$0xff]  ;;  %v4359_v47 = vld [vmem:[#allocation4 + $0x140] sm:$0xff]  ;;  %9198 = vst [vmem:[#allocation87_spill] sm:$0xff] %v8661_v59  ;;  %v8676_v36 = vadd.f32 %v4357_v31, %v8594_v50 }
 0x4ba   : > { %9199 = vst [vmem:[#allocation88_spill] sm:$0xff] %v8664_v13  ;;  %9200 = vst [vmem:[#allocation89_spill] sm:$0xff] %v8667_v41  ;;  %v8669_v40 = vld [vmem:[#allocation5 + $0x178] sm:$0xff]  ;;  %v8671_v0 = vld [vmem:[#allocation5 + $0x68] sm:$0xff]  ;;  %v8679_v22 = vadd.f32 %v4358_v35, %v8596_v61  ;;  %v8682_v38 = vadd.f32 %v4359_v47, %v8598_v60 }
 0x4bb   : > { %9201 = vst [vmem:[#allocation90_spill] sm:$0xff] %v8669_v40  ;;  %v8673_v63 = vld [vmem:[#allocation5 + $0x190] sm:$0xff]  ;;  %v4360_v62 = vld [vmem:[#allocation4 + $0x148] sm:$0xff]  ;;  %v4362_v4 = vld [vmem:[#allocation4 + $0x158] sm:$0xff] }
 0x4bc   : > { %9202 = vst [vmem:[#allocation91_spill] sm:$0xff] %v8673_v63  ;;  %v4361_v44 = vld [vmem:[#allocation4 + $0x150] sm:$0xff]  ;;  %9203 = vst [vmem:[#allocation92_spill] sm:$0xff] %v8676_v36  ;;  %v8684_v37 = vld [vmem:[#allocation5 + $0x198] sm:$0xff]  ;;  %v8691_v59 = vadd.f32 %v4360_v62, %v8609_v9  ;;  %v8697_v35 = vadd.f32 %v4362_v4, %v8613_v5 }
 0x4bd   : > { %9204 = vst [vmem:[#allocation93_spill] sm:$0xff] %v8679_v22  ;;  %9205 = vst [vmem:[#allocation94_spill] sm:$0xff] %v8682_v38  ;;  %v8686_v27 = vld [vmem:[#allocation5 + $0x38] sm:$0xff]  ;;  %v8688_v26 = vld [vmem:[#allocation5 + $0xc0] sm:$0xff]  ;;  %v8694_v31 = vadd.f32 %v4361_v44, %v8611_v6 }
 0x4be   : > { %v4363_v25 = vld [vmem:[#allocation4 + $0x160] sm:$0xff]  ;;  %v4364_v41 = vld [vmem:[#allocation4 + $0x168] sm:$0xff]  ;;  %v4365_v13 = vld [vmem:[#allocation4 + $0x170] sm:$0xff]  ;;  %9206 = vst [vmem:[#allocation95_spill] sm:$0xff] %v8691_v59 }
 0x4bf   : > { %9207 = vst [vmem:[#allocation96_spill] sm:$0xff] %v8694_v31  ;;  %9208 = vst [vmem:[#allocation97_spill] sm:$0xff] %v8697_v35  ;;  %v8699_v47 = vld [vmem:[#allocation5 + $0x1c0] sm:$0xff]  ;;  %v8701_v60 = vld [vmem:[#allocation5 + $0x158] sm:$0xff]  ;;  %v8706_v36 = vadd.f32 %v4363_v25, %v8624_v51  ;;  %v8709_v62 = vadd.f32 %v4364_v41, %v8626_v15  ;;  %v8712_v44 = vadd.f32 %v4365_v13, %v8628_v14 }
 0x4c0   : > { %v8703_v61 = vld [vmem:[#allocation5 + $0x10] sm:$0xff]  ;;  %v4366_v50 = vld [vmem:[#allocation4 + $0x178] sm:$0xff]  ;;  %v4367_v38 = vld [vmem:[#allocation4 + $0x180] sm:$0xff] }
 0x4c1   : > { %v4368_v22 = vld [vmem:[#allocation4 + $0x188] sm:$0xff]  ;;  %9209 = vst [vmem:[#allocation98_spill] sm:$0xff] %v8712_v44  ;;  %v8714_v4 = vld [vmem:[#allocation5 + $0x58] sm:$0xff]  ;;  %v8716_v5 = vld [vmem:[#allocation5 + $0xa0] sm:$0xff]  ;;  %v8719_v31 = vadd.f32 %v4366_v50, %v8639_v46  ;;  %v8722_v59 = vadd.f32 %v4367_v38, %v8641_v24 }
 0x4c2   : > { %v4369_v6 = vld [vmem:[#allocation4 + $0x190] sm:$0xff]  ;;  %v4370_v9 = vld [vmem:[#allocation4 + $0x198] sm:$0xff]  ;;  %v4371_v35 = vld [vmem:[#allocation4 + $0x1a0] sm:$0xff]  ;;  %v8725_v25 = vadd.f32 %v4368_v22, %v8643_v23 }
 0x4c3   : > { %9210 = vst [vmem:[#allocation99_spill] sm:$0xff] %v8719_v31  ;;  %v4372_v41 = vld [vmem:[#allocation4 + $0x1a8] sm:$0xff]  ;;  %v4373_v15 = vld [vmem:[#allocation4 + $0x1b0] sm:$0xff]  ;;  %v4374_v13 = vld [vmem:[#allocation4 + $0x1b8] sm:$0xff]  ;;  %v8728_v14 = vadd.f32 %v4369_v6, %v8654_v43  ;;  %v8731_v51 = vadd.f32 %v4370_v9, %v8656_v33  ;;  %v8734_v44 = vadd.f32 %v4371_v35, %v8658_v32 }
 0x4c4   : > { %v4375_v50 = vld [vmem:[#allocation4 + $0x1c0] sm:$0xff]  ;;  %v4376_v46 = vld [vmem:[#allocation4 + $0x1c8] sm:$0xff]  ;;  %v4377_v31 = vld [vmem:[#allocation4 + $0x1d0] sm:$0xff]  ;;  %v8737_v38 = vadd.f32 %v4372_v41, %v8669_v40  ;;  %v8740_v22 = vadd.f32 %v4373_v15, %v8671_v0  ;;  %v8743_v23 = vadd.f32 %v4374_v13, %v8673_v63 }
 0x4c5   : > { %v4378_v6 = vld [vmem:[#allocation4 + $0x1d8] sm:$0xff]  ;;  %v4379_v43 = vld [vmem:[#allocation4 + $0x1e0] sm:$0xff]  ;;  %v4380_v24 = vld [vmem:[#allocation4 + $0x1e8] sm:$0xff]  ;;  %v8746_v9 = vadd.f32 %v4375_v50, %v8684_v37  ;;  %v8749_v35 = vadd.f32 %v4376_v46, %v8686_v27  ;;  %v8752_v32 = vadd.f32 %v4377_v31, %v8688_v26 }
 0x4c6   : > { %9211 = vst [vmem:[#allocation100_spill] sm:$0xff] %v8740_v22  ;;  %9212 = vst [vmem:[#allocation101_spill] sm:$0xff] %v8743_v23  ;;  %v4381_v41 = vld [vmem:[#allocation4 + $0x1f0] sm:$0xff]  ;;  %v4382_v40 = vld [vmem:[#allocation4 + $0x1f8] sm:$0xff]  ;;  %v8755_v15 = vadd.f32 %v4378_v6, %v8699_v47  ;;  %v8758_v13 = vadd.f32 %v4379_v43, %v8701_v60  ;;  %v8761_v63 = vadd.f32 %v4380_v24, %v8703_v61  ;;  %4451 = sbr.rel (%p6187_p6) target bundleno = 1314 (0x522), region = 64 }
 0x4c7   : > { %9213 = vst [vmem:[#allocation102_spill] sm:$0xff] %v8746_v9  ;;  %9214 = vst [vmem:[#allocation103_spill] sm:$0xff] %v8749_v35  ;;  %v8764_v50 = vadd.f32 %v4381_v41, %v8714_v4  ;;  %v8767_v46 = vadd.f32 %v4382_v40, %v8716_v5 }
 0x4c8   : > { %9215 = vst [vmem:[#allocation104_spill] sm:$0xff] %v8752_v32  ;;  %9216 = vst [vmem:[#allocation105_spill] sm:$0xff] %v8755_v15 }
 0x4c9   : > { %9217 = vst [vmem:[#allocation106_spill] sm:$0xff] %v8758_v13  ;;  %9218 = vst [vmem:[#allocation107_spill] sm:$0xff] %v8761_v63 }
 0x4ca   : > { %9219 = vst [vmem:[#allocation108_spill] sm:$0xff] %v8764_v50  ;;  %9220 = vst [vmem:[#allocation109_spill] sm:$0xff] %v8767_v46 }
 0x4cb   : > { %4452 = vst [vmem:[#allocation4] sm:$0xff] %v8484_v57  ;;  %4453 = vst [vmem:[#allocation4 + $0x8] sm:$0xff] %v8487_v58  ;;  %v9221_v24 = vld [vmem:[#allocation77_spill] sm:$0xff]  ;;  %v9222_v43 = vld [vmem:[#allocation78_spill] sm:$0xff] }
 0x4cc   : > { %4454 = vst [vmem:[#allocation4 + $0x10] sm:$0xff] %v8496_v1  ;;  %4455 = vst [vmem:[#allocation4 + $0x18] sm:$0xff] %v8499_v2  ;;  %v9223_v40 = vld [vmem:[#allocation82_spill] sm:$0xff]  ;;  %v9224_v31 = vld [vmem:[#allocation83_spill] sm:$0xff] }
 0x4cd   : > { %4456 = vst [vmem:[#allocation4 + $0x20] sm:$0xff] %v8502_v3  ;;  %4457 = vst [vmem:[#allocation4 + $0x28] sm:$0xff] %v8511_v10  ;;  %v9225_v6 = vld [vmem:[#allocation84_spill] sm:$0xff]  ;;  %v9226_v41 = vld [vmem:[#allocation87_spill] sm:$0xff] }
 0x4ce   : > { %4458 = vst [vmem:[#allocation4 + $0x30] sm:$0xff] %v8514_v11  ;;  %4459 = vst [vmem:[#allocation4 + $0x38] sm:$0xff] %v8517_v12 }
 0x4cf   : > { %4460 = vst [vmem:[#allocation4 + $0x40] sm:$0xff] %v8526_v19  ;;  %4461 = vst [vmem:[#allocation4 + $0x48] sm:$0xff] %v8529_v20 }
 0x4d0   : > { %4462 = vst [vmem:[#allocation4 + $0x50] sm:$0xff] %v8532_v21  ;;  %4463 = vst [vmem:[#allocation4 + $0x58] sm:$0xff] %v8541_v28 }
 0x4d1   : > { %4464 = vst [vmem:[#allocation4 + $0x60] sm:$0xff] %v8544_v29  ;;  %4465 = vst [vmem:[#allocation4 + $0x68] sm:$0xff] %v8547_v30 }
 0x4d2   : > { %4466 = vst [vmem:[#allocation4 + $0x70] sm:$0xff] %v8556_v54  ;;  %4467 = vst [vmem:[#allocation4 + $0x78] sm:$0xff] %v8559_v55 }
 0x4d3   : > { %4468 = vst [vmem:[#allocation4 + $0x80] sm:$0xff] %v8562_v56  ;;  %4469 = vst [vmem:[#allocation4 + $0x88] sm:$0xff] %v8571_v16 }
 0x4d4   : > { %4470 = vst [vmem:[#allocation4 + $0x90] sm:$0xff] %v8574_v17  ;;  %4471 = vst [vmem:[#allocation4 + $0x98] sm:$0xff] %v8577_v18 }
 0x4d5   : > { %4472 = vst [vmem:[#allocation4 + $0xa0] sm:$0xff] %v8586_v48  ;;  %4473 = vst [vmem:[#allocation4 + $0xa8] sm:$0xff] %v8589_v34 }
 0x4d6   : > { %4474 = vst [vmem:[#allocation4 + $0xb0] sm:$0xff] %v8592_v49  ;;  %4475 = vst [vmem:[#allocation4 + $0xb8] sm:$0xff] %v8601_v45 }
 0x4d7   : > { %4476 = vst [vmem:[#allocation4 + $0xc0] sm:$0xff] %v8604_v7  ;;  %4477 = vst [vmem:[#allocation4 + $0xc8] sm:$0xff] %v8607_v8  ;;  %v9227_v8 = vld [vmem:[#allocation88_spill] sm:$0xff] }
 0x4d8   : > { %4478 = vst [vmem:[#allocation4 + $0xd0] sm:$0xff] %v8616_v42  ;;  %4479 = vst [vmem:[#allocation4 + $0xd8] sm:$0xff] %v8619_v53  ;;  %v9228_v42 = vld [vmem:[#allocation89_spill] sm:$0xff]  ;;  %v9229_v53 = vld [vmem:[#allocation92_spill] sm:$0xff] }
 0x4d9   : > { %4480 = vst [vmem:[#allocation4 + $0xe0] sm:$0xff] %v8622_v52  ;;  %4481 = vst [vmem:[#allocation4 + $0xe8] sm:$0xff] %v8631_v39  ;;  %v9230_v52 = vld [vmem:[#allocation93_spill] sm:$0xff]  ;;  %v9231_v39 = vld [vmem:[#allocation94_spill] sm:$0xff] }
 0x4da   : > { %4482 = vst [vmem:[#allocation4 + $0xf0] sm:$0xff] %v9221_v24  ;;  %4483 = vst [vmem:[#allocation4 + $0xf8] sm:$0xff] %v9222_v43  ;;  %v9232_v24 = vld [vmem:[#allocation95_spill] sm:$0xff]  ;;  %v9233_v43 = vld [vmem:[#allocation96_spill] sm:$0xff] }
 0x4db   : > { %4484 = vst [vmem:[#allocation4 + $0x100] sm:$0xff] %v9223_v40  ;;  %4485 = vst [vmem:[#allocation4 + $0x108] sm:$0xff] %v9224_v31  ;;  %v9234_v40 = vld [vmem:[#allocation97_spill] sm:$0xff]  ;;  %v9235_v31 = vld [vmem:[#allocation98_spill] sm:$0xff] }
 0x4dc   : > { %4486 = vst [vmem:[#allocation4 + $0x110] sm:$0xff] %v9225_v6  ;;  %4487 = vst [vmem:[#allocation4 + $0x118] sm:$0xff] %v9226_v41 }
 0x4dd   : > { %4488 = vst [vmem:[#allocation4 + $0x120] sm:$0xff] %v9227_v8  ;;  %4489 = vst [vmem:[#allocation4 + $0x128] sm:$0xff] %v9228_v42  ;;  %v9236_v8 = vld [vmem:[#allocation99_spill] sm:$0xff] }
 0x4de   : > { %4490 = vst [vmem:[#allocation4 + $0x130] sm:$0xff] %v9229_v53  ;;  %4491 = vst [vmem:[#allocation4 + $0x138] sm:$0xff] %v9230_v52 }
 0x4df   : > { %4492 = vst [vmem:[#allocation4 + $0x140] sm:$0xff] %v9231_v39  ;;  %4493 = vst [vmem:[#allocation4 + $0x148] sm:$0xff] %v9232_v24 }
 0x4e0   : > { %4494 = vst [vmem:[#allocation4 + $0x150] sm:$0xff] %v9233_v43  ;;  %4495 = vst [vmem:[#allocation4 + $0x158] sm:$0xff] %v9234_v40 }
 0x4e1   : > { %4496 = vst [vmem:[#allocation4 + $0x160] sm:$0xff] %v8706_v36  ;;  %4497 = vst [vmem:[#allocation4 + $0x168] sm:$0xff] %v8709_v62 }
 0x4e2   : > { %4498 = vst [vmem:[#allocation4 + $0x170] sm:$0xff] %v9235_v31  ;;  %4499 = vst [vmem:[#allocation4 + $0x178] sm:$0xff] %v9236_v8 }
 0x4e3   : > { %4500 = vst [vmem:[#allocation4 + $0x180] sm:$0xff] %v8722_v59  ;;  %4501 = vst [vmem:[#allocation4 + $0x188] sm:$0xff] %v8725_v25 }
 0x4e4   : > { %4502 = vst [vmem:[#allocation4 + $0x190] sm:$0xff] %v8728_v14  ;;  %4503 = vst [vmem:[#allocation4 + $0x198] sm:$0xff] %v8731_v51 }
 0x4e5   : > { %4504 = vst [vmem:[#allocation4 + $0x1a0] sm:$0xff] %v8734_v44  ;;  %4505 = vst [vmem:[#allocation4 + $0x1a8] sm:$0xff] %v8737_v38 }
 0x4e6   : > { %4506 = vst [vmem:[#allocation4 + $0x1b0] sm:$0xff] %v8740_v22  ;;  %4507 = vst [vmem:[#allocation4 + $0x1b8] sm:$0xff] %v8743_v23  ;;  %4518 = sbr.rel (%p5865_p0) target bundleno = 1284 (0x504), region = 68 }
 0x4e7   : > { %4508 = vst [vmem:[#allocation4 + $0x1c0] sm:$0xff] %v8746_v9  ;;  %4509 = vst [vmem:[#allocation4 + $0x1c8] sm:$0xff] %v8749_v35 }
 0x4e8   : > { %4510 = vst [vmem:[#allocation4 + $0x1d0] sm:$0xff] %v8752_v32  ;;  %4511 = vst [vmem:[#allocation4 + $0x1d8] sm:$0xff] %v8755_v15 }
 0x4e9   : > { %4512 = vst [vmem:[#allocation4 + $0x1e0] sm:$0xff] %v8758_v13  ;;  %4513 = vst [vmem:[#allocation4 + $0x1e8] sm:$0xff] %v8761_v63 }
 0x4ea   : > { %4514 = vst [vmem:[#allocation4 + $0x1f0] sm:$0xff] %v8764_v50  ;;  %4515 = vst [vmem:[#allocation4 + $0x1f8] sm:$0xff] %v8767_v46 }
 0x4eb   : > { %v9237_v39 = vld [vmem:[#allocation22_spill] sm:$0xff]  ;;  %v9238_v42 = vld [vmem:[#allocation23_spill] sm:$0xff]  ;;  %v9239_v52 = vld [vmem:[#allocation24_spill] sm:$0xff] }
 0x4ec   : > { %v6687_v53 = vpack.c.bf16 %v9238_v42, %v9237_v39  ;;  %v9240_v6 = vld [vmem:[#allocation25_spill] sm:$0xff]  ;;  %v9241_v24 = vld [vmem:[#allocation26_spill] sm:$0xff]  ;;  %v9242_v43 = vld [vmem:[#allocation27_spill] sm:$0xff] }
 0x4ed   : > { %v6692_v41 = vpack.c.bf16 %v9240_v6, %v9239_v52  ;;  %v6697_v40 = vpack.c.bf16 %v9242_v43, %v9241_v24  ;;  %v9243_v31 = vld [vmem:[#allocation28_spill] sm:$0xff]  ;;  %v9244_v8 = vld [vmem:[#allocation29_spill] sm:$0xff]  ;;  %v9245_v63 = vld [vmem:[#allocation30_spill] sm:$0xff] }
 0x4ee   : > { %v6702_v13 = vpack.c.bf16 %v9244_v8, %v9243_v31  ;;  %v9246_v15 = vld [vmem:[#allocation31_spill] sm:$0xff]  ;;  %v9247_v32 = vld [vmem:[#allocation32_spill] sm:$0xff]  ;;  %v9248_v46 = vld [vmem:[#allocation33_spill] sm:$0xff]  ;;  %6688 = vst [vmem:[#allocation2] sm:$0xff] %v6687_v53  }
 0x4ef   : > { %v6707_v50 = vpack.c.bf16 %v9246_v15, %v9245_v63  ;;  %v6712_v35 = vpack.c.bf16 %v9248_v46, %v9247_v32  ;;  %v9249_v9 = vld [vmem:[#allocation34_spill] sm:$0xff]  ;;  %v9250_v7 = vld [vmem:[#allocation35_spill] sm:$0xff]  ;;  %v9251_v22 = vld [vmem:[#allocation36_spill] sm:$0xff]  ;;  %7035 = vst [vmem:[#allocation2 + $0x8] sm:$0xff] %v6692_v41  }
 0x4f0   : > { %v6717_v23 = vpack.c.bf16 %v9250_v7, %v9249_v9  ;;  %v9252_v39 = vld [vmem:[#allocation37_spill] sm:$0xff]  ;;  %7036 = vst [vmem:[#allocation2 + $0x10] sm:$0xff] %v6697_v40   ;;  %7037 = vst [vmem:[#allocation2 + $0x18] sm:$0xff] %v6702_v13   ;;  %v9253_v52 = vld [vmem:[#allocation38_spill] sm:$0xff] }
 0x4f1   : > { %v6722_v42 = vpack.c.bf16 %v9252_v39, %v9251_v22  ;;  %v9254_v6 = vld [vmem:[#allocation39_spill] sm:$0xff]  ;;  %v9255_v43 = vld [vmem:[#allocation40_spill] sm:$0xff]  ;;  %v9256_v31 = vld [vmem:[#allocation41_spill] sm:$0xff]  ;;  %7038 = vst [vmem:[#allocation2 + $0x20] sm:$0xff] %v6707_v50  }
 0x4f2   : > { %v6727_v24 = vpack.c.bf16 %v9254_v6, %v9253_v52  ;;  %v6732_v8 = vpack.c.bf16 %v9256_v31, %v9255_v43  ;;  %v9257_v63 = vld [vmem:[#allocation42_spill] sm:$0xff]  ;;  %v9258_v15 = vld [vmem:[#allocation43_spill] sm:$0xff]  ;;  %v9259_v32 = vld [vmem:[#allocation44_spill] sm:$0xff]  ;;  %7039 = vst [vmem:[#allocation2 + $0x28] sm:$0xff] %v6712_v35  }
 0x4f3   : > { %v6737_v45 = vpack.c.bf16 %v9258_v15, %v9257_v63  ;;  %v9260_v46 = vld [vmem:[#allocation45_spill] sm:$0xff]  ;;  %7040 = vst [vmem:[#allocation2 + $0x30] sm:$0xff] %v6717_v23   ;;  %7041 = vst [vmem:[#allocation2 + $0x38] sm:$0xff] %v6722_v42   ;;  %v9261_v7 = vld [vmem:[#allocation46_spill] sm:$0xff] }
 0x4f4   : > { %v6742_v49 = vpack.c.bf16 %v9260_v46, %v9259_v32  ;;  %v9262_v22 = vld [vmem:[#allocation47_spill] sm:$0xff]  ;;  %v9263_v13 = vld [vmem:[#allocation48_spill] sm:$0xff]  ;;  %v9264_v53 = vld [vmem:[#allocation49_spill] sm:$0xff]  ;;  %7042 = vst [vmem:[#allocation2 + $0x40] sm:$0xff] %v6727_v24  }
 0x4f5   : > { %v6747_v9 = vpack.c.bf16 %v9262_v22, %v9261_v7  ;;  %v6752_v41 = vpack.c.bf16 %v9264_v53, %v9263_v13  ;;  %v9265_v40 = vld [vmem:[#allocation50_spill] sm:$0xff]  ;;  %v9266_v39 = vld [vmem:[#allocation51_spill] sm:$0xff]  ;;  %v9267_v6 = vld [vmem:[#allocation52_spill] sm:$0xff]  ;;  %7043 = vst [vmem:[#allocation2 + $0x48] sm:$0xff] %v6732_v8  }
 0x4f6   : > { %v6757_v52 = vpack.c.bf16 %v9266_v39, %v9265_v40  ;;  %v9268_v43 = vld [vmem:[#allocation53_spill] sm:$0xff]  ;;  %7044 = vst [vmem:[#allocation2 + $0x50] sm:$0xff] %v6737_v45   ;;  %7045 = vst [vmem:[#allocation2 + $0x58] sm:$0xff] %v6742_v49   ;;  %v9269_v50 = vld [vmem:[#allocation54_spill] sm:$0xff] }
 0x4f7   : > { %v6762_v31 = vpack.c.bf16 %v9268_v43, %v9267_v6  ;;  %v9270_v35 = vld [vmem:[#allocation55_spill] sm:$0xff]  ;;  %v9271_v42 = vld [vmem:[#allocation56_spill] sm:$0xff]  ;;  %v9272_v63 = vld [vmem:[#allocation57_spill] sm:$0xff]  ;;  %7046 = vst [vmem:[#allocation2 + $0x60] sm:$0xff] %v6747_v9  }
 0x4f8   : > { %v6767_v23 = vpack.c.bf16 %v9270_v35, %v9269_v50  ;;  %v6772_v15 = vpack.c.bf16 %v9272_v63, %v9271_v42  ;;  %v9273_v32 = vld [vmem:[#allocation58_spill] sm:$0xff]  ;;  %v9274_v46 = vld [vmem:[#allocation59_spill] sm:$0xff]  ;;  %v9275_v22 = vld [vmem:[#allocation61_spill] sm:$0xff]  ;;  %7047 = vst [vmem:[#allocation2 + $0x68] sm:$0xff] %v6752_v41  }
 0x4f9   : > { %v6777_v7 = vpack.c.bf16 %v9274_v46, %v9273_v32  ;;  %v9276_v13 = vld [vmem:[#allocation62_spill] sm:$0xff]  ;;  %7048 = vst [vmem:[#allocation2 + $0x70] sm:$0xff] %v6757_v52   ;;  %7049 = vst [vmem:[#allocation2 + $0x78] sm:$0xff] %v6762_v31   ;;  %v9277_v24 = vld [vmem:[#allocation63_spill] sm:$0xff] }
 0x4fa   : > { %v6782_v53 = vpack.c.bf16 %v9276_v13, %v9275_v22  ;;  %v9278_v8 = vld [vmem:[#allocation67_spill] sm:$0xff]  ;;  %v9279_v49 = vld [vmem:[#allocation68_spill] sm:$0xff]  ;;  %v9280_v40 = vld [vmem:[#allocation69_spill] sm:$0xff]  ;;  %7050 = vst [vmem:[#allocation2 + $0x80] sm:$0xff] %v6767_v23   ;;  %v6827_v23 = vpack.c.bf16 %v8686_v27, %v8684_v37 }
 0x4fb   : > { %v6787_v45 = vpack.c.bf16 %v9278_v8, %v9277_v24  ;;  %v6792_v39 = vpack.c.bf16 %v9280_v40, %v9279_v49  ;;  %v9281_v6 = vld [vmem:[#allocation73_spill] sm:$0xff]  ;;  %v9282_v43 = vld [vmem:[#allocation74_spill] sm:$0xff]  ;;  %v9283_v35 = vld [vmem:[#allocation75_spill] sm:$0xff]  ;;  %7051 = vst [vmem:[#allocation2 + $0x88] sm:$0xff] %v6772_v15   ;;  %v6832_v15 = vpack.c.bf16 %v8699_v47, %v8688_v26 }
 0x4fc   : > { %v6797_v50 = vpack.c.bf16 %v9282_v43, %v9281_v6  ;;  %v9284_v42 = vld [vmem:[#allocation79_spill] sm:$0xff]  ;;  %7052 = vst [vmem:[#allocation2 + $0x90] sm:$0xff] %v6777_v7   ;;  %7053 = vst [vmem:[#allocation2 + $0x98] sm:$0xff] %v6782_v53   ;;  %v9285_v9 = vld [vmem:[#allocation80_spill] sm:$0xff]  ;;  %v6837_v7 = vpack.c.bf16 %v8703_v61, %v8701_v60  ;;  %v6842_v53 = vpack.c.bf16 %v8716_v5, %v8714_v4 }
 0x4fd   : > { %v6802_v63 = vpack.c.bf16 %v9284_v42, %v9283_v35  ;;  %v9286_v41 = vld [vmem:[#allocation81_spill] sm:$0xff]  ;;  %v9288_v46 = vld [vmem:[#allocation86_spill] sm:$0xff]  ;;  %v9290_v24 = vld [vmem:[#allocation91_spill] sm:$0xff]  ;;  %7054 = vst [vmem:[#allocation2 + $0xa0] sm:$0xff] %v6787_v45  }
 0x4fe   : > { %v6807_v52 = vpack.c.bf16 %v9286_v41, %v9285_v9  ;;  %v9287_v31 = vld [vmem:[#allocation85_spill] sm:$0xff]  ;;  %v9289_v22 = vld [vmem:[#allocation90_spill] sm:$0xff]  ;;  %v6822_v8 = vpack.c.bf16 %v9290_v24, %v8671_v0  ;;  %7055 = vst [vmem:[#allocation2 + $0xa8] sm:$0xff] %v6792_v39   ;;  %7056 = vst [vmem:[#allocation2 + $0xb0] sm:$0xff] %v6797_v50  }
 0x4ff   : > { %v6812_v32 = vpack.c.bf16 %v8656_v33, %v9287_v31  ;;  %v6817_v13 = vpack.c.bf16 %v9289_v22, %v9288_v46  ;;  %7057 = vst [vmem:[#allocation2 + $0xb8] sm:$0xff] %v6802_v63   ;;  %7062 = vst [vmem:[#allocation2 + $0xe0] sm:$0xff] %v6827_v23  }
 0x500   : > { %7058 = vst [vmem:[#allocation2 + $0xc0] sm:$0xff] %v6807_v52   ;;  %7061 = vst [vmem:[#allocation2 + $0xd8] sm:$0xff] %v6822_v8  }
 0x501   : > { %7059 = vst [vmem:[#allocation2 + $0xc8] sm:$0xff] %v6812_v32   ;;  %7060 = vst [vmem:[#allocation2 + $0xd0] sm:$0xff] %v6817_v13  }
 0x502   : > { %7063 = vst [vmem:[#allocation2 + $0xe8] sm:$0xff] %v6832_v15   ;;  %7064 = vst [vmem:[#allocation2 + $0xf0] sm:$0xff] %v6837_v7  }
 0x503   : > { %7065 = vst [vmem:[#allocation2 + $0xf8] sm:$0xff] %v6842_v53  }
 0x504 PF: > { %4845 = sbr.rel (%p6026_p3) target bundleno = 1314 (0x522), region = 72 }
 0x509   : > { %v9291_v45 = vld [vmem:[#allocation22_spill] sm:$0xff]  ;;  %v9292_v49 = vld [vmem:[#allocation23_spill] sm:$0xff]  ;;  %v9293_v39 = vld [vmem:[#allocation24_spill] sm:$0xff] }
 0x50a   : > { %v6847_v40 = vpack.c.bf16 %v9292_v49, %v9291_v45  ;;  %v9294_v6 = vld [vmem:[#allocation25_spill] sm:$0xff]  ;;  %v9295_v50 = vld [vmem:[#allocation26_spill] sm:$0xff]  ;;  %v9296_v35 = vld [vmem:[#allocation27_spill] sm:$0xff] }
 0x50b   : > { %v6852_v43 = vpack.c.bf16 %v9294_v6, %v9293_v39  ;;  %v6857_v42 = vpack.c.bf16 %v9296_v35, %v9295_v50  ;;  %v9297_v63 = vld [vmem:[#allocation28_spill] sm:$0xff]  ;;  %v9298_v9 = vld [vmem:[#allocation29_spill] sm:$0xff]  ;;  %v9299_v52 = vld [vmem:[#allocation30_spill] sm:$0xff] }
 0x50c   : > { %v6862_v41 = vpack.c.bf16 %v9298_v9, %v9297_v63  ;;  %v9300_v31 = vld [vmem:[#allocation31_spill] sm:$0xff]  ;;  %v9301_v46 = vld [vmem:[#allocation32_spill] sm:$0xff]  ;;  %v9302_v22 = vld [vmem:[#allocation33_spill] sm:$0xff]  ;;  %6848 = vst [vmem:[#allocation3] sm:$0xff] %v6847_v40  }
 0x50d   : > { %v6867_v32 = vpack.c.bf16 %v9300_v31, %v9299_v52  ;;  %v6872_v13 = vpack.c.bf16 %v9302_v22, %v9301_v46  ;;  %v9303_v24 = vld [vmem:[#allocation34_spill] sm:$0xff]  ;;  %v9304_v8 = vld [vmem:[#allocation35_spill] sm:$0xff]  ;;  %v9305_v15 = vld [vmem:[#allocation36_spill] sm:$0xff]  ;;  %7066 = vst [vmem:[#allocation3 + $0x8] sm:$0xff] %v6852_v43  }
 0x50e   : > { %v6877_v23 = vpack.c.bf16 %v9304_v8, %v9303_v24  ;;  %v9306_v7 = vld [vmem:[#allocation37_spill] sm:$0xff]  ;;  %7067 = vst [vmem:[#allocation3 + $0x10] sm:$0xff] %v6857_v42   ;;  %7068 = vst [vmem:[#allocation3 + $0x18] sm:$0xff] %v6862_v41   ;;  %v9307_v45 = vld [vmem:[#allocation38_spill] sm:$0xff] }
 0x50f   : > { %v6882_v53 = vpack.c.bf16 %v9306_v7, %v9305_v15  ;;  %v9308_v49 = vld [vmem:[#allocation39_spill] sm:$0xff]  ;;  %v9309_v6 = vld [vmem:[#allocation40_spill] sm:$0xff]  ;;  %v9310_v50 = vld [vmem:[#allocation41_spill] sm:$0xff]  ;;  %7069 = vst [vmem:[#allocation3 + $0x20] sm:$0xff] %v6867_v32  }
 0x510   : > { %v6887_v39 = vpack.c.bf16 %v9308_v49, %v9307_v45  ;;  %v6892_v35 = vpack.c.bf16 %v9310_v50, %v9309_v6  ;;  %v9311_v63 = vld [vmem:[#allocation42_spill] sm:$0xff]  ;;  %v9312_v9 = vld [vmem:[#allocation43_spill] sm:$0xff]  ;;  %v9313_v31 = vld [vmem:[#allocation44_spill] sm:$0xff]  ;;  %7070 = vst [vmem:[#allocation3 + $0x28] sm:$0xff] %v6872_v13  }
 0x511   : > { %v6897_v52 = vpack.c.bf16 %v9312_v9, %v9311_v63  ;;  %v9314_v46 = vld [vmem:[#allocation45_spill] sm:$0xff]  ;;  %7071 = vst [vmem:[#allocation3 + $0x30] sm:$0xff] %v6877_v23   ;;  %7072 = vst [vmem:[#allocation3 + $0x38] sm:$0xff] %v6882_v53   ;;  %v9315_v40 = vld [vmem:[#allocation46_spill] sm:$0xff] }
 0x512   : > { %v6902_v22 = vpack.c.bf16 %v9314_v46, %v9313_v31  ;;  %v9316_v43 = vld [vmem:[#allocation47_spill] sm:$0xff]  ;;  %v9317_v41 = vld [vmem:[#allocation48_spill] sm:$0xff]  ;;  %v9318_v24 = vld [vmem:[#allocation49_spill] sm:$0xff]  ;;  %7073 = vst [vmem:[#allocation3 + $0x40] sm:$0xff] %v6887_v39  }
 0x513   : > { %v6907_v42 = vpack.c.bf16 %v9316_v43, %v9315_v40  ;;  %v6912_v8 = vpack.c.bf16 %v9318_v24, %v9317_v41  ;;  %v9319_v15 = vld [vmem:[#allocation50_spill] sm:$0xff]  ;;  %v9320_v7 = vld [vmem:[#allocation51_spill] sm:$0xff]  ;;  %v9321_v49 = vld [vmem:[#allocation52_spill] sm:$0xff]  ;;  %7074 = vst [vmem:[#allocation3 + $0x48] sm:$0xff] %v6892_v35  }
 0x514   : > { %v6917_v45 = vpack.c.bf16 %v9320_v7, %v9319_v15  ;;  %v9322_v6 = vld [vmem:[#allocation53_spill] sm:$0xff]  ;;  %7075 = vst [vmem:[#allocation3 + $0x50] sm:$0xff] %v6897_v52   ;;  %7076 = vst [vmem:[#allocation3 + $0x58] sm:$0xff] %v6902_v22   ;;  %v9323_v32 = vld [vmem:[#allocation54_spill] sm:$0xff] }
 0x515   : > { %v6922_v50 = vpack.c.bf16 %v9322_v6, %v9321_v49  ;;  %v9324_v13 = vld [vmem:[#allocation55_spill] sm:$0xff]  ;;  %v9325_v53 = vld [vmem:[#allocation56_spill] sm:$0xff]  ;;  %v9326_v63 = vld [vmem:[#allocation57_spill] sm:$0xff]  ;;  %7077 = vst [vmem:[#allocation3 + $0x60] sm:$0xff] %v6907_v42  }
 0x516   : > { %v6927_v23 = vpack.c.bf16 %v9324_v13, %v9323_v32  ;;  %v6932_v9 = vpack.c.bf16 %v9326_v63, %v9325_v53  ;;  %v9327_v31 = vld [vmem:[#allocation58_spill] sm:$0xff]  ;;  %v9328_v46 = vld [vmem:[#allocation59_spill] sm:$0xff]  ;;  %v9329_v43 = vld [vmem:[#allocation61_spill] sm:$0xff]  ;;  %7078 = vst [vmem:[#allocation3 + $0x68] sm:$0xff] %v6912_v8  }
 0x517   : > { %v6937_v40 = vpack.c.bf16 %v9328_v46, %v9327_v31  ;;  %v9330_v41 = vld [vmem:[#allocation62_spill] sm:$0xff]  ;;  %7079 = vst [vmem:[#allocation3 + $0x70] sm:$0xff] %v6917_v45   ;;  %7080 = vst [vmem:[#allocation3 + $0x78] sm:$0xff] %v6922_v50   ;;  %v9331_v39 = vld [vmem:[#allocation63_spill] sm:$0xff] }
 0x518   : > { %v6942_v24 = vpack.c.bf16 %v9330_v41, %v9329_v43  ;;  %v9332_v35 = vld [vmem:[#allocation67_spill] sm:$0xff]  ;;  %v9333_v22 = vld [vmem:[#allocation68_spill] sm:$0xff]  ;;  %v9334_v15 = vld [vmem:[#allocation69_spill] sm:$0xff]  ;;  %7081 = vst [vmem:[#allocation3 + $0x80] sm:$0xff] %v6927_v23   ;;  %v6987_v23 = vpack.c.bf16 %v8686_v27, %v8684_v37 }
 0x519   : > { %v6947_v52 = vpack.c.bf16 %v9332_v35, %v9331_v39  ;;  %v6952_v7 = vpack.c.bf16 %v9334_v15, %v9333_v22  ;;  %v9335_v49 = vld [vmem:[#allocation73_spill] sm:$0xff]  ;;  %v9336_v6 = vld [vmem:[#allocation74_spill] sm:$0xff]  ;;  %v9337_v13 = vld [vmem:[#allocation75_spill] sm:$0xff]  ;;  %7082 = vst [vmem:[#allocation3 + $0x88] sm:$0xff] %v6932_v9   ;;  %v6992_v9 = vpack.c.bf16 %v8699_v47, %v8688_v26 }
 0x51a   : > { %v6957_v32 = vpack.c.bf16 %v9336_v6, %v9335_v49  ;;  %v9338_v53 = vld [vmem:[#allocation79_spill] sm:$0xff]  ;;  %7083 = vst [vmem:[#allocation3 + $0x90] sm:$0xff] %v6937_v40   ;;  %7084 = vst [vmem:[#allocation3 + $0x98] sm:$0xff] %v6942_v24   ;;  %v9339_v42 = vld [vmem:[#allocation80_spill] sm:$0xff]  ;;  %v6997_v40 = vpack.c.bf16 %v8703_v61, %v8701_v60 }
 0x51b   : > { %v6962_v63 = vpack.c.bf16 %v9338_v53, %v9337_v13  ;;  %v9340_v8 = vld [vmem:[#allocation81_spill] sm:$0xff]  ;;  %v9342_v46 = vld [vmem:[#allocation86_spill] sm:$0xff]  ;;  %v9344_v39 = vld [vmem:[#allocation91_spill] sm:$0xff]  ;;  %7085 = vst [vmem:[#allocation3 + $0xa0] sm:$0xff] %v6947_v52  }
 0x51c   : > { %v6967_v45 = vpack.c.bf16 %v9340_v8, %v9339_v42  ;;  %v9341_v50 = vld [vmem:[#allocation85_spill] sm:$0xff]  ;;  %v9343_v43 = vld [vmem:[#allocation90_spill] sm:$0xff]  ;;  %v6982_v35 = vpack.c.bf16 %v9344_v39, %v8671_v0  ;;  %7086 = vst [vmem:[#allocation3 + $0xa8] sm:$0xff] %v6952_v7   ;;  %7087 = vst [vmem:[#allocation3 + $0xb0] sm:$0xff] %v6957_v32  }
 0x51d   : > { %v6972_v31 = vpack.c.bf16 %v8656_v33, %v9341_v50  ;;  %v6977_v41 = vpack.c.bf16 %v9343_v43, %v9342_v46  ;;  %7088 = vst [vmem:[#allocation3 + $0xb8] sm:$0xff] %v6962_v63   ;;  %v7002_v33 = vpack.c.bf16 %v8716_v5, %v8714_v4  ;;  %7093 = vst [vmem:[#allocation3 + $0xe0] sm:$0xff] %v6987_v23  }
 0x51e   : > { %7089 = vst [vmem:[#allocation3 + $0xc0] sm:$0xff] %v6967_v45   ;;  %7092 = vst [vmem:[#allocation3 + $0xd8] sm:$0xff] %v6982_v35  }
 0x51f   : > { %7090 = vst [vmem:[#allocation3 + $0xc8] sm:$0xff] %v6972_v31   ;;  %7091 = vst [vmem:[#allocation3 + $0xd0] sm:$0xff] %v6977_v41  }
 0x520   : > { %7094 = vst [vmem:[#allocation3 + $0xe8] sm:$0xff] %v6992_v9   ;;  %7095 = vst [vmem:[#allocation3 + $0xf0] sm:$0xff] %v6997_v40  }
 0x521   : > { %7096 = vst [vmem:[#allocation3 + $0xf8] sm:$0xff] %v7002_v33  }
 0x522 PF: > { %p6318_p7 = scmp.ne.s32.totalorder %s7909_s15, 1 }
 0x523   : > { %s7929_s15 = smov (!%p6318_p7), [#allocation6]  }
 0x524   : > { %5173 = sbr.rel (%p6318_p7) target bundleno = 1616 (0x650), region = 76  ;;  %s5697_s26 = sshll.u32 (!%p6318_p7), %s7929_s15, 4  ;;  %s5698_s26 = int_to_ptr.vmem [resolvable:$true] %s5697_s26 }
 0x525   : > { %s7839_s27 = scalar_lea.vmem (!%p6318_p7), %s5698_s26, 8192  ;;  %p7844_p9 = scmp.lt.s32.totalorder (!%p6318_p7), %s5698_s26, %s5698_s26 }
 0x526   : > { %p7840_p8 = scmp.ne.s32.totalorder (!%p6318_p7), %s5698_s26, %s7839_s27  ;;  %p7845_p2 = scmp.lt.s32.totalorder (!%p6318_p7), %s7839_s27, %s7839_s27 }
 0x528   : > { %p7846_p10 = por (!%p6318_p7), %p7845_p2, %p7844_p9 }
 0x529   : > { %v7757_v0 = vld [vmem:[#allocation10 + $0x38] sm:$0xff]   ;;  %v7758_v26 = vld [vmem:[#allocation10 + $0x30] sm:$0xff]   ;;  %v5174_v60 = vpack.c.bf16 %v8487_v58, %v8484_v57  ;;  %v9345_v61 = vld [vmem:[#allocation82_spill] sm:$0xff]  ;;  %v5175_v52 = vpack.c.bf16 %v8499_v2, %v8496_v1  ;;  %v5176_v49 = vpack.c.bf16 %v8511_v10, %v8502_v3  ;;  %v5177_v53 = vpack.c.bf16 %v8517_v12, %v8514_v11 }
 0x52a   : > { %v9346_v5 = vld [vmem:[#allocation83_spill] sm:$0xff]  ;;  %7137 = vmatprep.subr.bf16.mxu0 %v7757_v0  ;;  %7217 = vmatprep.subr.bf16.mxu1 %v7757_v0  ;;  %v7760_v47 = vld [vmem:[#allocation10 + $0x20] sm:$0xff]   ;;  %v7761_v57 = vld [vmem:[#allocation10 + $0x18] sm:$0xff]   ;;  %v5178_v42 = vpack.c.bf16 %v8529_v20, %v8526_v19  ;;  %v5179_v3 = vpack.c.bf16 %v8541_v28, %v8532_v21  ;;  %v5180_v11 = vpack.c.bf16 %v8547_v30, %v8544_v29  ;;  %p7847_p5 = pnand %p7846_p10, %p7840_p8 }
 0x52b   : > { %v5190_v27 = vpack.c.bf16 %v9346_v5, %v9345_v61  ;;  %7138 = vmatpush3.bf16.msra.mxu0 %v7757_v0  ;;  %7225 = vmatpush3.bf16.msra.mxu1 %v7757_v0  ;;  %v7759_v37 = vld [vmem:[#allocation10 + $0x28] sm:$0xff]   ;;  %v7762_v58 = vld [vmem:[#allocation10 + $0x10] sm:$0xff]   ;;  %v7764_v24 = vld [vmem:[#allocation10] sm:$0xff]   ;;  %v5196_v12 = vpack.c.bf16 %v8709_v62, %v8706_v36  ;;  %v5181_v19 = vpack.c.bf16 %v8559_v55, %v8556_v54 }
 0x52c   : > { %7139 = vmatprep.subr.bf16.mxu0 %v7758_v26  ;;  %7218 = vmatprep.subr.bf16.mxu1 %v7758_v26  ;;  %v7763_v4 = vld [vmem:[#allocation10 + $0x8] sm:$0xff]   ;;  %v9347_v22 = vld [vmem:[#allocation84_spill] sm:$0xff]  ;;  %v9350_v32 = vld [vmem:[#allocation89_spill] sm:$0xff]  ;;  %v5182_v21 = vpack.c.bf16 %v8571_v16, %v8562_v56  ;;  %v5198_v28 = vpack.c.bf16 %v8725_v25, %v8722_v59  ;;  %v5183_v36 = vpack.c.bf16 %v8577_v18, %v8574_v17 }
 0x52d   : > { %7153 = vmatprep.mubr.bf16.mxu0 %v5174_v60  ;;  %7185 = vmatprep.mubr.bf16.mxu1 %v5190_v27  ;;  %v9348_v15 = vld [vmem:[#allocation87_spill] sm:$0xff]  ;;  %v9349_v6 = vld [vmem:[#allocation88_spill] sm:$0xff]  ;;  %v9352_v1 = vld [vmem:[#allocation93_spill] sm:$0xff]  ;;  %v5199_v29 = vpack.c.bf16 %v8731_v51, %v8728_v14  ;;  %v5184_v30 = vpack.c.bf16 %v8589_v34, %v8586_v48  ;;  %v5200_v54 = vpack.c.bf16 %v8737_v38, %v8734_v44 }
 0x52e   : > { %v5191_v7 = vpack.c.bf16 %v9348_v15, %v9347_v22  ;;  %v5192_v13 = vpack.c.bf16 %v9350_v32, %v9349_v6  ;;  %v9351_v63 = vld [vmem:[#allocation92_spill] sm:$0xff]  ;;  %v9353_v8 = vld [vmem:[#allocation94_spill] sm:$0xff]  ;;  %v9354_v45 = vld [vmem:[#allocation95_spill] sm:$0xff] }
 0x52f   : > { %7140 = vmatpush3.bf16.msra.mxu0 %v7758_v26  ;;  %7226 = vmatpush3.bf16.msra.mxu1 %v7758_v26  ;;  %v5193_v2 = vpack.c.bf16 %v9352_v1, %v9351_v63  ;;  %v5194_v50 = vpack.c.bf16 %v9354_v45, %v9353_v8  ;;  %v9355_v10 = vld [vmem:[#allocation96_spill] sm:$0xff]  ;;  %v9356_v31 = vld [vmem:[#allocation97_spill] sm:$0xff]  ;;  %v9357_v20 = vld [vmem:[#allocation98_spill] sm:$0xff] }
 0x530   : > { %7141 = vmatprep.subr.bf16.mxu0 %v7759_v37  ;;  %7219 = vmatprep.subr.bf16.mxu1 %v7759_v37  ;;  %v5195_v46 = vpack.c.bf16 %v9356_v31, %v9355_v10  ;;  %v9358_v43 = vld [vmem:[#allocation99_spill] sm:$0xff]  ;;  %v9359_v55 = vld [vmem:[#allocation60_spill] sm:$0xff]  ;;  %v9362_v62 = vld [vmem:[#allocation101_spill] sm:$0xff] }
 0x531   : > { %v5197_v41 = vpack.c.bf16 %v9358_v43, %v9357_v20  ;;  %v9360_v56 = vld [vmem:[#allocation64_spill] sm:$0xff]  ;;  %v9363_v17 = vld [vmem:[#allocation65_spill] sm:$0xff]  ;;  %v9364_v18 = vld [vmem:[#allocation66_spill] sm:$0xff] }
 0x532   : > { %v5185_v16 = vpack.c.bf16 %v9360_v56, %v9359_v55  ;;  %v9361_v59 = vld [vmem:[#allocation100_spill] sm:$0xff]  ;;  %v5186_v39 = vpack.c.bf16 %v9364_v18, %v9363_v17  ;;  %v9365_v14 = vld [vmem:[#allocation102_spill] sm:$0xff]  ;;  %v9366_v51 = vld [vmem:[#allocation103_spill] sm:$0xff] }
 0x533   : > { %7142 = vmatpush3.bf16.msra.mxu0 %v7759_v37  ;;  %7227 = vmatpush3.bf16.msra.mxu1 %v7759_v37  ;;  %v5201_v25 = vpack.c.bf16 %v9362_v62, %v9361_v59  ;;  %v5202_v35 = vpack.c.bf16 %v9366_v51, %v9365_v14  ;;  %v9367_v48 = vld [vmem:[#allocation70_spill] sm:$0xff]  ;;  %v9368_v34 = vld [vmem:[#allocation71_spill] sm:$0xff]  ;;  %v9369_v38 = vld [vmem:[#allocation104_spill] sm:$0xff] }
 0x534   : > { %7143 = vmatprep.subr.bf16.mxu0 %v7760_v47  ;;  %7220 = vmatprep.subr.bf16.mxu1 %v7760_v47  ;;  %v5187_v44 = vpack.c.bf16 %v9368_v34, %v9367_v48  ;;  %v9370_v23 = vld [vmem:[#allocation105_spill] sm:$0xff]  ;;  %v9371_v40 = vld [vmem:[#allocation72_spill] sm:$0xff]  ;;  %v9373_v26 = vld [vmem:[#allocation106_spill] sm:$0xff] }
 0x535   : > { %v5203_v9 = vpack.c.bf16 %v9370_v23, %v9369_v38  ;;  %v9372_v33 = vld [vmem:[#allocation76_spill] sm:$0xff]  ;;  %v9374_v60 = vld [vmem:[#allocation107_spill] sm:$0xff]  ;;  %v9375_v5 = vld [vmem:[#allocation77_spill] sm:$0xff] }
 0x536   : > { %v5188_v0 = vpack.c.bf16 %v9372_v33, %v9371_v40  ;;  %v5204_v61 = vpack.c.bf16 %v9374_v60, %v9373_v26  ;;  %v9376_v27 = vld [vmem:[#allocation78_spill] sm:$0xff] }
 0x537   : > { %7144 = vmatpush3.bf16.msra.mxu0 %v7760_v47  ;;  %7228 = vmatpush3.bf16.msra.mxu1 %v7760_v47  ;;  %v5189_v37 = vpack.c.bf16 %v9376_v27, %v9375_v5  ;;  %v9377_v47 = vld [vmem:[#allocation108_spill] sm:$0xff] }
 0x538   : > { %7145 = vmatprep.subr.bf16.mxu0 %v7761_v57  ;;  %7221 = vmatprep.subr.bf16.mxu1 %v7761_v57 }
 0x53b   : > { %7146 = vmatpush3.bf16.msra.mxu0 %v7761_v57  ;;  %7229 = vmatpush3.bf16.msra.mxu1 %v7761_v57  ;;  %v9378_v57 = vld [vmem:[#allocation109_spill] sm:$0xff] }
 0x53c   : > { %7147 = vmatprep.subr.bf16.mxu0 %v7762_v58  ;;  %7222 = vmatprep.subr.bf16.mxu1 %v7762_v58 }
 0x53f   : > { %7148 = vmatpush3.bf16.msra.mxu0 %v7762_v58  ;;  %7230 = vmatpush3.bf16.msra.mxu1 %v7762_v58  ;;  %v5205_v58 = vpack.c.bf16 %v9378_v57, %v9377_v47 }
 0x540   : > { %7149 = vmatprep.subr.bf16.mxu0 %v7763_v4  ;;  %7223 = vmatprep.subr.bf16.mxu1 %v7763_v4 }
 0x543   : > { %7150 = vmatpush3.bf16.msra.mxu0 %v7763_v4  ;;  %7231 = vmatpush3.bf16.msra.mxu1 %v7763_v4 }
 0x544   : > { %7151 = vmatprep.subr.bf16.mxu0 %v7764_v24  ;;  %7224 = vmatprep.subr.bf16.mxu1 %v7764_v24 }
 0x547   : > { %7152 = vmatpush3.bf16.msra.mxu0 %v7764_v24  ;;  %7232 = vmatpush3.bf16.msra.mxu1 %v7764_v24 }
 0x54a   : > { %7154 = vmatmul.mubr.bf16.vlgmr.msra.gmra.mxu0 %v5175_v52  ;;  %7186 = vmatmul.mubr.bf16.vlgmr.msra.gmra.mxu1 %v5191_v7 }
 0x54b   : > { %7157 = vmatprep.mubr.bf16.mxu0 %v5176_v49  ;;  %7189 = vmatprep.mubr.bf16.mxu1 %v5192_v13 }
 0x552   : > { %7158 = vmatmul.mubr.bf16.gmra.mxu0 %v5177_v53  ;;  %7190 = vmatmul.mubr.bf16.gmra.mxu1 %v5193_v2 }
 0x553   : > { %7161 = vmatprep.mubr.bf16.mxu0 %v5178_v42  ;;  %7193 = vmatprep.mubr.bf16.mxu1 %v5194_v50 }
 0x55a   : > { %7162 = vmatmul.mubr.bf16.gmra.mxu0 %v5179_v3  ;;  %7194 = vmatmul.mubr.bf16.gmra.mxu1 %v5195_v46 }
 0x55b   : > { %7165 = vmatprep.mubr.bf16.mxu0 %v5180_v11  ;;  %7197 = vmatprep.mubr.bf16.mxu1 %v5196_v12 }
 0x562   : > { %7166 = vmatmul.mubr.bf16.gmra.mxu0 %v5181_v19  ;;  %7198 = vmatmul.mubr.bf16.gmra.mxu1 %v5197_v41 }
 0x563   : > { %7169 = vmatprep.mubr.bf16.mxu0 %v5182_v21  ;;  %7201 = vmatprep.mubr.bf16.mxu1 %v5198_v28 }
 0x56a   : > { %7170 = vmatmul.mubr.bf16.gmra.mxu0 %v5183_v36  ;;  %7202 = vmatmul.mubr.bf16.gmra.mxu1 %v5199_v29 }
 0x56b   : > { %7173 = vmatprep.mubr.bf16.mxu0 %v5184_v30  ;;  %7205 = vmatprep.mubr.bf16.mxu1 %v5200_v54 }
 0x572   : > { %7174 = vmatmul.mubr.bf16.gmra.mxu0 %v5185_v16  ;;  %7206 = vmatmul.mubr.bf16.gmra.mxu1 %v5201_v25 }
 0x573   : > { %7177 = vmatprep.mubr.bf16.mxu0 %v5186_v39  ;;  %7209 = vmatprep.mubr.bf16.mxu1 %v5202_v35 }
 0x57a   : > { %7178 = vmatmul.mubr.bf16.gmra.mxu0 %v5187_v44  ;;  %7210 = vmatmul.mubr.bf16.gmra.mxu1 %v5203_v9 }
 0x57b   : > { %7181 = vmatprep.mubr.bf16.mxu0 %v5188_v0  ;;  %7213 = vmatprep.mubr.bf16.mxu1 %v5204_v61 }
 0x582   : > { %7182 = vmatmul.mubr.bf16.gmra.mxu0 %v5189_v37  ;;  %7214 = vmatmul.mubr.bf16.gmra.mxu1 %v5205_v58 }
 0x60a   : > { %v7155_v4 = vpop.f32.mrf.mxu0  ;;  %v7187_v24 = vpop.f32.mrf.mxu1 }
 0x60b   : > { %v5561_v52 = vmax.f32 %v7155_v4, 0.0  ;;  %v5593_v22 = vmax.f32 %v7187_v24, 0.0 }
 0x60c   : > { %v5304_v15 = vpop.f32.mrf.mxu0  ;;  %v5432_v7 = vpop.f32.mrf.mxu1 }
 0x60d   : > { %5625 = vst [vmem:[#allocation6 + $0x10] sm:$0xff] %v5561_v52  ;;  %5657 = vst [vmem:[#allocation6 + $0x110] sm:$0xff] %v5593_v22  ;;  %v5559_v49 = vmax.f32 %v5304_v15, 0.0  ;;  %v5591_v6 = vmax.f32 %v5432_v7, 0.0 }
 0x60e   : > { %v7156_v32 = vpop.f32.mrf.mxu0  ;;  %v7188_v13 = vpop.f32.mrf.mxu1 }
 0x60f   : > { %5623 = vst [vmem:[#allocation6] sm:$0xff] %v5559_v49  ;;  %5655 = vst [vmem:[#allocation6 + $0x100] sm:$0xff] %v5591_v6  ;;  %v5562_v53 = vmax.f32 %v7156_v32, 0.0  ;;  %v5594_v63 = vmax.f32 %v7188_v13, 0.0 }
 0x610   : > { %v5307_v1 = vpop.f32.mrf.mxu0  ;;  %v5435_v2 = vpop.f32.mrf.mxu1 }
 0x611   : > { %5626 = vst [vmem:[#allocation6 + $0x18] sm:$0xff] %v5562_v53  ;;  %5658 = vst [vmem:[#allocation6 + $0x118] sm:$0xff] %v5594_v63  ;;  %v5560_v42 = vmax.f32 %v5307_v1, 0.0  ;;  %v5592_v8 = vmax.f32 %v5435_v2, 0.0 }
 0x612   : > { %v7159_v45 = vpop.f32.mrf.mxu0  ;;  %v7191_v50 = vpop.f32.mrf.mxu1 }
 0x613   : > { %5624 = vst [vmem:[#allocation6 + $0x8] sm:$0xff] %v5560_v42  ;;  %5656 = vst [vmem:[#allocation6 + $0x108] sm:$0xff] %v5592_v8  ;;  %v5565_v3 = vmax.f32 %v7159_v45, 0.0  ;;  %v5597_v10 = vmax.f32 %v7191_v50, 0.0 }
 0x614   : > { %v5320_v31 = vpop.f32.mrf.mxu0  ;;  %v5448_v46 = vpop.f32.mrf.mxu1 }
 0x615   : > { %5629 = vst [vmem:[#allocation6 + $0x30] sm:$0xff] %v5565_v3  ;;  %5661 = vst [vmem:[#allocation6 + $0x130] sm:$0xff] %v5597_v10  ;;  %v5563_v11 = vmax.f32 %v5320_v31, 0.0  ;;  %v5595_v12 = vmax.f32 %v5448_v46, 0.0 }
 0x616   : > { %v7160_v19 = vpop.f32.mrf.mxu0  ;;  %v7192_v20 = vpop.f32.mrf.mxu1 }
 0x617   : > { %5627 = vst [vmem:[#allocation6 + $0x20] sm:$0xff] %v5563_v11  ;;  %5659 = vst [vmem:[#allocation6 + $0x120] sm:$0xff] %v5595_v12  ;;  %v5566_v43 = vmax.f32 %v7160_v19, 0.0  ;;  %v5598_v41 = vmax.f32 %v7192_v20, 0.0 }
 0x618   : > { %v5323_v21 = vpop.f32.mrf.mxu0  ;;  %v5451_v28 = vpop.f32.mrf.mxu1 }
 0x619   : > { %5630 = vst [vmem:[#allocation6 + $0x38] sm:$0xff] %v5566_v43  ;;  %5662 = vst [vmem:[#allocation6 + $0x138] sm:$0xff] %v5598_v41  ;;  %v5564_v36 = vmax.f32 %v5323_v21, 0.0  ;;  %v5596_v29 = vmax.f32 %v5451_v28, 0.0 }
 0x61a   : > { %v7163_v30 = vpop.f32.mrf.mxu0  ;;  %v7195_v54 = vpop.f32.mrf.mxu1 }
 0x61b   : > { %5628 = vst [vmem:[#allocation6 + $0x28] sm:$0xff] %v5564_v36  ;;  %5660 = vst [vmem:[#allocation6 + $0x128] sm:$0xff] %v5596_v29  ;;  %v5569_v55 = vmax.f32 %v7163_v30, 0.0  ;;  %v5601_v56 = vmax.f32 %v7195_v54, 0.0 }
 0x61c   : > { %v5336_v16 = vpop.f32.mrf.mxu0  ;;  %v5464_v59 = vpop.f32.mrf.mxu1 }
 0x61d   : > { %5633 = vst [vmem:[#allocation6 + $0x50] sm:$0xff] %v5569_v55  ;;  %5665 = vst [vmem:[#allocation6 + $0x150] sm:$0xff] %v5601_v56  ;;  %v5567_v62 = vmax.f32 %v5336_v16, 0.0  ;;  %v5599_v25 = vmax.f32 %v5464_v59, 0.0 }
 0x61e   : > { %v7164_v17 = vpop.f32.mrf.mxu0  ;;  %v7196_v18 = vpop.f32.mrf.mxu1 }
 0x61f   : > { %5631 = vst [vmem:[#allocation6 + $0x40] sm:$0xff] %v5567_v62  ;;  %5663 = vst [vmem:[#allocation6 + $0x140] sm:$0xff] %v5599_v25  ;;  %v5570_v39 = vmax.f32 %v7164_v17, 0.0  ;;  %v5602_v14 = vmax.f32 %v7196_v18, 0.0 }
 0x620   : > { %v5339_v51 = vpop.f32.mrf.mxu0  ;;  %v5467_v35 = vpop.f32.mrf.mxu1 }
 0x621   : > { %5634 = vst [vmem:[#allocation6 + $0x58] sm:$0xff] %v5570_v39  ;;  %5666 = vst [vmem:[#allocation6 + $0x158] sm:$0xff] %v5602_v14  ;;  %v5568_v48 = vmax.f32 %v5339_v51, 0.0  ;;  %v5600_v34 = vmax.f32 %v5467_v35, 0.0 }
 0x622   : > { %v7167_v44 = vpop.f32.mrf.mxu0  ;;  %v7199_v38 = vpop.f32.mrf.mxu1 }
 0x623   : > { %5632 = vst [vmem:[#allocation6 + $0x48] sm:$0xff] %v5568_v48  ;;  %5664 = vst [vmem:[#allocation6 + $0x148] sm:$0xff] %v5600_v34  ;;  %v5573_v23 = vmax.f32 %v7167_v44, 0.0  ;;  %v5605_v9 = vmax.f32 %v7199_v38, 0.0 }
 0x624   : > { %v5352_v40 = vpop.f32.mrf.mxu0  ;;  %v5480_v33 = vpop.f32.mrf.mxu1 }
 0x625   : > { %5637 = vst [vmem:[#allocation6 + $0x70] sm:$0xff] %v5573_v23  ;;  %5669 = vst [vmem:[#allocation6 + $0x170] sm:$0xff] %v5605_v9  ;;  %v5571_v0 = vmax.f32 %v5352_v40, 0.0  ;;  %v5603_v26 = vmax.f32 %v5480_v33, 0.0 }
 0x626   : > { %v7168_v60 = vpop.f32.mrf.mxu0  ;;  %v7200_v61 = vpop.f32.mrf.mxu1 }
 0x627   : > { %5635 = vst [vmem:[#allocation6 + $0x60] sm:$0xff] %v5571_v0  ;;  %5667 = vst [vmem:[#allocation6 + $0x160] sm:$0xff] %v5603_v26  ;;  %v5574_v5 = vmax.f32 %v7168_v60, 0.0  ;;  %v5606_v27 = vmax.f32 %v7200_v61, 0.0 }
 0x628   : > { %v5355_v37 = vpop.f32.mrf.mxu0  ;;  %v5483_v47 = vpop.f32.mrf.mxu1 }
 0x629   : > { %5638 = vst [vmem:[#allocation6 + $0x78] sm:$0xff] %v5574_v5  ;;  %5670 = vst [vmem:[#allocation6 + $0x178] sm:$0xff] %v5606_v27  ;;  %v5572_v57 = vmax.f32 %v5355_v37, 0.0  ;;  %v5604_v58 = vmax.f32 %v5483_v47, 0.0 }
 0x62a   : > { %v7171_v4 = vpop.f32.mrf.mxu0  ;;  %v7203_v24 = vpop.f32.mrf.mxu1 }
 0x62b   : > { %5636 = vst [vmem:[#allocation6 + $0x68] sm:$0xff] %v5572_v57  ;;  %5668 = vst [vmem:[#allocation6 + $0x168] sm:$0xff] %v5604_v58  ;;  %v5577_v52 = vmax.f32 %v7171_v4, 0.0  ;;  %v5609_v22 = vmax.f32 %v7203_v24, 0.0 }
 0x62c   : > { %v5368_v15 = vpop.f32.mrf.mxu0  ;;  %v5496_v7 = vpop.f32.mrf.mxu1 }
 0x62d   : > { %5641 = vst [vmem:[#allocation6 + $0x90] sm:$0xff] %v5577_v52  ;;  %5673 = vst [vmem:[#allocation6 + $0x190] sm:$0xff] %v5609_v22  ;;  %v5575_v49 = vmax.f32 %v5368_v15, 0.0  ;;  %v5607_v6 = vmax.f32 %v5496_v7, 0.0 }
 0x62e   : > { %v7172_v32 = vpop.f32.mrf.mxu0  ;;  %v7204_v13 = vpop.f32.mrf.mxu1 }
 0x62f   : > { %5639 = vst [vmem:[#allocation6 + $0x80] sm:$0xff] %v5575_v49  ;;  %5671 = vst [vmem:[#allocation6 + $0x180] sm:$0xff] %v5607_v6  ;;  %v5578_v53 = vmax.f32 %v7172_v32, 0.0  ;;  %v5610_v63 = vmax.f32 %v7204_v13, 0.0 }
 0x630   : > { %v5371_v1 = vpop.f32.mrf.mxu0  ;;  %v5499_v2 = vpop.f32.mrf.mxu1 }
 0x631   : > { %5642 = vst [vmem:[#allocation6 + $0x98] sm:$0xff] %v5578_v53  ;;  %5674 = vst [vmem:[#allocation6 + $0x198] sm:$0xff] %v5610_v63  ;;  %v5576_v42 = vmax.f32 %v5371_v1, 0.0  ;;  %v5608_v8 = vmax.f32 %v5499_v2, 0.0 }
 0x632   : > { %v7175_v45 = vpop.f32.mrf.mxu0  ;;  %v7207_v50 = vpop.f32.mrf.mxu1 }
 0x633   : > { %5640 = vst [vmem:[#allocation6 + $0x88] sm:$0xff] %v5576_v42  ;;  %5672 = vst [vmem:[#allocation6 + $0x188] sm:$0xff] %v5608_v8  ;;  %v5581_v3 = vmax.f32 %v7175_v45, 0.0  ;;  %v5613_v10 = vmax.f32 %v7207_v50, 0.0 }
 0x634   : > { %v5384_v31 = vpop.f32.mrf.mxu0  ;;  %v5512_v46 = vpop.f32.mrf.mxu1 }
 0x635   : > { %5645 = vst [vmem:[#allocation6 + $0xb0] sm:$0xff] %v5581_v3  ;;  %5677 = vst [vmem:[#allocation6 + $0x1b0] sm:$0xff] %v5613_v10  ;;  %v5579_v11 = vmax.f32 %v5384_v31, 0.0  ;;  %v5611_v12 = vmax.f32 %v5512_v46, 0.0 }
 0x636   : > { %v7176_v19 = vpop.f32.mrf.mxu0  ;;  %v7208_v20 = vpop.f32.mrf.mxu1 }
 0x637   : > { %5643 = vst [vmem:[#allocation6 + $0xa0] sm:$0xff] %v5579_v11  ;;  %5675 = vst [vmem:[#allocation6 + $0x1a0] sm:$0xff] %v5611_v12  ;;  %v5582_v43 = vmax.f32 %v7176_v19, 0.0  ;;  %v5614_v41 = vmax.f32 %v7208_v20, 0.0 }
 0x638   : > { %v5387_v21 = vpop.f32.mrf.mxu0  ;;  %v5515_v28 = vpop.f32.mrf.mxu1 }
 0x639   : > { %5646 = vst [vmem:[#allocation6 + $0xb8] sm:$0xff] %v5582_v43  ;;  %5678 = vst [vmem:[#allocation6 + $0x1b8] sm:$0xff] %v5614_v41  ;;  %v5580_v36 = vmax.f32 %v5387_v21, 0.0  ;;  %v5612_v29 = vmax.f32 %v5515_v28, 0.0 }
 0x63a   : > { %v7179_v30 = vpop.f32.mrf.mxu0  ;;  %v7211_v54 = vpop.f32.mrf.mxu1 }
 0x63b   : > { %5644 = vst [vmem:[#allocation6 + $0xa8] sm:$0xff] %v5580_v36  ;;  %5676 = vst [vmem:[#allocation6 + $0x1a8] sm:$0xff] %v5612_v29  ;;  %v5585_v55 = vmax.f32 %v7179_v30, 0.0  ;;  %v5617_v56 = vmax.f32 %v7211_v54, 0.0 }
 0x63c   : > { %v5400_v16 = vpop.f32.mrf.mxu0  ;;  %v5528_v59 = vpop.f32.mrf.mxu1 }
 0x63d   : > { %5649 = vst [vmem:[#allocation6 + $0xd0] sm:$0xff] %v5585_v55  ;;  %5681 = vst [vmem:[#allocation6 + $0x1d0] sm:$0xff] %v5617_v56  ;;  %v5583_v62 = vmax.f32 %v5400_v16, 0.0  ;;  %v5615_v25 = vmax.f32 %v5528_v59, 0.0 }
 0x63e   : > { %v7180_v17 = vpop.f32.mrf.mxu0  ;;  %v7212_v18 = vpop.f32.mrf.mxu1 }
 0x63f   : > { %5647 = vst [vmem:[#allocation6 + $0xc0] sm:$0xff] %v5583_v62  ;;  %5679 = vst [vmem:[#allocation6 + $0x1c0] sm:$0xff] %v5615_v25  ;;  %v5586_v39 = vmax.f32 %v7180_v17, 0.0  ;;  %v5618_v14 = vmax.f32 %v7212_v18, 0.0 }
 0x640   : > { %v5403_v51 = vpop.f32.mrf.mxu0  ;;  %v5531_v35 = vpop.f32.mrf.mxu1 }
 0x641   : > { %5650 = vst [vmem:[#allocation6 + $0xd8] sm:$0xff] %v5586_v39  ;;  %5682 = vst [vmem:[#allocation6 + $0x1d8] sm:$0xff] %v5618_v14  ;;  %v5584_v48 = vmax.f32 %v5403_v51, 0.0  ;;  %v5616_v34 = vmax.f32 %v5531_v35, 0.0 }
 0x642   : > { %v7183_v44 = vpop.f32.mrf.mxu0  ;;  %v7215_v38 = vpop.f32.mrf.mxu1 }
 0x643   : > { %5648 = vst [vmem:[#allocation6 + $0xc8] sm:$0xff] %v5584_v48  ;;  %5680 = vst [vmem:[#allocation6 + $0x1c8] sm:$0xff] %v5616_v34  ;;  %v5589_v23 = vmax.f32 %v7183_v44, 0.0  ;;  %v5621_v9 = vmax.f32 %v7215_v38, 0.0 }
 0x644   : > { %v5416_v40 = vpop.f32.mrf.mxu0  ;;  %v5544_v33 = vpop.f32.mrf.mxu1 }
 0x645   : > { %5653 = vst [vmem:[#allocation6 + $0xf0] sm:$0xff] %v5589_v23  ;;  %5685 = vst [vmem:[#allocation6 + $0x1f0] sm:$0xff] %v5621_v9  ;;  %v5587_v0 = vmax.f32 %v5416_v40, 0.0  ;;  %v5619_v26 = vmax.f32 %v5544_v33, 0.0 }
 0x646   : > { %v7184_v60 = vpop.f32.mrf.mxu0  ;;  %v7216_v61 = vpop.f32.mrf.mxu1 }
 0x647   : > { %5651 = vst [vmem:[#allocation6 + $0xe0] sm:$0xff] %v5587_v0  ;;  %5683 = vst [vmem:[#allocation6 + $0x1e0] sm:$0xff] %v5619_v26  ;;  %v5590_v5 = vmax.f32 %v7184_v60, 0.0  ;;  %v5622_v27 = vmax.f32 %v7216_v61, 0.0 }
 0x648   : > { %v5419_v37 = vpop.f32.mrf.mxu0  ;;  %v5547_v47 = vpop.f32.mrf.mxu1 }
 0x649   : > { %5654 = vst [vmem:[#allocation6 + $0xf8] sm:$0xff] %v5590_v5  ;;  %5686 = vst [vmem:[#allocation6 + $0x1f8] sm:$0xff] %v5622_v27  ;;  %v5588_v57 = vmax.f32 %v5419_v37, 0.0  ;;  %v5620_v58 = vmax.f32 %v5547_v47, 0.0 }
 0x64b   : > { %5652 = vst [vmem:[#allocation6 + $0xe8] sm:$0xff] %v5588_v57  ;;  %5684 = vst [vmem:[#allocation6 + $0x1e8] sm:$0xff] %v5620_v58 }
 0x64c   : > { %7850 = shalt.err (!%p7847_p5)  }
 0x64d   : > { %5700 = dma.vmem_to_hbm [thread:$0]  %s5698_s26, 8192, %s9056_s3, [#allocation7 + $0x1] }
 0x64e   : > { %7893 = dma.done.wait [#allocation7 + $0x1], 8192 }
 0x64f   : > { %7894 = vsyncadd [#allocation7 + $0x1], 4294959104 }
 0x650 PF: > { %s17_s17 = sadd.s32 1, %s7917_s17   ;;  %s9379_s12 = smov %s7901_s13 }
 0x651   : > { %p14_p11 = scmp.ge.s32.totalorder %s17_s17, 3   ;;  %s9380_s13 = smov %s7905_s14 }
 0x652   : > { %s9381_s14 = smov %s8026_s23  ;;  %s9382_s15 = smov %s7913_s16 }
 0x653   : > { %s9383_s16 = smov %s9385_s30  ;;  %16 = sbr.rel (!%p14_p11) target bundleno = 5 (0x5), region = 108 }
 0x658   :  { %5704 = vsyncpa [#allocation9], 1 }
 0x659   :  { %5706 = vsyncpa [#allocation9 + $0x1], 1 }
 0x65a   :  { %5707 = vsyncpa [#allocation11], 1 }
 0x65b   :  { %5708 = vsyncmov [#allocation7] }
 0x65e   :  { %s5709_s29 = vpop.sfrf %5708 }
 0x65f   :  { %p6327_p12 = scmp.ne.s32.totalorder %s5709_s29, 0 }
 0x661   :  { %5713 = shalt.err (%p6327_p12)  }
 0x662   :  { %5715 = vsyncmov [#allocation7 + $0x1] }
 0x665   :  { %s5716_s5 = vpop.sfrf %5715 }
 0x666   :  { %p6328_p13 = scmp.ne.s32.totalorder %s5716_s5, 0 }
 0x668   :  { %5720 = shalt.err (%p6328_p13)  }

</bundles_post_ra>
